<compile_context>
chip_gen: v7x
topology: tpu7x:2x2x1
jax: 0.10.0
libtpu: 0.0.40
codegen_flags: <defaults>
</compile_context>

<pallas_src>
import jax
import jax.numpy as jnp
from jax.experimental import pallas as pl
from jax.experimental.pallas import tpu as pltpu

OUT_CHANNELS = 30
KERNEL_SIZE = 10
S_CHUNK = 8        # window-position strip (one f32 sublane row-group)
CH_GROUP = 6       # channels per accumulator group (30 = 5 * 6)


def _round_up(a, b):
    return (a + b - 1) // b * b


def _pick_tile_b(b_pad):
    """Largest lane tile in {512,384,256,128} that divides b_pad while keeping
    >= 2 grid steps (so both v7x TensorCores get work); 128 when b_pad == 128."""
    for t in (512, 384, 256, 128):
        if b_pad % t == 0 and (b_pad // t >= 2 or b_pad == 128):
            return t
    return 128


def cnn_stocks_kernel(x_ref, wconv_ref, bconv_ref, wlin_ref, blin_ref,
                      out_ref, pooled_ref, win_ref):
    # x_ref     : (W, TB) VMEM          -- batch tile on the lane axis
    # wconv_ref : (C, K)  SMEM          -- Conv1d weight (scalar reads)
    # bconv_ref : (C, 1)  VMEM          -- Conv1d bias
    # wlin_ref  : (C, 1)  VMEM          -- Linear weight (transposed)
    # blin_ref  : (1,)    SMEM          -- Linear bias
    # out_ref   : (1, TB) VMEM          -- lane-dense per-sample scores
    # pooled_ref: (C, TB) VMEM scratch  -- running max over window positions
    # win_ref   : (K, S_CHUNK, TB) VMEM -- staged, aligned window slices
    W = x_ref.shape[0]
    S = W - KERNEL_SIZE + 1
    n_full = S // S_CHUNK
    tail = S - n_full * S_CHUNK

    pooled_ref[...] = jnp.full(pooled_ref.shape, -jnp.inf, pooled_ref.dtype)

    def do_chunk(s0, s_len):
        # Stage the K sublane-misaligned window slices into an aligned VMEM
        # scratch once per chunk; the channel loops only read aligned rows.
        for k in range(KERNEL_SIZE):
            win_ref[k, pl.ds(0, s_len), :] = x_ref[pl.ds(s0 + k, s_len), :]
        # Conv1d MACs, k-outer / channel-group-inner: each loaded window slice
        # is reused across CH_GROUP accumulators; max-pool fused immediately so
        # only (s_len, TB) accumulators are ever live.
        for c0 in range(0, OUT_CHANNELS, CH_GROUP):
            chans = list(range(c0, min(c0 + CH_GROUP, OUT_CHANNELS)))
            x0 = win_ref[0, pl.ds(0, s_len), :]
            accs = [wconv_ref[c, 0] * x0 for c in chans]
            for k in range(1, KERNEL_SIZE):
                xk = win_ref[k, pl.ds(0, s_len), :]
                accs = [acc + wconv_ref[c, k] * xk for acc, c in zip(accs, chans)]
            for acc, c in zip(accs, chans):
                row = jnp.max(acc, axis=0, keepdims=True)                 # (1, TB)
                pooled_ref[pl.ds(c, 1), :] = jnp.maximum(
                    pooled_ref[pl.ds(c, 1), :], row)

    if n_full > 0:
        @pl.loop(0, n_full)
        def _(j):
            do_chunk(pl.multiple_of(j * S_CHUNK, 8), S_CHUNK)
    if tail > 0:
        do_chunk(n_full * S_CHUNK, tail)

    # Conv bias is constant over window positions -> commutes with the max-pool.
    pooled = pooled_ref[...] + bconv_ref[...]                             # (C, TB)

    # softmax over channels (sublane axis) fused with Linear(30 -> 1):
    #   out = (sum_c e_c * w_c) / (sum_c e_c) + b    (exact divide, one row)
    m = jnp.max(pooled, axis=0, keepdims=True)
    e = jnp.exp(pooled - m)
    den = jnp.sum(e, axis=0, keepdims=True)
    num = jnp.sum(e * wlin_ref[...], axis=0, keepdims=True)
    out_ref[...] = (num / den + blin_ref[0]).astype(out_ref.dtype)        # lane-dense


@jax.jit
def cnn_stocks_forward(x, w_conv, b_conv, w_lin, b_lin):
    """x: (B, W) float32. Returns (B,) float32 matching CNNStocksModule.forward."""
    B, W = x.shape
    S = W - KERNEL_SIZE + 1
    assert S >= 1, "window_length must be >= KERNEL_SIZE"

    b_pad = _round_up(B, 128)
    tile_b = _pick_tile_b(b_pad)
    grid = (b_pad // tile_b,)

    # Layout plumbing only: batch onto the lane axis, inside the same jit as the
    # pallas_call so XLA fuses the zero-pad into the transpose.
    x_t = jnp.pad(x.astype(jnp.float32).T, ((0, 0), (0, b_pad - B)))      # (W, b_pad)

    wconv_ck = w_conv.reshape(OUT_CHANNELS, KERNEL_SIZE).astype(jnp.float32)
    bconv_c1 = b_conv.astype(jnp.float32).reshape(OUT_CHANNELS, 1)
    wlin_c1 = w_lin.astype(jnp.float32).reshape(OUT_CHANNELS, 1)
    blin = b_lin.astype(jnp.float32).reshape(1)

    smem = pltpu.MemorySpace.SMEM
    vmem = pltpu.MemorySpace.VMEM

    # VMEM budget: double-buffered x block + scratch + headroom, capped at
    # 48 MiB (safe on v7x's 64 MiB as well as v5e/v6e's 128 MiB).
    need = (2 * W * tile_b * 4
            + (OUT_CHANNELS + KERNEL_SIZE * S_CHUNK + 4) * tile_b * 4
            + (1 << 20))
    vmem_limit = min(48 * 1024 * 1024, max(32 * 1024 * 1024, need * 5 // 4))

    out = pl.pallas_call(
        cnn_stocks_kernel,
        out_shape=jax.ShapeDtypeStruct((1, b_pad), jnp.float32),
        grid=grid,
        in_specs=[
            pl.BlockSpec((W, tile_b), lambda i: (0, i)),   # x: batch-tiled, pipelined
            pl.BlockSpec(memory_space=smem),               # conv weight scalars (C, K)
            pl.BlockSpec(memory_space=vmem),               # conv bias (C, 1)
            pl.BlockSpec(memory_space=vmem),               # linear weight (C, 1)
            pl.BlockSpec(memory_space=smem),               # linear bias (1,)
        ],
        out_specs=pl.BlockSpec((1, tile_b), lambda i: (0, i)),
        scratch_shapes=[
            pltpu.VMEM((OUT_CHANNELS, tile_b), jnp.float32),            # pooled max
            pltpu.VMEM((KERNEL_SIZE, S_CHUNK, tile_b), jnp.float32),    # staged windows
        ],
        compiler_params=pltpu.CompilerParams(
            dimension_semantics=("parallel",),     # shards batch tiles across v7x's 2 TCs
            vmem_limit_bytes=vmem_limit,
        ),
    )(x_t, wconv_ck, bconv_c1, wlin_c1, blin)

    return out[0, :B]                              # drop batch padding -> (B,)


def init_params(key):
    """Deterministic parameter init matching the PyTorch module's shapes."""
    k1, k2, k3, k4 = jax.random.split(key, 4)
    # Conv1d(1, 30, 10): weight (30, 1, 10), bias (30,)
    fan_in_conv = 1 * KERNEL_SIZE
    bound_c = 1.0 / jnp.sqrt(fan_in_conv)
    w_conv = jax.random.uniform(k1, (OUT_CHANNELS, 1, KERNEL_SIZE),
                                jnp.float32, -bound_c, bound_c)
    b_conv = jax.random.uniform(k2, (OUT_CHANNELS,), jnp.float32, -bound_c, bound_c)
    # Linear(30, 1): weight (1, 30), bias (1,)
    bound_l = 1.0 / jnp.sqrt(OUT_CHANNELS)
    w_lin = jax.random.uniform(k3, (1, OUT_CHANNELS), jnp.float32, -bound_l, bound_l)
    b_lin = jax.random.uniform(k4, (1,), jnp.float32, -bound_l, bound_l)
    return w_conv, b_conv, w_lin, b_lin


def reference_forward(x, w_conv, b_conv, w_lin, b_lin):
    """Pure-JAX reference of the PyTorch forward (for a sanity check)."""
    B, W = x.shape
    S = W - KERNEL_SIZE + 1
    idx = jnp.arange(S)[:, None] + jnp.arange(KERNEL_SIZE)[None, :]
    x_win = x[:, idx]                                               # (B, S, K)
    conv = jnp.einsum("bsk,ck->bsc", x_win, w_conv[:, 0, :]) + b_conv
    pooled = jnp.max(conv, axis=1)                                  # (B, C)
    sm = jax.nn.softmax(pooled, axis=1)
    return (sm @ w_lin.T + b_lin)[:, 0]


if __name__ == "__main__":
    key = jax.random.PRNGKey(0)
    kx, kp = jax.random.split(key)

    B = 8
    window_length = 16          # >= KERNEL_SIZE, num_scores = 7
    x = jax.random.normal(kx, (B, window_length), jnp.float32)

    w_conv, b_conv, w_lin, b_lin = init_params(kp)

    out = cnn_stocks_forward(x, w_conv, b_conv, w_lin, b_lin)
    out = jax.block_until_ready(out)

    ref = reference_forward(x, w_conv, b_conv, w_lin, b_lin)
    assert out.shape == (B,)
    assert jnp.allclose(out, ref, atol=2e-5, rtol=2e-5), (out, ref)

    print("KERNEL_OK")
</pallas_src>

<mosaic_0001>
module attributes {stable_mosaic.version = 11 : i64} {
  func.func @cnn_stocks_kernel(%arg0: i32, %arg1: memref<16x128xf32, #tpu.memory_space<vmem>>, %arg2: memref<30x10xf32, #tpu.memory_space<smem>>, %arg3: memref<30x1xf32, #tpu.memory_space<vmem>>, %arg4: memref<30x1xf32, #tpu.memory_space<vmem>>, %arg5: memref<1xf32, #tpu.memory_space<smem>>, %arg6: memref<1x128xf32, #tpu.memory_space<vmem>>, %arg7: memref<30x128xf32, #tpu.memory_space<vmem>>, %arg8: memref<10x8x128xf32, #tpu.memory_space<vmem>>) attributes {dimension_semantics = [#tpu.dimension_semantics<parallel>], iteration_bounds = array<i64: 1>, scalar_prefetch = 0 : i64, scratch_operands = 2 : i64, tpu.core_type = #tpu.core_type<tc>, window_params = [{transform_indices = @transform_0, window_bounds = array<i64: 16, 128>}, {transform_indices = @transform_1, window_bounds = array<i64: 30, 10>}, {pipeline_mode = #tpu.pipeline_mode<synchronous>, transform_indices = @transform_2, window_bounds = array<i64: 30, 1>}, {pipeline_mode = #tpu.pipeline_mode<synchronous>, transform_indices = @transform_3, window_bounds = array<i64: 30, 1>}, {transform_indices = @transform_4, window_bounds = array<i64: 1>}, {transform_indices = @transform_5, window_bounds = array<i64: 1, 128>}]} {
    %cst = arith.constant 0xFF800000 : f32
    %0 = vector.broadcast %cst : f32 to vector<30x128xf32>
    %c0 = arith.constant 0 : index
    %c0_0 = arith.constant 0 : index
    %1 = vector.load %arg7[%c0, %c0_0] : memref<30x128xf32, #tpu.memory_space<vmem>>, vector<30x128xf32>
    tpu.vector_store %arg7[%c0, %c0_0], %0 {strides = array<i32>} : memref<30x128xf32, #tpu.memory_space<vmem>>, vector<30x128xf32>,
    %c0_1 = arith.constant 0 : index
    %c0_2 = arith.constant 0 : index
    %2 = vector.load %arg1[%c0_1, %c0_2] : memref<16x128xf32, #tpu.memory_space<vmem>>, vector<7x128xf32>
    %c0_3 = arith.constant 0 : index
    %c0_4 = arith.constant 0 : index
    %c0_5 = arith.constant 0 : index
    %3 = vector.load %arg8[%c0_3, %c0_4, %c0_5] : memref<10x8x128xf32, #tpu.memory_space<vmem>>, vector<1x7x128xf32>
    %4 = vector.shape_cast %3 : vector<1x7x128xf32> to vector<7x128xf32>
    %5 = vector.shape_cast %2 : vector<7x128xf32> to vector<1x7x128xf32>
    tpu.vector_store %arg8[%c0_3, %c0_4, %c0_5], %5 {strides = array<i32>} : memref<10x8x128xf32, #tpu.memory_space<vmem>>, vector<1x7x128xf32>,
    %c1 = arith.constant 1 : index
    %c0_6 = arith.constant 0 : index
    %6 = vector.load %arg1[%c1, %c0_6] : memref<16x128xf32, #tpu.memory_space<vmem>>, vector<7x128xf32>
    %c1_7 = arith.constant 1 : index
    %c0_8 = arith.constant 0 : index
    %c0_9 = arith.constant 0 : index
    %7 = vector.load %arg8[%c1_7, %c0_8, %c0_9] : memref<10x8x128xf32, #tpu.memory_space<vmem>>, vector<1x7x128xf32>
    %8 = vector.shape_cast %7 : vector<1x7x128xf32> to vector<7x128xf32>
    %9 = vector.shape_cast %6 : vector<7x128xf32> to vector<1x7x128xf32>
    tpu.vector_store %arg8[%c1_7, %c0_8, %c0_9], %9 {strides = array<i32>} : memref<10x8x128xf32, #tpu.memory_space<vmem>>, vector<1x7x128xf32>,
    %c2 = arith.constant 2 : index
    %c0_10 = arith.constant 0 : index
    %10 = vector.load %arg1[%c2, %c0_10] : memref<16x128xf32, #tpu.memory_space<vmem>>, vector<7x128xf32>
    %c2_11 = arith.constant 2 : index
    %c0_12 = arith.constant 0 : index
    %c0_13 = arith.constant 0 : index
    %11 = vector.load %arg8[%c2_11, %c0_12, %c0_13] : memref<10x8x128xf32, #tpu.memory_space<vmem>>, vector<1x7x128xf32>
    %12 = vector.shape_cast %11 : vector<1x7x128xf32> to vector<7x128xf32>
    %13 = vector.shape_cast %10 : vector<7x128xf32> to vector<1x7x128xf32>
    tpu.vector_store %arg8[%c2_11, %c0_12, %c0_13], %13 {strides = array<i32>} : memref<10x8x128xf32, #tpu.memory_space<vmem>>, vector<1x7x128xf32>,
    %c3 = arith.constant 3 : index
    %c0_14 = arith.constant 0 : index
    %14 = vector.load %arg1[%c3, %c0_14] : memref<16x128xf32, #tpu.memory_space<vmem>>, vector<7x128xf32>
    %c3_15 = arith.constant 3 : index
    %c0_16 = arith.constant 0 : index
    %c0_17 = arith.constant 0 : index
    %15 = vector.load %arg8[%c3_15, %c0_16, %c0_17] : memref<10x8x128xf32, #tpu.memory_space<vmem>>, vector<1x7x128xf32>
    %16 = vector.shape_cast %15 : vector<1x7x128xf32> to vector<7x128xf32>
    %17 = vector.shape_cast %14 : vector<7x128xf32> to vector<1x7x128xf32>
    tpu.vector_store %arg8[%c3_15, %c0_16, %c0_17], %17 {strides = array<i32>} : memref<10x8x128xf32, #tpu.memory_space<vmem>>, vector<1x7x128xf32>,
    %c4 = arith.constant 4 : index
    %c0_18 = arith.constant 0 : index
    %18 = vector.load %arg1[%c4, %c0_18] : memref<16x128xf32, #tpu.memory_space<vmem>>, vector<7x128xf32>
    %c4_19 = arith.constant 4 : index
    %c0_20 = arith.constant 0 : index
    %c0_21 = arith.constant 0 : index
    %19 = vector.load %arg8[%c4_19, %c0_20, %c0_21] : memref<10x8x128xf32, #tpu.memory_space<vmem>>, vector<1x7x128xf32>
    %20 = vector.shape_cast %19 : vector<1x7x128xf32> to vector<7x128xf32>
    %21 = vector.shape_cast %18 : vector<7x128xf32> to vector<1x7x128xf32>
    tpu.vector_store %arg8[%c4_19, %c0_20, %c0_21], %21 {strides = array<i32>} : memref<10x8x128xf32, #tpu.memory_space<vmem>>, vector<1x7x128xf32>,
    %c5 = arith.constant 5 : index
    %c0_22 = arith.constant 0 : index
    %22 = vector.load %arg1[%c5, %c0_22] : memref<16x128xf32, #tpu.memory_space<vmem>>, vector<7x128xf32>
    %c5_23 = arith.constant 5 : index
    %c0_24 = arith.constant 0 : index
    %c0_25 = arith.constant 0 : index
    %23 = vector.load %arg8[%c5_23, %c0_24, %c0_25] : memref<10x8x128xf32, #tpu.memory_space<vmem>>, vector<1x7x128xf32>
    %24 = vector.shape_cast %23 : vector<1x7x128xf32> to vector<7x128xf32>
    %25 = vector.shape_cast %22 : vector<7x128xf32> to vector<1x7x128xf32>
    tpu.vector_store %arg8[%c5_23, %c0_24, %c0_25], %25 {strides = array<i32>} : memref<10x8x128xf32, #tpu.memory_space<vmem>>, vector<1x7x128xf32>,
    %c6 = arith.constant 6 : index
    %c0_26 = arith.constant 0 : index
    %26 = vector.load %arg1[%c6, %c0_26] : memref<16x128xf32, #tpu.memory_space<vmem>>, vector<7x128xf32>
    %c6_27 = arith.constant 6 : index
    %c0_28 = arith.constant 0 : index
    %c0_29 = arith.constant 0 : index
    %27 = vector.load %arg8[%c6_27, %c0_28, %c0_29] : memref<10x8x128xf32, #tpu.memory_space<vmem>>, vector<1x7x128xf32>
    %28 = vector.shape_cast %27 : vector<1x7x128xf32> to vector<7x128xf32>
    %29 = vector.shape_cast %26 : vector<7x128xf32> to vector<1x7x128xf32>
    tpu.vector_store %arg8[%c6_27, %c0_28, %c0_29], %29 {strides = array<i32>} : memref<10x8x128xf32, #tpu.memory_space<vmem>>, vector<1x7x128xf32>,
    %c7 = arith.constant 7 : index
    %c0_30 = arith.constant 0 : index
    %30 = vector.load %arg1[%c7, %c0_30] : memref<16x128xf32, #tpu.memory_space<vmem>>, vector<7x128xf32>
    %c7_31 = arith.constant 7 : index
    %c0_32 = arith.constant 0 : index
    %c0_33 = arith.constant 0 : index
    %31 = vector.load %arg8[%c7_31, %c0_32, %c0_33] : memref<10x8x128xf32, #tpu.memory_space<vmem>>, vector<1x7x128xf32>
    %32 = vector.shape_cast %31 : vector<1x7x128xf32> to vector<7x128xf32>
    %33 = vector.shape_cast %30 : vector<7x128xf32> to vector<1x7x128xf32>
    tpu.vector_store %arg8[%c7_31, %c0_32, %c0_33], %33 {strides = array<i32>} : memref<10x8x128xf32, #tpu.memory_space<vmem>>, vector<1x7x128xf32>,
    %c8 = arith.constant 8 : index
    %c0_34 = arith.constant 0 : index
    %34 = vector.load %arg1[%c8, %c0_34] : memref<16x128xf32, #tpu.memory_space<vmem>>, vector<7x128xf32>
    %c8_35 = arith.constant 8 : index
    %c0_36 = arith.constant 0 : index
    %c0_37 = arith.constant 0 : index
    %35 = vector.load %arg8[%c8_35, %c0_36, %c0_37] : memref<10x8x128xf32, #tpu.memory_space<vmem>>, vector<1x7x128xf32>
    %36 = vector.shape_cast %35 : vector<1x7x128xf32> to vector<7x128xf32>
    %37 = vector.shape_cast %34 : vector<7x128xf32> to vector<1x7x128xf32>
    tpu.vector_store %arg8[%c8_35, %c0_36, %c0_37], %37 {strides = array<i32>} : memref<10x8x128xf32, #tpu.memory_space<vmem>>, vector<1x7x128xf32>,
    %c9 = arith.constant 9 : index
    %c0_38 = arith.constant 0 : index
    %38 = vector.load %arg1[%c9, %c0_38] : memref<16x128xf32, #tpu.memory_space<vmem>>, vector<7x128xf32>
    %c9_39 = arith.constant 9 : index
    %c0_40 = arith.constant 0 : index
    %c0_41 = arith.constant 0 : index
    %39 = vector.load %arg8[%c9_39, %c0_40, %c0_41] : memref<10x8x128xf32, #tpu.memory_space<vmem>>, vector<1x7x128xf32>
    %40 = vector.shape_cast %39 : vector<1x7x128xf32> to vector<7x128xf32>
    %41 = vector.shape_cast %38 : vector<7x128xf32> to vector<1x7x128xf32>
    tpu.vector_store %arg8[%c9_39, %c0_40, %c0_41], %41 {strides = array<i32>} : memref<10x8x128xf32, #tpu.memory_space<vmem>>, vector<1x7x128xf32>,
    %c0_42 = arith.constant 0 : index
    %c0_43 = arith.constant 0 : index
    %c0_44 = arith.constant 0 : index
    %42 = vector.load %arg8[%c0_42, %c0_43, %c0_44] : memref<10x8x128xf32, #tpu.memory_space<vmem>>, vector<1x7x128xf32>
    %43 = vector.shape_cast %42 : vector<1x7x128xf32> to vector<7x128xf32>
    %c0_45 = arith.constant 0 : index
    %c0_46 = arith.constant 0 : index
    %44 = memref.load %arg2[%c0_45, %c0_46] : memref<30x10xf32, #tpu.memory_space<smem>>
    %45 = vector.broadcast %44 : f32 to vector<7x128xf32>
    %46 = arith.mulf %45, %43 : vector<7x128xf32>
    %c1_47 = arith.constant 1 : index
    %c0_48 = arith.constant 0 : index
    %47 = memref.load %arg2[%c1_47, %c0_48] : memref<30x10xf32, #tpu.memory_space<smem>>
    %48 = vector.broadcast %47 : f32 to vector<7x128xf32>
    %49 = arith.mulf %48, %43 : vector<7x128xf32>
    %c2_49 = arith.constant 2 : index
    %c0_50 = arith.constant 0 : index
    %50 = memref.load %arg2[%c2_49, %c0_50] : memref<30x10xf32, #tpu.memory_space<smem>>
    %51 = vector.broadcast %50 : f32 to vector<7x128xf32>
    %52 = arith.mulf %51, %43 : vector<7x128xf32>
    %c3_51 = arith.constant 3 : index
    %c0_52 = arith.constant 0 : index
    %53 = memref.load %arg2[%c3_51, %c0_52] : memref<30x10xf32, #tpu.memory_space<smem>>
    %54 = vector.broadcast %53 : f32 to vector<7x128xf32>
    %55 = arith.mulf %54, %43 : vector<7x128xf32>
    %c4_53 = arith.constant 4 : index
    %c0_54 = arith.constant 0 : index
    %56 = memref.load %arg2[%c4_53, %c0_54] : memref<30x10xf32, #tpu.memory_space<smem>>
    %57 = vector.broadcast %56 : f32 to vector<7x128xf32>
    %58 = arith.mulf %57, %43 : vector<7x128xf32>
    %c5_55 = arith.constant 5 : index
    %c0_56 = arith.constant 0 : index
    %59 = memref.load %arg2[%c5_55, %c0_56] : memref<30x10xf32, #tpu.memory_space<smem>>
    %60 = vector.broadcast %59 : f32 to vector<7x128xf32>
    %61 = arith.mulf %60, %43 : vector<7x128xf32>
    %c1_57 = arith.constant 1 : index
    %c0_58 = arith.constant 0 : index
    %c0_59 = arith.constant 0 : index
    %62 = vector.load %arg8[%c1_57, %c0_58, %c0_59] : memref<10x8x128xf32, #tpu.memory_space<vmem>>, vector<1x7x128xf32>
    %63 = vector.shape_cast %62 : vector<1x7x128xf32> to vector<7x128xf32>
    %c0_60 = arith.constant 0 : index
    %c1_61 = arith.constant 1 : index
    %64 = memref.load %arg2[%c0_60, %c1_61] : memref<30x10xf32, #tpu.memory_space<smem>>
    %65 = vector.broadcast %64 : f32 to vector<7x128xf32>
    %66 = arith.mulf %65, %63 : vector<7x128xf32>
    %67 = arith.addf %46, %66 : vector<7x128xf32>
    %c1_62 = arith.constant 1 : index
    %c1_63 = arith.constant 1 : index
    %68 = memref.load %arg2[%c1_62, %c1_63] : memref<30x10xf32, #tpu.memory_space<smem>>
    %69 = vector.broadcast %68 : f32 to vector<7x128xf32>
    %70 = arith.mulf %69, %63 : vector<7x128xf32>
    %71 = arith.addf %49, %70 : vector<7x128xf32>
    %c2_64 = arith.constant 2 : index
    %c1_65 = arith.constant 1 : index
    %72 = memref.load %arg2[%c2_64, %c1_65] : memref<30x10xf32, #tpu.memory_space<smem>>
    %73 = vector.broadcast %72 : f32 to vector<7x128xf32>
    %74 = arith.mulf %73, %63 : vector<7x128xf32>
    %75 = arith.addf %52, %74 : vector<7x128xf32>
    %c3_66 = arith.constant 3 : index
    %c1_67 = arith.constant 1 : index
    %76 = memref.load %arg2[%c3_66, %c1_67] : memref<30x10xf32, #tpu.memory_space<smem>>
    %77 = vector.broadcast %76 : f32 to vector<7x128xf32>
    %78 = arith.mulf %77, %63 : vector<7x128xf32>
    %79 = arith.addf %55, %78 : vector<7x128xf32>
    %c4_68 = arith.constant 4 : index
    %c1_69 = arith.constant 1 : index
    %80 = memref.load %arg2[%c4_68, %c1_69] : memref<30x10xf32, #tpu.memory_space<smem>>
    %81 = vector.broadcast %80 : f32 to vector<7x128xf32>
    %82 = arith.mulf %81, %63 : vector<7x128xf32>
    %83 = arith.addf %58, %82 : vector<7x128xf32>
    %c5_70 = arith.constant 5 : index
    %c1_71 = arith.constant 1 : index
    %84 = memref.load %arg2[%c5_70, %c1_71] : memref<30x10xf32, #tpu.memory_space<smem>>
    %85 = vector.broadcast %84 : f32 to vector<7x128xf32>
    %86 = arith.mulf %85, %63 : vector<7x128xf32>
    %87 = arith.addf %61, %86 : vector<7x128xf32>
    %c2_72 = arith.constant 2 : index
    %c0_73 = arith.constant 0 : index
    %c0_74 = arith.constant 0 : index
    %88 = vector.load %arg8[%c2_72, %c0_73, %c0_74] : memref<10x8x128xf32, #tpu.memory_space<vmem>>, vector<1x7x128xf32>
    %89 = vector.shape_cast %88 : vector<1x7x128xf32> to vector<7x128xf32>
    %c0_75 = arith.constant 0 : index
    %c2_76 = arith.constant 2 : index
    %90 = memref.load %arg2[%c0_75, %c2_76] : memref<30x10xf32, #tpu.memory_space<smem>>
    %91 = vector.broadcast %90 : f32 to vector<7x128xf32>
    %92 = arith.mulf %91, %89 : vector<7x128xf32>
    %93 = arith.addf %67, %92 : vector<7x128xf32>
    %c1_77 = arith.constant 1 : index
    %c2_78 = arith.constant 2 : index
    %94 = memref.load %arg2[%c1_77, %c2_78] : memref<30x10xf32, #tpu.memory_space<smem>>
    %95 = vector.broadcast %94 : f32 to vector<7x128xf32>
    %96 = arith.mulf %95, %89 : vector<7x128xf32>
    %97 = arith.addf %71, %96 : vector<7x128xf32>
    %c2_79 = arith.constant 2 : index
    %c2_80 = arith.constant 2 : index
    %98 = memref.load %arg2[%c2_79, %c2_80] : memref<30x10xf32, #tpu.memory_space<smem>>
    %99 = vector.broadcast %98 : f32 to vector<7x128xf32>
    %100 = arith.mulf %99, %89 : vector<7x128xf32>
    %101 = arith.addf %75, %100 : vector<7x128xf32>
    %c3_81 = arith.constant 3 : index
    %c2_82 = arith.constant 2 : index
    %102 = memref.load %arg2[%c3_81, %c2_82] : memref<30x10xf32, #tpu.memory_space<smem>>
    %103 = vector.broadcast %102 : f32 to vector<7x128xf32>
    %104 = arith.mulf %103, %89 : vector<7x128xf32>
    %105 = arith.addf %79, %104 : vector<7x128xf32>
    %c4_83 = arith.constant 4 : index
    %c2_84 = arith.constant 2 : index
    %106 = memref.load %arg2[%c4_83, %c2_84] : memref<30x10xf32, #tpu.memory_space<smem>>
    %107 = vector.broadcast %106 : f32 to vector<7x128xf32>
    %108 = arith.mulf %107, %89 : vector<7x128xf32>
    %109 = arith.addf %83, %108 : vector<7x128xf32>
    %c5_85 = arith.constant 5 : index
    %c2_86 = arith.constant 2 : index
    %110 = memref.load %arg2[%c5_85, %c2_86] : memref<30x10xf32, #tpu.memory_space<smem>>
    %111 = vector.broadcast %110 : f32 to vector<7x128xf32>
    %112 = arith.mulf %111, %89 : vector<7x128xf32>
    %113 = arith.addf %87, %112 : vector<7x128xf32>
    %c3_87 = arith.constant 3 : index
    %c0_88 = arith.constant 0 : index
    %c0_89 = arith.constant 0 : index
    %114 = vector.load %arg8[%c3_87, %c0_88, %c0_89] : memref<10x8x128xf32, #tpu.memory_space<vmem>>, vector<1x7x128xf32>
    %115 = vector.shape_cast %114 : vector<1x7x128xf32> to vector<7x128xf32>
    %c0_90 = arith.constant 0 : index
    %c3_91 = arith.constant 3 : index
    %116 = memref.load %arg2[%c0_90, %c3_91] : memref<30x10xf32, #tpu.memory_space<smem>>
    %117 = vector.broadcast %116 : f32 to vector<7x128xf32>
    %118 = arith.mulf %117, %115 : vector<7x128xf32>
    %119 = arith.addf %93, %118 : vector<7x128xf32>
    %c1_92 = arith.constant 1 : index
    %c3_93 = arith.constant 3 : index
    %120 = memref.load %arg2[%c1_92, %c3_93] : memref<30x10xf32, #tpu.memory_space<smem>>
    %121 = vector.broadcast %120 : f32 to vector<7x128xf32>
    %122 = arith.mulf %121, %115 : vector<7x128xf32>
    %123 = arith.addf %97, %122 : vector<7x128xf32>
    %c2_94 = arith.constant 2 : index
    %c3_95 = arith.constant 3 : index
    %124 = memref.load %arg2[%c2_94, %c3_95] : memref<30x10xf32, #tpu.memory_space<smem>>
    %125 = vector.broadcast %124 : f32 to vector<7x128xf32>
    %126 = arith.mulf %125, %115 : vector<7x128xf32>
    %127 = arith.addf %101, %126 : vector<7x128xf32>
    %c3_96 = arith.constant 3 : index
    %c3_97 = arith.constant 3 : index
    %128 = memref.load %arg2[%c3_96, %c3_97] : memref<30x10xf32, #tpu.memory_space<smem>>
    %129 = vector.broadcast %128 : f32 to vector<7x128xf32>
    %130 = arith.mulf %129, %115 : vector<7x128xf32>
    %131 = arith.addf %105, %130 : vector<7x128xf32>
    %c4_98 = arith.constant 4 : index
    %c3_99 = arith.constant 3 : index
    %132 = memref.load %arg2[%c4_98, %c3_99] : memref<30x10xf32, #tpu.memory_space<smem>>
    %133 = vector.broadcast %132 : f32 to vector<7x128xf32>
    %134 = arith.mulf %133, %115 : vector<7x128xf32>
    %135 = arith.addf %109, %134 : vector<7x128xf32>
    %c5_100 = arith.constant 5 : index
    %c3_101 = arith.constant 3 : index
    %136 = memref.load %arg2[%c5_100, %c3_101] : memref<30x10xf32, #tpu.memory_space<smem>>
    %137 = vector.broadcast %136 : f32 to vector<7x128xf32>
    %138 = arith.mulf %137, %115 : vector<7x128xf32>
    %139 = arith.addf %113, %138 : vector<7x128xf32>
    %c4_102 = arith.constant 4 : index
    %c0_103 = arith.constant 0 : index
    %c0_104 = arith.constant 0 : index
    %140 = vector.load %arg8[%c4_102, %c0_103, %c0_104] : memref<10x8x128xf32, #tpu.memory_space<vmem>>, vector<1x7x128xf32>
    %141 = vector.shape_cast %140 : vector<1x7x128xf32> to vector<7x128xf32>
    %c0_105 = arith.constant 0 : index
    %c4_106 = arith.constant 4 : index
    %142 = memref.load %arg2[%c0_105, %c4_106] : memref<30x10xf32, #tpu.memory_space<smem>>
    %143 = vector.broadcast %142 : f32 to vector<7x128xf32>
    %144 = arith.mulf %143, %141 : vector<7x128xf32>
    %145 = arith.addf %119, %144 : vector<7x128xf32>
    %c1_107 = arith.constant 1 : index
    %c4_108 = arith.constant 4 : index
    %146 = memref.load %arg2[%c1_107, %c4_108] : memref<30x10xf32, #tpu.memory_space<smem>>
    %147 = vector.broadcast %146 : f32 to vector<7x128xf32>
    %148 = arith.mulf %147, %141 : vector<7x128xf32>
    %149 = arith.addf %123, %148 : vector<7x128xf32>
    %c2_109 = arith.constant 2 : index
    %c4_110 = arith.constant 4 : index
    %150 = memref.load %arg2[%c2_109, %c4_110] : memref<30x10xf32, #tpu.memory_space<smem>>
    %151 = vector.broadcast %150 : f32 to vector<7x128xf32>
    %152 = arith.mulf %151, %141 : vector<7x128xf32>
    %153 = arith.addf %127, %152 : vector<7x128xf32>
    %c3_111 = arith.constant 3 : index
    %c4_112 = arith.constant 4 : index
    %154 = memref.load %arg2[%c3_111, %c4_112] : memref<30x10xf32, #tpu.memory_space<smem>>
    %155 = vector.broadcast %154 : f32 to vector<7x128xf32>
    %156 = arith.mulf %155, %141 : vector<7x128xf32>
    %157 = arith.addf %131, %156 : vector<7x128xf32>
    %c4_113 = arith.constant 4 : index
    %c4_114 = arith.constant 4 : index
    %158 = memref.load %arg2[%c4_113, %c4_114] : memref<30x10xf32, #tpu.memory_space<smem>>
    %159 = vector.broadcast %158 : f32 to vector<7x128xf32>
    %160 = arith.mulf %159, %141 : vector<7x128xf32>
    %161 = arith.addf %135, %160 : vector<7x128xf32>
    %c5_115 = arith.constant 5 : index
    %c4_116 = arith.constant 4 : index
    %162 = memref.load %arg2[%c5_115, %c4_116] : memref<30x10xf32, #tpu.memory_space<smem>>
    %163 = vector.broadcast %162 : f32 to vector<7x128xf32>
    %164 = arith.mulf %163, %141 : vector<7x128xf32>
    %165 = arith.addf %139, %164 : vector<7x128xf32>
    %c5_117 = arith.constant 5 : index
    %c0_118 = arith.constant 0 : index
    %c0_119 = arith.constant 0 : index
    %166 = vector.load %arg8[%c5_117, %c0_118, %c0_119] : memref<10x8x128xf32, #tpu.memory_space<vmem>>, vector<1x7x128xf32>
    %167 = vector.shape_cast %166 : vector<1x7x128xf32> to vector<7x128xf32>
    %c0_120 = arith.constant 0 : index
    %c5_121 = arith.constant 5 : index
    %168 = memref.load %arg2[%c0_120, %c5_121] : memref<30x10xf32, #tpu.memory_space<smem>>
    %169 = vector.broadcast %168 : f32 to vector<7x128xf32>
    %170 = arith.mulf %169, %167 : vector<7x128xf32>
    %171 = arith.addf %145, %170 : vector<7x128xf32>
    %c1_122 = arith.constant 1 : index
    %c5_123 = arith.constant 5 : index
    %172 = memref.load %arg2[%c1_122, %c5_123] : memref<30x10xf32, #tpu.memory_space<smem>>
    %173 = vector.broadcast %172 : f32 to vector<7x128xf32>
    %174 = arith.mulf %173, %167 : vector<7x128xf32>
    %175 = arith.addf %149, %174 : vector<7x128xf32>
    %c2_124 = arith.constant 2 : index
    %c5_125 = arith.constant 5 : index
    %176 = memref.load %arg2[%c2_124, %c5_125] : memref<30x10xf32, #tpu.memory_space<smem>>
    %177 = vector.broadcast %176 : f32 to vector<7x128xf32>
    %178 = arith.mulf %177, %167 : vector<7x128xf32>
    %179 = arith.addf %153, %178 : vector<7x128xf32>
    %c3_126 = arith.constant 3 : index
    %c5_127 = arith.constant 5 : index
    %180 = memref.load %arg2[%c3_126, %c5_127] : memref<30x10xf32, #tpu.memory_space<smem>>
    %181 = vector.broadcast %180 : f32 to vector<7x128xf32>
    %182 = arith.mulf %181, %167 : vector<7x128xf32>
    %183 = arith.addf %157, %182 : vector<7x128xf32>
    %c4_128 = arith.constant 4 : index
    %c5_129 = arith.constant 5 : index
    %184 = memref.load %arg2[%c4_128, %c5_129] : memref<30x10xf32, #tpu.memory_space<smem>>
    %185 = vector.broadcast %184 : f32 to vector<7x128xf32>
    %186 = arith.mulf %185, %167 : vector<7x128xf32>
    %187 = arith.addf %161, %186 : vector<7x128xf32>
    %c5_130 = arith.constant 5 : index
    %c5_131 = arith.constant 5 : index
    %188 = memref.load %arg2[%c5_130, %c5_131] : memref<30x10xf32, #tpu.memory_space<smem>>
    %189 = vector.broadcast %188 : f32 to vector<7x128xf32>
    %190 = arith.mulf %189, %167 : vector<7x128xf32>
    %191 = arith.addf %165, %190 : vector<7x128xf32>
    %c6_132 = arith.constant 6 : index
    %c0_133 = arith.constant 0 : index
    %c0_134 = arith.constant 0 : index
    %192 = vector.load %arg8[%c6_132, %c0_133, %c0_134] : memref<10x8x128xf32, #tpu.memory_space<vmem>>, vector<1x7x128xf32>
    %193 = vector.shape_cast %192 : vector<1x7x128xf32> to vector<7x128xf32>
    %c0_135 = arith.constant 0 : index
    %c6_136 = arith.constant 6 : index
    %194 = memref.load %arg2[%c0_135, %c6_136] : memref<30x10xf32, #tpu.memory_space<smem>>
    %195 = vector.broadcast %194 : f32 to vector<7x128xf32>
    %196 = arith.mulf %195, %193 : vector<7x128xf32>
    %197 = arith.addf %171, %196 : vector<7x128xf32>
    %c1_137 = arith.constant 1 : index
    %c6_138 = arith.constant 6 : index
    %198 = memref.load %arg2[%c1_137, %c6_138] : memref<30x10xf32, #tpu.memory_space<smem>>
    %199 = vector.broadcast %198 : f32 to vector<7x128xf32>
    %200 = arith.mulf %199, %193 : vector<7x128xf32>
    %201 = arith.addf %175, %200 : vector<7x128xf32>
    %c2_139 = arith.constant 2 : index
    %c6_140 = arith.constant 6 : index
    %202 = memref.load %arg2[%c2_139, %c6_140] : memref<30x10xf32, #tpu.memory_space<smem>>
    %203 = vector.broadcast %202 : f32 to vector<7x128xf32>
    %204 = arith.mulf %203, %193 : vector<7x128xf32>
    %205 = arith.addf %179, %204 : vector<7x128xf32>
    %c3_141 = arith.constant 3 : index
    %c6_142 = arith.constant 6 : index
    %206 = memref.load %arg2[%c3_141, %c6_142] : memref<30x10xf32, #tpu.memory_space<smem>>
    %207 = vector.broadcast %206 : f32 to vector<7x128xf32>
    %208 = arith.mulf %207, %193 : vector<7x128xf32>
    %209 = arith.addf %183, %208 : vector<7x128xf32>
    %c4_143 = arith.constant 4 : index
    %c6_144 = arith.constant 6 : index
    %210 = memref.load %arg2[%c4_143, %c6_144] : memref<30x10xf32, #tpu.memory_space<smem>>
    %211 = vector.broadcast %210 : f32 to vector<7x128xf32>
    %212 = arith.mulf %211, %193 : vector<7x128xf32>
    %213 = arith.addf %187, %212 : vector<7x128xf32>
    %c5_145 = arith.constant 5 : index
    %c6_146 = arith.constant 6 : index
    %214 = memref.load %arg2[%c5_145, %c6_146] : memref<30x10xf32, #tpu.memory_space<smem>>
    %215 = vector.broadcast %214 : f32 to vector<7x128xf32>
    %216 = arith.mulf %215, %193 : vector<7x128xf32>
    %217 = arith.addf %191, %216 : vector<7x128xf32>
    %c7_147 = arith.constant 7 : index
    %c0_148 = arith.constant 0 : index
    %c0_149 = arith.constant 0 : index
    %218 = vector.load %arg8[%c7_147, %c0_148, %c0_149] : memref<10x8x128xf32, #tpu.memory_space<vmem>>, vector<1x7x128xf32>
    %219 = vector.shape_cast %218 : vector<1x7x128xf32> to vector<7x128xf32>
    %c0_150 = arith.constant 0 : index
    %c7_151 = arith.constant 7 : index
    %220 = memref.load %arg2[%c0_150, %c7_151] : memref<30x10xf32, #tpu.memory_space<smem>>
    %221 = vector.broadcast %220 : f32 to vector<7x128xf32>
    %222 = arith.mulf %221, %219 : vector<7x128xf32>
    %223 = arith.addf %197, %222 : vector<7x128xf32>
    %c1_152 = arith.constant 1 : index
    %c7_153 = arith.constant 7 : index
    %224 = memref.load %arg2[%c1_152, %c7_153] : memref<30x10xf32, #tpu.memory_space<smem>>
    %225 = vector.broadcast %224 : f32 to vector<7x128xf32>
    %226 = arith.mulf %225, %219 : vector<7x128xf32>
    %227 = arith.addf %201, %226 : vector<7x128xf32>
    %c2_154 = arith.constant 2 : index
    %c7_155 = arith.constant 7 : index
    %228 = memref.load %arg2[%c2_154, %c7_155] : memref<30x10xf32, #tpu.memory_space<smem>>
    %229 = vector.broadcast %228 : f32 to vector<7x128xf32>
    %230 = arith.mulf %229, %219 : vector<7x128xf32>
    %231 = arith.addf %205, %230 : vector<7x128xf32>
    %c3_156 = arith.constant 3 : index
    %c7_157 = arith.constant 7 : index
    %232 = memref.load %arg2[%c3_156, %c7_157] : memref<30x10xf32, #tpu.memory_space<smem>>
    %233 = vector.broadcast %232 : f32 to vector<7x128xf32>
    %234 = arith.mulf %233, %219 : vector<7x128xf32>
    %235 = arith.addf %209, %234 : vector<7x128xf32>
    %c4_158 = arith.constant 4 : index
    %c7_159 = arith.constant 7 : index
    %236 = memref.load %arg2[%c4_158, %c7_159] : memref<30x10xf32, #tpu.memory_space<smem>>
    %237 = vector.broadcast %236 : f32 to vector<7x128xf32>
    %238 = arith.mulf %237, %219 : vector<7x128xf32>
    %239 = arith.addf %213, %238 : vector<7x128xf32>
    %c5_160 = arith.constant 5 : index
    %c7_161 = arith.constant 7 : index
    %240 = memref.load %arg2[%c5_160, %c7_161] : memref<30x10xf32, #tpu.memory_space<smem>>
    %241 = vector.broadcast %240 : f32 to vector<7x128xf32>
    %242 = arith.mulf %241, %219 : vector<7x128xf32>
    %243 = arith.addf %217, %242 : vector<7x128xf32>
    %c8_162 = arith.constant 8 : index
    %c0_163 = arith.constant 0 : index
    %c0_164 = arith.constant 0 : index
    %244 = vector.load %arg8[%c8_162, %c0_163, %c0_164] : memref<10x8x128xf32, #tpu.memory_space<vmem>>, vector<1x7x128xf32>
    %245 = vector.shape_cast %244 : vector<1x7x128xf32> to vector<7x128xf32>
    %c0_165 = arith.constant 0 : index
    %c8_166 = arith.constant 8 : index
    %246 = memref.load %arg2[%c0_165, %c8_166] : memref<30x10xf32, #tpu.memory_space<smem>>
    %247 = vector.broadcast %246 : f32 to vector<7x128xf32>
    %248 = arith.mulf %247, %245 : vector<7x128xf32>
    %249 = arith.addf %223, %248 : vector<7x128xf32>
    %c1_167 = arith.constant 1 : index
    %c8_168 = arith.constant 8 : index
    %250 = memref.load %arg2[%c1_167, %c8_168] : memref<30x10xf32, #tpu.memory_space<smem>>
    %251 = vector.broadcast %250 : f32 to vector<7x128xf32>
    %252 = arith.mulf %251, %245 : vector<7x128xf32>
    %253 = arith.addf %227, %252 : vector<7x128xf32>
    %c2_169 = arith.constant 2 : index
    %c8_170 = arith.constant 8 : index
    %254 = memref.load %arg2[%c2_169, %c8_170] : memref<30x10xf32, #tpu.memory_space<smem>>
    %255 = vector.broadcast %254 : f32 to vector<7x128xf32>
    %256 = arith.mulf %255, %245 : vector<7x128xf32>
    %257 = arith.addf %231, %256 : vector<7x128xf32>
    %c3_171 = arith.constant 3 : index
    %c8_172 = arith.constant 8 : index
    %258 = memref.load %arg2[%c3_171, %c8_172] : memref<30x10xf32, #tpu.memory_space<smem>>
    %259 = vector.broadcast %258 : f32 to vector<7x128xf32>
    %260 = arith.mulf %259, %245 : vector<7x128xf32>
    %261 = arith.addf %235, %260 : vector<7x128xf32>
    %c4_173 = arith.constant 4 : index
    %c8_174 = arith.constant 8 : index
    %262 = memref.load %arg2[%c4_173, %c8_174] : memref<30x10xf32, #tpu.memory_space<smem>>
    %263 = vector.broadcast %262 : f32 to vector<7x128xf32>
    %264 = arith.mulf %263, %245 : vector<7x128xf32>
    %265 = arith.addf %239, %264 : vector<7x128xf32>
    %c5_175 = arith.constant 5 : index
    %c8_176 = arith.constant 8 : index
    %266 = memref.load %arg2[%c5_175, %c8_176] : memref<30x10xf32, #tpu.memory_space<smem>>
    %267 = vector.broadcast %266 : f32 to vector<7x128xf32>
    %268 = arith.mulf %267, %245 : vector<7x128xf32>
    %269 = arith.addf %243, %268 : vector<7x128xf32>
    %c9_177 = arith.constant 9 : index
    %c0_178 = arith.constant 0 : index
    %c0_179 = arith.constant 0 : index
    %270 = vector.load %arg8[%c9_177, %c0_178, %c0_179] : memref<10x8x128xf32, #tpu.memory_space<vmem>>, vector<1x7x128xf32>
    %271 = vector.shape_cast %270 : vector<1x7x128xf32> to vector<7x128xf32>
    %c0_180 = arith.constant 0 : index
    %c9_181 = arith.constant 9 : index
    %272 = memref.load %arg2[%c0_180, %c9_181] : memref<30x10xf32, #tpu.memory_space<smem>>
    %273 = vector.broadcast %272 : f32 to vector<7x128xf32>
    %274 = arith.mulf %273, %271 : vector<7x128xf32>
    %275 = arith.addf %249, %274 : vector<7x128xf32>
    %c1_182 = arith.constant 1 : index
    %c9_183 = arith.constant 9 : index
    %276 = memref.load %arg2[%c1_182, %c9_183] : memref<30x10xf32, #tpu.memory_space<smem>>
    %277 = vector.broadcast %276 : f32 to vector<7x128xf32>
    %278 = arith.mulf %277, %271 : vector<7x128xf32>
    %279 = arith.addf %253, %278 : vector<7x128xf32>
    %c2_184 = arith.constant 2 : index
    %c9_185 = arith.constant 9 : index
    %280 = memref.load %arg2[%c2_184, %c9_185] : memref<30x10xf32, #tpu.memory_space<smem>>
    %281 = vector.broadcast %280 : f32 to vector<7x128xf32>
    %282 = arith.mulf %281, %271 : vector<7x128xf32>
    %283 = arith.addf %257, %282 : vector<7x128xf32>
    %c3_186 = arith.constant 3 : index
    %c9_187 = arith.constant 9 : index
    %284 = memref.load %arg2[%c3_186, %c9_187] : memref<30x10xf32, #tpu.memory_space<smem>>
    %285 = vector.broadcast %284 : f32 to vector<7x128xf32>
    %286 = arith.mulf %285, %271 : vector<7x128xf32>
    %287 = arith.addf %261, %286 : vector<7x128xf32>
    %c4_188 = arith.constant 4 : index
    %c9_189 = arith.constant 9 : index
    %288 = memref.load %arg2[%c4_188, %c9_189] : memref<30x10xf32, #tpu.memory_space<smem>>
    %289 = vector.broadcast %288 : f32 to vector<7x128xf32>
    %290 = arith.mulf %289, %271 : vector<7x128xf32>
    %291 = arith.addf %265, %290 : vector<7x128xf32>
    %c5_190 = arith.constant 5 : index
    %c9_191 = arith.constant 9 : index
    %292 = memref.load %arg2[%c5_190, %c9_191] : memref<30x10xf32, #tpu.memory_space<smem>>
    %293 = vector.broadcast %292 : f32 to vector<7x128xf32>
    %294 = arith.mulf %293, %271 : vector<7x128xf32>
    %295 = arith.addf %269, %294 : vector<7x128xf32>
    %cst_192 = arith.constant dense<0xFF800000> : vector<128xf32>
    %296 = vector.multi_reduction <maximumf>, %275, %cst_192 [0] : vector<7x128xf32> to vector<128xf32>
    %297 = vector.shape_cast %296 : vector<128xf32> to vector<1x128xf32>
    %c0_193 = arith.constant 0 : index
    %c0_194 = arith.constant 0 : index
    %298 = vector.load %arg7[%c0_193, %c0_194] : memref<30x128xf32, #tpu.memory_space<vmem>>, vector<1x128xf32>
    %299 = arith.maximumf %298, %297 : vector<1x128xf32>
    %c0_195 = arith.constant 0 : index
    %c0_196 = arith.constant 0 : index
    %300 = vector.load %arg7[%c0_195, %c0_196] : memref<30x128xf32, #tpu.memory_space<vmem>>, vector<1x128xf32>
    tpu.vector_store %arg7[%c0_195, %c0_196], %299 {strides = array<i32>} : memref<30x128xf32, #tpu.memory_space<vmem>>, vector<1x128xf32>,
    %cst_197 = arith.constant dense<0xFF800000> : vector<128xf32>
    %301 = vector.multi_reduction <maximumf>, %279, %cst_197 [0] : vector<7x128xf32> to vector<128xf32>
    %302 = vector.shape_cast %301 : vector<128xf32> to vector<1x128xf32>
    %c1_198 = arith.constant 1 : index
    %c0_199 = arith.constant 0 : index
    %303 = vector.load %arg7[%c1_198, %c0_199] : memref<30x128xf32, #tpu.memory_space<vmem>>, vector<1x128xf32>
    %304 = arith.maximumf %303, %302 : vector<1x128xf32>
    %c1_200 = arith.constant 1 : index
    %c0_201 = arith.constant 0 : index
    %305 = vector.load %arg7[%c1_200, %c0_201] : memref<30x128xf32, #tpu.memory_space<vmem>>, vector<1x128xf32>
    tpu.vector_store %arg7[%c1_200, %c0_201], %304 {strides = array<i32>} : memref<30x128xf32, #tpu.memory_space<vmem>>, vector<1x128xf32>,
    %cst_202 = arith.constant dense<0xFF800000> : vector<128xf32>
    %306 = vector.multi_reduction <maximumf>, %283, %cst_202 [0] : vector<7x128xf32> to vector<128xf32>
    %307 = vector.shape_cast %306 : vector<128xf32> to vector<1x128xf32>
    %c2_203 = arith.constant 2 : index
    %c0_204 = arith.constant 0 : index
    %308 = vector.load %arg7[%c2_203, %c0_204] : memref<30x128xf32, #tpu.memory_space<vmem>>, vector<1x128xf32>
    %309 = arith.maximumf %308, %307 : vector<1x128xf32>
    %c2_205 = arith.constant 2 : index
    %c0_206 = arith.constant 0 : index
    %310 = vector.load %arg7[%c2_205, %c0_206] : memref<30x128xf32, #tpu.memory_space<vmem>>, vector<1x128xf32>
    tpu.vector_store %arg7[%c2_205, %c0_206], %309 {strides = array<i32>} : memref<30x128xf32, #tpu.memory_space<vmem>>, vector<1x128xf32>,
    %cst_207 = arith.constant dense<0xFF800000> : vector<128xf32>
    %311 = vector.multi_reduction <maximumf>, %287, %cst_207 [0] : vector<7x128xf32> to vector<128xf32>
    %312 = vector.shape_cast %311 : vector<128xf32> to vector<1x128xf32>
    %c3_208 = arith.constant 3 : index
    %c0_209 = arith.constant 0 : index
    %313 = vector.load %arg7[%c3_208, %c0_209] : memref<30x128xf32, #tpu.memory_space<vmem>>, vector<1x128xf32>
    %314 = arith.maximumf %313, %312 : vector<1x128xf32>
    %c3_210 = arith.constant 3 : index
    %c0_211 = arith.constant 0 : index
    %315 = vector.load %arg7[%c3_210, %c0_211] : memref<30x128xf32, #tpu.memory_space<vmem>>, vector<1x128xf32>
    tpu.vector_store %arg7[%c3_210, %c0_211], %314 {strides = array<i32>} : memref<30x128xf32, #tpu.memory_space<vmem>>, vector<1x128xf32>,
    %cst_212 = arith.constant dense<0xFF800000> : vector<128xf32>
    %316 = vector.multi_reduction <maximumf>, %291, %cst_212 [0] : vector<7x128xf32> to vector<128xf32>
    %317 = vector.shape_cast %316 : vector<128xf32> to vector<1x128xf32>
    %c4_213 = arith.constant 4 : index
    %c0_214 = arith.constant 0 : index
    %318 = vector.load %arg7[%c4_213, %c0_214] : memref<30x128xf32, #tpu.memory_space<vmem>>, vector<1x128xf32>
    %319 = arith.maximumf %318, %317 : vector<1x128xf32>
    %c4_215 = arith.constant 4 : index
    %c0_216 = arith.constant 0 : index
    %320 = vector.load %arg7[%c4_215, %c0_216] : memref<30x128xf32, #tpu.memory_space<vmem>>, vector<1x128xf32>
    tpu.vector_store %arg7[%c4_215, %c0_216], %319 {strides = array<i32>} : memref<30x128xf32, #tpu.memory_space<vmem>>, vector<1x128xf32>,
    %cst_217 = arith.constant dense<0xFF800000> : vector<128xf32>
    %321 = vector.multi_reduction <maximumf>, %295, %cst_217 [0] : vector<7x128xf32> to vector<128xf32>
    %322 = vector.shape_cast %321 : vector<128xf32> to vector<1x128xf32>
    %c5_218 = arith.constant 5 : index
    %c0_219 = arith.constant 0 : index
    %323 = vector.load %arg7[%c5_218, %c0_219] : memref<30x128xf32, #tpu.memory_space<vmem>>, vector<1x128xf32>
    %324 = arith.maximumf %323, %322 : vector<1x128xf32>
    %c5_220 = arith.constant 5 : index
    %c0_221 = arith.constant 0 : index
    %325 = vector.load %arg7[%c5_220, %c0_221] : memref<30x128xf32, #tpu.memory_space<vmem>>, vector<1x128xf32>
    tpu.vector_store %arg7[%c5_220, %c0_221], %324 {strides = array<i32>} : memref<30x128xf32, #tpu.memory_space<vmem>>, vector<1x128xf32>,
    %c0_222 = arith.constant 0 : index
    %c0_223 = arith.constant 0 : index
    %c0_224 = arith.constant 0 : index
    %326 = vector.load %arg8[%c0_222, %c0_223, %c0_224] : memref<10x8x128xf32, #tpu.memory_space<vmem>>, vector<1x7x128xf32>
    %327 = vector.shape_cast %326 : vector<1x7x128xf32> to vector<7x128xf32>
    %c6_225 = arith.constant 6 : index
    %c0_226 = arith.constant 0 : index
    %328 = memref.load %arg2[%c6_225, %c0_226] : memref<30x10xf32, #tpu.memory_space<smem>>
    %329 = vector.broadcast %328 : f32 to vector<7x128xf32>
    %330 = arith.mulf %329, %327 : vector<7x128xf32>
    %c7_227 = arith.constant 7 : index
    %c0_228 = arith.constant 0 : index
    %331 = memref.load %arg2[%c7_227, %c0_228] : memref<30x10xf32, #tpu.memory_space<smem>>
    %332 = vector.broadcast %331 : f32 to vector<7x128xf32>
    %333 = arith.mulf %332, %327 : vector<7x128xf32>
    %c8_229 = arith.constant 8 : index
    %c0_230 = arith.constant 0 : index
    %334 = memref.load %arg2[%c8_229, %c0_230] : memref<30x10xf32, #tpu.memory_space<smem>>
    %335 = vector.broadcast %334 : f32 to vector<7x128xf32>
    %336 = arith.mulf %335, %327 : vector<7x128xf32>
    %c9_231 = arith.constant 9 : index
    %c0_232 = arith.constant 0 : index
    %337 = memref.load %arg2[%c9_231, %c0_232] : memref<30x10xf32, #tpu.memory_space<smem>>
    %338 = vector.broadcast %337 : f32 to vector<7x128xf32>
    %339 = arith.mulf %338, %327 : vector<7x128xf32>
    %c10 = arith.constant 10 : index
    %c0_233 = arith.constant 0 : index
    %340 = memref.load %arg2[%c10, %c0_233] : memref<30x10xf32, #tpu.memory_space<smem>>
    %341 = vector.broadcast %340 : f32 to vector<7x128xf32>
    %342 = arith.mulf %341, %327 : vector<7x128xf32>
    %c11 = arith.constant 11 : index
    %c0_234 = arith.constant 0 : index
    %343 = memref.load %arg2[%c11, %c0_234] : memref<30x10xf32, #tpu.memory_space<smem>>
    %344 = vector.broadcast %343 : f32 to vector<7x128xf32>
    %345 = arith.mulf %344, %327 : vector<7x128xf32>
    %c1_235 = arith.constant 1 : index
    %c0_236 = arith.constant 0 : index
    %c0_237 = arith.constant 0 : index
    %346 = vector.load %arg8[%c1_235, %c0_236, %c0_237] : memref<10x8x128xf32, #tpu.memory_space<vmem>>, vector<1x7x128xf32>
    %347 = vector.shape_cast %346 : vector<1x7x128xf32> to vector<7x128xf32>
    %c6_238 = arith.constant 6 : index
    %c1_239 = arith.constant 1 : index
    %348 = memref.load %arg2[%c6_238, %c1_239] : memref<30x10xf32, #tpu.memory_space<smem>>
    %349 = vector.broadcast %348 : f32 to vector<7x128xf32>
    %350 = arith.mulf %349, %347 : vector<7x128xf32>
    %351 = arith.addf %330, %350 : vector<7x128xf32>
    %c7_240 = arith.constant 7 : index
    %c1_241 = arith.constant 1 : index
    %352 = memref.load %arg2[%c7_240, %c1_241] : memref<30x10xf32, #tpu.memory_space<smem>>
    %353 = vector.broadcast %352 : f32 to vector<7x128xf32>
    %354 = arith.mulf %353, %347 : vector<7x128xf32>
    %355 = arith.addf %333, %354 : vector<7x128xf32>
    %c8_242 = arith.constant 8 : index
    %c1_243 = arith.constant 1 : index
    %356 = memref.load %arg2[%c8_242, %c1_243] : memref<30x10xf32, #tpu.memory_space<smem>>
    %357 = vector.broadcast %356 : f32 to vector<7x128xf32>
    %358 = arith.mulf %357, %347 : vector<7x128xf32>
    %359 = arith.addf %336, %358 : vector<7x128xf32>
    %c9_244 = arith.constant 9 : index
    %c1_245 = arith.constant 1 : index
    %360 = memref.load %arg2[%c9_244, %c1_245] : memref<30x10xf32, #tpu.memory_space<smem>>
    %361 = vector.broadcast %360 : f32 to vector<7x128xf32>
    %362 = arith.mulf %361, %347 : vector<7x128xf32>
    %363 = arith.addf %339, %362 : vector<7x128xf32>
    %c10_246 = arith.constant 10 : index
    %c1_247 = arith.constant 1 : index
    %364 = memref.load %arg2[%c10_246, %c1_247] : memref<30x10xf32, #tpu.memory_space<smem>>
    %365 = vector.broadcast %364 : f32 to vector<7x128xf32>
    %366 = arith.mulf %365, %347 : vector<7x128xf32>
    %367 = arith.addf %342, %366 : vector<7x128xf32>
    %c11_248 = arith.constant 11 : index
    %c1_249 = arith.constant 1 : index
    %368 = memref.load %arg2[%c11_248, %c1_249] : memref<30x10xf32, #tpu.memory_space<smem>>
    %369 = vector.broadcast %368 : f32 to vector<7x128xf32>
    %370 = arith.mulf %369, %347 : vector<7x128xf32>
    %371 = arith.addf %345, %370 : vector<7x128xf32>
    %c2_250 = arith.constant 2 : index
    %c0_251 = arith.constant 0 : index
    %c0_252 = arith.constant 0 : index
    %372 = vector.load %arg8[%c2_250, %c0_251, %c0_252] : memref<10x8x128xf32, #tpu.memory_space<vmem>>, vector<1x7x128xf32>
    %373 = vector.shape_cast %372 : vector<1x7x128xf32> to vector<7x128xf32>
    %c6_253 = arith.constant 6 : index
    %c2_254 = arith.constant 2 : index
    %374 = memref.load %arg2[%c6_253, %c2_254] : memref<30x10xf32, #tpu.memory_space<smem>>
    %375 = vector.broadcast %374 : f32 to vector<7x128xf32>
    %376 = arith.mulf %375, %373 : vector<7x128xf32>
    %377 = arith.addf %351, %376 : vector<7x128xf32>
    %c7_255 = arith.constant 7 : index
    %c2_256 = arith.constant 2 : index
    %378 = memref.load %arg2[%c7_255, %c2_256] : memref<30x10xf32, #tpu.memory_space<smem>>
    %379 = vector.broadcast %378 : f32 to vector<7x128xf32>
    %380 = arith.mulf %379, %373 : vector<7x128xf32>
    %381 = arith.addf %355, %380 : vector<7x128xf32>
    %c8_257 = arith.constant 8 : index
    %c2_258 = arith.constant 2 : index
    %382 = memref.load %arg2[%c8_257, %c2_258] : memref<30x10xf32, #tpu.memory_space<smem>>
    %383 = vector.broadcast %382 : f32 to vector<7x128xf32>
    %384 = arith.mulf %383, %373 : vector<7x128xf32>
    %385 = arith.addf %359, %384 : vector<7x128xf32>
    %c9_259 = arith.constant 9 : index
    %c2_260 = arith.constant 2 : index
    %386 = memref.load %arg2[%c9_259, %c2_260] : memref<30x10xf32, #tpu.memory_space<smem>>
    %387 = vector.broadcast %386 : f32 to vector<7x128xf32>
    %388 = arith.mulf %387, %373 : vector<7x128xf32>
    %389 = arith.addf %363, %388 : vector<7x128xf32>
    %c10_261 = arith.constant 10 : index
    %c2_262 = arith.constant 2 : index
    %390 = memref.load %arg2[%c10_261, %c2_262] : memref<30x10xf32, #tpu.memory_space<smem>>
    %391 = vector.broadcast %390 : f32 to vector<7x128xf32>
    %392 = arith.mulf %391, %373 : vector<7x128xf32>
    %393 = arith.addf %367, %392 : vector<7x128xf32>
    %c11_263 = arith.constant 11 : index
    %c2_264 = arith.constant 2 : index
    %394 = memref.load %arg2[%c11_263, %c2_264] : memref<30x10xf32, #tpu.memory_space<smem>>
    %395 = vector.broadcast %394 : f32 to vector<7x128xf32>
    %396 = arith.mulf %395, %373 : vector<7x128xf32>
    %397 = arith.addf %371, %396 : vector<7x128xf32>
    %c3_265 = arith.constant 3 : index
    %c0_266 = arith.constant 0 : index
    %c0_267 = arith.constant 0 : index
    %398 = vector.load %arg8[%c3_265, %c0_266, %c0_267] : memref<10x8x128xf32, #tpu.memory_space<vmem>>, vector<1x7x128xf32>
    %399 = vector.shape_cast %398 : vector<1x7x128xf32> to vector<7x128xf32>
    %c6_268 = arith.constant 6 : index
    %c3_269 = arith.constant 3 : index
    %400 = memref.load %arg2[%c6_268, %c3_269] : memref<30x10xf32, #tpu.memory_space<smem>>
    %401 = vector.broadcast %400 : f32 to vector<7x128xf32>
    %402 = arith.mulf %401, %399 : vector<7x128xf32>
    %403 = arith.addf %377, %402 : vector<7x128xf32>
    %c7_270 = arith.constant 7 : index
    %c3_271 = arith.constant 3 : index
    %404 = memref.load %arg2[%c7_270, %c3_271] : memref<30x10xf32, #tpu.memory_space<smem>>
    %405 = vector.broadcast %404 : f32 to vector<7x128xf32>
    %406 = arith.mulf %405, %399 : vector<7x128xf32>
    %407 = arith.addf %381, %406 : vector<7x128xf32>
    %c8_272 = arith.constant 8 : index
    %c3_273 = arith.constant 3 : index
    %408 = memref.load %arg2[%c8_272, %c3_273] : memref<30x10xf32, #tpu.memory_space<smem>>
    %409 = vector.broadcast %408 : f32 to vector<7x128xf32>
    %410 = arith.mulf %409, %399 : vector<7x128xf32>
    %411 = arith.addf %385, %410 : vector<7x128xf32>
    %c9_274 = arith.constant 9 : index
    %c3_275 = arith.constant 3 : index
    %412 = memref.load %arg2[%c9_274, %c3_275] : memref<30x10xf32, #tpu.memory_space<smem>>
    %413 = vector.broadcast %412 : f32 to vector<7x128xf32>
    %414 = arith.mulf %413, %399 : vector<7x128xf32>
    %415 = arith.addf %389, %414 : vector<7x128xf32>
    %c10_276 = arith.constant 10 : index
    %c3_277 = arith.constant 3 : index
    %416 = memref.load %arg2[%c10_276, %c3_277] : memref<30x10xf32, #tpu.memory_space<smem>>
    %417 = vector.broadcast %416 : f32 to vector<7x128xf32>
    %418 = arith.mulf %417, %399 : vector<7x128xf32>
    %419 = arith.addf %393, %418 : vector<7x128xf32>
    %c11_278 = arith.constant 11 : index
    %c3_279 = arith.constant 3 : index
    %420 = memref.load %arg2[%c11_278, %c3_279] : memref<30x10xf32, #tpu.memory_space<smem>>
    %421 = vector.broadcast %420 : f32 to vector<7x128xf32>
    %422 = arith.mulf %421, %399 : vector<7x128xf32>
    %423 = arith.addf %397, %422 : vector<7x128xf32>
    %c4_280 = arith.constant 4 : index
    %c0_281 = arith.constant 0 : index
    %c0_282 = arith.constant 0 : index
    %424 = vector.load %arg8[%c4_280, %c0_281, %c0_282] : memref<10x8x128xf32, #tpu.memory_space<vmem>>, vector<1x7x128xf32>
    %425 = vector.shape_cast %424 : vector<1x7x128xf32> to vector<7x128xf32>
    %c6_283 = arith.constant 6 : index
    %c4_284 = arith.constant 4 : index
    %426 = memref.load %arg2[%c6_283, %c4_284] : memref<30x10xf32, #tpu.memory_space<smem>>
    %427 = vector.broadcast %426 : f32 to vector<7x128xf32>
    %428 = arith.mulf %427, %425 : vector<7x128xf32>
    %429 = arith.addf %403, %428 : vector<7x128xf32>
    %c7_285 = arith.constant 7 : index
    %c4_286 = arith.constant 4 : index
    %430 = memref.load %arg2[%c7_285, %c4_286] : memref<30x10xf32, #tpu.memory_space<smem>>
    %431 = vector.broadcast %430 : f32 to vector<7x128xf32>
    %432 = arith.mulf %431, %425 : vector<7x128xf32>
    %433 = arith.addf %407, %432 : vector<7x128xf32>
    %c8_287 = arith.constant 8 : index
    %c4_288 = arith.constant 4 : index
    %434 = memref.load %arg2[%c8_287, %c4_288] : memref<30x10xf32, #tpu.memory_space<smem>>
    %435 = vector.broadcast %434 : f32 to vector<7x128xf32>
    %436 = arith.mulf %435, %425 : vector<7x128xf32>
    %437 = arith.addf %411, %436 : vector<7x128xf32>
    %c9_289 = arith.constant 9 : index
    %c4_290 = arith.constant 4 : index
    %438 = memref.load %arg2[%c9_289, %c4_290] : memref<30x10xf32, #tpu.memory_space<smem>>
    %439 = vector.broadcast %438 : f32 to vector<7x128xf32>
    %440 = arith.mulf %439, %425 : vector<7x128xf32>
    %441 = arith.addf %415, %440 : vector<7x128xf32>
    %c10_291 = arith.constant 10 : index
    %c4_292 = arith.constant 4 : index
    %442 = memref.load %arg2[%c10_291, %c4_292] : memref<30x10xf32, #tpu.memory_space<smem>>
    %443 = vector.broadcast %442 : f32 to vector<7x128xf32>
    %444 = arith.mulf %443, %425 : vector<7x128xf32>
    %445 = arith.addf %419, %444 : vector<7x128xf32>
    %c11_293 = arith.constant 11 : index
    %c4_294 = arith.constant 4 : index
    %446 = memref.load %arg2[%c11_293, %c4_294] : memref<30x10xf32, #tpu.memory_space<smem>>
    %447 = vector.broadcast %446 : f32 to vector<7x128xf32>
    %448 = arith.mulf %447, %425 : vector<7x128xf32>
    %449 = arith.addf %423, %448 : vector<7x128xf32>
    %c5_295 = arith.constant 5 : index
    %c0_296 = arith.constant 0 : index
    %c0_297 = arith.constant 0 : index
    %450 = vector.load %arg8[%c5_295, %c0_296, %c0_297] : memref<10x8x128xf32, #tpu.memory_space<vmem>>, vector<1x7x128xf32>
    %451 = vector.shape_cast %450 : vector<1x7x128xf32> to vector<7x128xf32>
    %c6_298 = arith.constant 6 : index
    %c5_299 = arith.constant 5 : index
    %452 = memref.load %arg2[%c6_298, %c5_299] : memref<30x10xf32, #tpu.memory_space<smem>>
    %453 = vector.broadcast %452 : f32 to vector<7x128xf32>
    %454 = arith.mulf %453, %451 : vector<7x128xf32>
    %455 = arith.addf %429, %454 : vector<7x128xf32>
    %c7_300 = arith.constant 7 : index
    %c5_301 = arith.constant 5 : index
    %456 = memref.load %arg2[%c7_300, %c5_301] : memref<30x10xf32, #tpu.memory_space<smem>>
    %457 = vector.broadcast %456 : f32 to vector<7x128xf32>
    %458 = arith.mulf %457, %451 : vector<7x128xf32>
    %459 = arith.addf %433, %458 : vector<7x128xf32>
    %c8_302 = arith.constant 8 : index
    %c5_303 = arith.constant 5 : index
    %460 = memref.load %arg2[%c8_302, %c5_303] : memref<30x10xf32, #tpu.memory_space<smem>>
    %461 = vector.broadcast %460 : f32 to vector<7x128xf32>
    %462 = arith.mulf %461, %451 : vector<7x128xf32>
    %463 = arith.addf %437, %462 : vector<7x128xf32>
    %c9_304 = arith.constant 9 : index
    %c5_305 = arith.constant 5 : index
    %464 = memref.load %arg2[%c9_304, %c5_305] : memref<30x10xf32, #tpu.memory_space<smem>>
    %465 = vector.broadcast %464 : f32 to vector<7x128xf32>
    %466 = arith.mulf %465, %451 : vector<7x128xf32>
    %467 = arith.addf %441, %466 : vector<7x128xf32>
    %c10_306 = arith.constant 10 : index
    %c5_307 = arith.constant 5 : index
    %468 = memref.load %arg2[%c10_306, %c5_307] : memref<30x10xf32, #tpu.memory_space<smem>>
    %469 = vector.broadcast %468 : f32 to vector<7x128xf32>
    %470 = arith.mulf %469, %451 : vector<7x128xf32>
    %471 = arith.addf %445, %470 : vector<7x128xf32>
    %c11_308 = arith.constant 11 : index
    %c5_309 = arith.constant 5 : index
    %472 = memref.load %arg2[%c11_308, %c5_309] : memref<30x10xf32, #tpu.memory_space<smem>>
    %473 = vector.broadcast %472 : f32 to vector<7x128xf32>
    %474 = arith.mulf %473, %451 : vector<7x128xf32>
    %475 = arith.addf %449, %474 : vector<7x128xf32>
    %c6_310 = arith.constant 6 : index
    %c0_311 = arith.constant 0 : index
    %c0_312 = arith.constant 0 : index
    %476 = vector.load %arg8[%c6_310, %c0_311, %c0_312] : memref<10x8x128xf32, #tpu.memory_space<vmem>>, vector<1x7x128xf32>
    %477 = vector.shape_cast %476 : vector<1x7x128xf32> to vector<7x128xf32>
    %c6_313 = arith.constant 6 : index
    %c6_314 = arith.constant 6 : index
    %478 = memref.load %arg2[%c6_313, %c6_314] : memref<30x10xf32, #tpu.memory_space<smem>>
    %479 = vector.broadcast %478 : f32 to vector<7x128xf32>
    %480 = arith.mulf %479, %477 : vector<7x128xf32>
    %481 = arith.addf %455, %480 : vector<7x128xf32>
    %c7_315 = arith.constant 7 : index
    %c6_316 = arith.constant 6 : index
    %482 = memref.load %arg2[%c7_315, %c6_316] : memref<30x10xf32, #tpu.memory_space<smem>>
    %483 = vector.broadcast %482 : f32 to vector<7x128xf32>
    %484 = arith.mulf %483, %477 : vector<7x128xf32>
    %485 = arith.addf %459, %484 : vector<7x128xf32>
    %c8_317 = arith.constant 8 : index
    %c6_318 = arith.constant 6 : index
    %486 = memref.load %arg2[%c8_317, %c6_318] : memref<30x10xf32, #tpu.memory_space<smem>>
    %487 = vector.broadcast %486 : f32 to vector<7x128xf32>
    %488 = arith.mulf %487, %477 : vector<7x128xf32>
    %489 = arith.addf %463, %488 : vector<7x128xf32>
    %c9_319 = arith.constant 9 : index
    %c6_320 = arith.constant 6 : index
    %490 = memref.load %arg2[%c9_319, %c6_320] : memref<30x10xf32, #tpu.memory_space<smem>>
    %491 = vector.broadcast %490 : f32 to vector<7x128xf32>
    %492 = arith.mulf %491, %477 : vector<7x128xf32>
    %493 = arith.addf %467, %492 : vector<7x128xf32>
    %c10_321 = arith.constant 10 : index
    %c6_322 = arith.constant 6 : index
    %494 = memref.load %arg2[%c10_321, %c6_322] : memref<30x10xf32, #tpu.memory_space<smem>>
    %495 = vector.broadcast %494 : f32 to vector<7x128xf32>
    %496 = arith.mulf %495, %477 : vector<7x128xf32>
    %497 = arith.addf %471, %496 : vector<7x128xf32>
    %c11_323 = arith.constant 11 : index
    %c6_324 = arith.constant 6 : index
    %498 = memref.load %arg2[%c11_323, %c6_324] : memref<30x10xf32, #tpu.memory_space<smem>>
    %499 = vector.broadcast %498 : f32 to vector<7x128xf32>
    %500 = arith.mulf %499, %477 : vector<7x128xf32>
    %501 = arith.addf %475, %500 : vector<7x128xf32>
    %c7_325 = arith.constant 7 : index
    %c0_326 = arith.constant 0 : index
    %c0_327 = arith.constant 0 : index
    %502 = vector.load %arg8[%c7_325, %c0_326, %c0_327] : memref<10x8x128xf32, #tpu.memory_space<vmem>>, vector<1x7x128xf32>
    %503 = vector.shape_cast %502 : vector<1x7x128xf32> to vector<7x128xf32>
    %c6_328 = arith.constant 6 : index
    %c7_329 = arith.constant 7 : index
    %504 = memref.load %arg2[%c6_328, %c7_329] : memref<30x10xf32, #tpu.memory_space<smem>>
    %505 = vector.broadcast %504 : f32 to vector<7x128xf32>
    %506 = arith.mulf %505, %503 : vector<7x128xf32>
    %507 = arith.addf %481, %506 : vector<7x128xf32>
    %c7_330 = arith.constant 7 : index
    %c7_331 = arith.constant 7 : index
    %508 = memref.load %arg2[%c7_330, %c7_331] : memref<30x10xf32, #tpu.memory_space<smem>>
    %509 = vector.broadcast %508 : f32 to vector<7x128xf32>
    %510 = arith.mulf %509, %503 : vector<7x128xf32>
    %511 = arith.addf %485, %510 : vector<7x128xf32>
    %c8_332 = arith.constant 8 : index
    %c7_333 = arith.constant 7 : index
    %512 = memref.load %arg2[%c8_332, %c7_333] : memref<30x10xf32, #tpu.memory_space<smem>>
    %513 = vector.broadcast %512 : f32 to vector<7x128xf32>
    %514 = arith.mulf %513, %503 : vector<7x128xf32>
    %515 = arith.addf %489, %514 : vector<7x128xf32>
    %c9_334 = arith.constant 9 : index
    %c7_335 = arith.constant 7 : index
    %516 = memref.load %arg2[%c9_334, %c7_335] : memref<30x10xf32, #tpu.memory_space<smem>>
    %517 = vector.broadcast %516 : f32 to vector<7x128xf32>
    %518 = arith.mulf %517, %503 : vector<7x128xf32>
    %519 = arith.addf %493, %518 : vector<7x128xf32>
    %c10_336 = arith.constant 10 : index
    %c7_337 = arith.constant 7 : index
    %520 = memref.load %arg2[%c10_336, %c7_337] : memref<30x10xf32, #tpu.memory_space<smem>>
    %521 = vector.broadcast %520 : f32 to vector<7x128xf32>
    %522 = arith.mulf %521, %503 : vector<7x128xf32>
    %523 = arith.addf %497, %522 : vector<7x128xf32>
    %c11_338 = arith.constant 11 : index
    %c7_339 = arith.constant 7 : index
    %524 = memref.load %arg2[%c11_338, %c7_339] : memref<30x10xf32, #tpu.memory_space<smem>>
    %525 = vector.broadcast %524 : f32 to vector<7x128xf32>
    %526 = arith.mulf %525, %503 : vector<7x128xf32>
    %527 = arith.addf %501, %526 : vector<7x128xf32>
    %c8_340 = arith.constant 8 : index
    %c0_341 = arith.constant 0 : index
    %c0_342 = arith.constant 0 : index
    %528 = vector.load %arg8[%c8_340, %c0_341, %c0_342] : memref<10x8x128xf32, #tpu.memory_space<vmem>>, vector<1x7x128xf32>
    %529 = vector.shape_cast %528 : vector<1x7x128xf32> to vector<7x128xf32>
    %c6_343 = arith.constant 6 : index
    %c8_344 = arith.constant 8 : index
    %530 = memref.load %arg2[%c6_343, %c8_344] : memref<30x10xf32, #tpu.memory_space<smem>>
    %531 = vector.broadcast %530 : f32 to vector<7x128xf32>
    %532 = arith.mulf %531, %529 : vector<7x128xf32>
    %533 = arith.addf %507, %532 : vector<7x128xf32>
    %c7_345 = arith.constant 7 : index
    %c8_346 = arith.constant 8 : index
    %534 = memref.load %arg2[%c7_345, %c8_346] : memref<30x10xf32, #tpu.memory_space<smem>>
    %535 = vector.broadcast %534 : f32 to vector<7x128xf32>
    %536 = arith.mulf %535, %529 : vector<7x128xf32>
    %537 = arith.addf %511, %536 : vector<7x128xf32>
    %c8_347 = arith.constant 8 : index
    %c8_348 = arith.constant 8 : index
    %538 = memref.load %arg2[%c8_347, %c8_348] : memref<30x10xf32, #tpu.memory_space<smem>>
    %539 = vector.broadcast %538 : f32 to vector<7x128xf32>
    %540 = arith.mulf %539, %529 : vector<7x128xf32>
    %541 = arith.addf %515, %540 : vector<7x128xf32>
    %c9_349 = arith.constant 9 : index
    %c8_350 = arith.constant 8 : index
    %542 = memref.load %arg2[%c9_349, %c8_350] : memref<30x10xf32, #tpu.memory_space<smem>>
    %543 = vector.broadcast %542 : f32 to vector<7x128xf32>
    %544 = arith.mulf %543, %529 : vector<7x128xf32>
    %545 = arith.addf %519, %544 : vector<7x128xf32>
    %c10_351 = arith.constant 10 : index
    %c8_352 = arith.constant 8 : index
    %546 = memref.load %arg2[%c10_351, %c8_352] : memref<30x10xf32, #tpu.memory_space<smem>>
    %547 = vector.broadcast %546 : f32 to vector<7x128xf32>
    %548 = arith.mulf %547, %529 : vector<7x128xf32>
    %549 = arith.addf %523, %548 : vector<7x128xf32>
    %c11_353 = arith.constant 11 : index
    %c8_354 = arith.constant 8 : index
    %550 = memref.load %arg2[%c11_353, %c8_354] : memref<30x10xf32, #tpu.memory_space<smem>>
    %551 = vector.broadcast %550 : f32 to vector<7x128xf32>
    %552 = arith.mulf %551, %529 : vector<7x128xf32>
    %553 = arith.addf %527, %552 : vector<7x128xf32>
    %c9_355 = arith.constant 9 : index
    %c0_356 = arith.constant 0 : index
    %c0_357 = arith.constant 0 : index
    %554 = vector.load %arg8[%c9_355, %c0_356, %c0_357] : memref<10x8x128xf32, #tpu.memory_space<vmem>>, vector<1x7x128xf32>
    %555 = vector.shape_cast %554 : vector<1x7x128xf32> to vector<7x128xf32>
    %c6_358 = arith.constant 6 : index
    %c9_359 = arith.constant 9 : index
    %556 = memref.load %arg2[%c6_358, %c9_359] : memref<30x10xf32, #tpu.memory_space<smem>>
    %557 = vector.broadcast %556 : f32 to vector<7x128xf32>
    %558 = arith.mulf %557, %555 : vector<7x128xf32>
    %559 = arith.addf %533, %558 : vector<7x128xf32>
    %c7_360 = arith.constant 7 : index
    %c9_361 = arith.constant 9 : index
    %560 = memref.load %arg2[%c7_360, %c9_361] : memref<30x10xf32, #tpu.memory_space<smem>>
    %561 = vector.broadcast %560 : f32 to vector<7x128xf32>
    %562 = arith.mulf %561, %555 : vector<7x128xf32>
    %563 = arith.addf %537, %562 : vector<7x128xf32>
    %c8_362 = arith.constant 8 : index
    %c9_363 = arith.constant 9 : index
    %564 = memref.load %arg2[%c8_362, %c9_363] : memref<30x10xf32, #tpu.memory_space<smem>>
    %565 = vector.broadcast %564 : f32 to vector<7x128xf32>
    %566 = arith.mulf %565, %555 : vector<7x128xf32>
    %567 = arith.addf %541, %566 : vector<7x128xf32>
    %c9_364 = arith.constant 9 : index
    %c9_365 = arith.constant 9 : index
    %568 = memref.load %arg2[%c9_364, %c9_365] : memref<30x10xf32, #tpu.memory_space<smem>>
    %569 = vector.broadcast %568 : f32 to vector<7x128xf32>
    %570 = arith.mulf %569, %555 : vector<7x128xf32>
    %571 = arith.addf %545, %570 : vector<7x128xf32>
    %c10_366 = arith.constant 10 : index
    %c9_367 = arith.constant 9 : index
    %572 = memref.load %arg2[%c10_366, %c9_367] : memref<30x10xf32, #tpu.memory_space<smem>>
    %573 = vector.broadcast %572 : f32 to vector<7x128xf32>
    %574 = arith.mulf %573, %555 : vector<7x128xf32>
    %575 = arith.addf %549, %574 : vector<7x128xf32>
    %c11_368 = arith.constant 11 : index
    %c9_369 = arith.constant 9 : index
    %576 = memref.load %arg2[%c11_368, %c9_369] : memref<30x10xf32, #tpu.memory_space<smem>>
    %577 = vector.broadcast %576 : f32 to vector<7x128xf32>
    %578 = arith.mulf %577, %555 : vector<7x128xf32>
    %579 = arith.addf %553, %578 : vector<7x128xf32>
    %cst_370 = arith.constant dense<0xFF800000> : vector<128xf32>
    %580 = vector.multi_reduction <maximumf>, %559, %cst_370 [0] : vector<7x128xf32> to vector<128xf32>
    %581 = vector.shape_cast %580 : vector<128xf32> to vector<1x128xf32>
    %c6_371 = arith.constant 6 : index
    %c0_372 = arith.constant 0 : index
    %582 = vector.load %arg7[%c6_371, %c0_372] : memref<30x128xf32, #tpu.memory_space<vmem>>, vector<1x128xf32>
    %583 = arith.maximumf %582, %581 : vector<1x128xf32>
    %c6_373 = arith.constant 6 : index
    %c0_374 = arith.constant 0 : index
    %584 = vector.load %arg7[%c6_373, %c0_374] : memref<30x128xf32, #tpu.memory_space<vmem>>, vector<1x128xf32>
    tpu.vector_store %arg7[%c6_373, %c0_374], %583 {strides = array<i32>} : memref<30x128xf32, #tpu.memory_space<vmem>>, vector<1x128xf32>,
    %cst_375 = arith.constant dense<0xFF800000> : vector<128xf32>
    %585 = vector.multi_reduction <maximumf>, %563, %cst_375 [0] : vector<7x128xf32> to vector<128xf32>
    %586 = vector.shape_cast %585 : vector<128xf32> to vector<1x128xf32>
    %c7_376 = arith.constant 7 : index
    %c0_377 = arith.constant 0 : index
    %587 = vector.load %arg7[%c7_376, %c0_377] : memref<30x128xf32, #tpu.memory_space<vmem>>, vector<1x128xf32>
    %588 = arith.maximumf %587, %586 : vector<1x128xf32>
    %c7_378 = arith.constant 7 : index
    %c0_379 = arith.constant 0 : index
    %589 = vector.load %arg7[%c7_378, %c0_379] : memref<30x128xf32, #tpu.memory_space<vmem>>, vector<1x128xf32>
    tpu.vector_store %arg7[%c7_378, %c0_379], %588 {strides = array<i32>} : memref<30x128xf32, #tpu.memory_space<vmem>>, vector<1x128xf32>,
    %cst_380 = arith.constant dense<0xFF800000> : vector<128xf32>
    %590 = vector.multi_reduction <maximumf>, %567, %cst_380 [0] : vector<7x128xf32> to vector<128xf32>
    %591 = vector.shape_cast %590 : vector<128xf32> to vector<1x128xf32>
    %c8_381 = arith.constant 8 : index
    %c0_382 = arith.constant 0 : index
    %592 = vector.load %arg7[%c8_381, %c0_382] : memref<30x128xf32, #tpu.memory_space<vmem>>, vector<1x128xf32>
    %593 = arith.maximumf %592, %591 : vector<1x128xf32>
    %c8_383 = arith.constant 8 : index
    %c0_384 = arith.constant 0 : index
    %594 = vector.load %arg7[%c8_383, %c0_384] : memref<30x128xf32, #tpu.memory_space<vmem>>, vector<1x128xf32>
    tpu.vector_store %arg7[%c8_383, %c0_384], %593 {strides = array<i32>} : memref<30x128xf32, #tpu.memory_space<vmem>>, vector<1x128xf32>,
    %cst_385 = arith.constant dense<0xFF800000> : vector<128xf32>
    %595 = vector.multi_reduction <maximumf>, %571, %cst_385 [0] : vector<7x128xf32> to vector<128xf32>
    %596 = vector.shape_cast %595 : vector<128xf32> to vector<1x128xf32>
    %c9_386 = arith.constant 9 : index
    %c0_387 = arith.constant 0 : index
    %597 = vector.load %arg7[%c9_386, %c0_387] : memref<30x128xf32, #tpu.memory_space<vmem>>, vector<1x128xf32>
    %598 = arith.maximumf %597, %596 : vector<1x128xf32>
    %c9_388 = arith.constant 9 : index
    %c0_389 = arith.constant 0 : index
    %599 = vector.load %arg7[%c9_388, %c0_389] : memref<30x128xf32, #tpu.memory_space<vmem>>, vector<1x128xf32>
    tpu.vector_store %arg7[%c9_388, %c0_389], %598 {strides = array<i32>} : memref<30x128xf32, #tpu.memory_space<vmem>>, vector<1x128xf32>,
    %cst_390 = arith.constant dense<0xFF800000> : vector<128xf32>
    %600 = vector.multi_reduction <maximumf>, %575, %cst_390 [0] : vector<7x128xf32> to vector<128xf32>
    %601 = vector.shape_cast %600 : vector<128xf32> to vector<1x128xf32>
    %c10_391 = arith.constant 10 : index
    %c0_392 = arith.constant 0 : index
    %602 = vector.load %arg7[%c10_391, %c0_392] : memref<30x128xf32, #tpu.memory_space<vmem>>, vector<1x128xf32>
    %603 = arith.maximumf %602, %601 : vector<1x128xf32>
    %c10_393 = arith.constant 10 : index
    %c0_394 = arith.constant 0 : index
    %604 = vector.load %arg7[%c10_393, %c0_394] : memref<30x128xf32, #tpu.memory_space<vmem>>, vector<1x128xf32>
    tpu.vector_store %arg7[%c10_393, %c0_394], %603 {strides = array<i32>} : memref<30x128xf32, #tpu.memory_space<vmem>>, vector<1x128xf32>,
    %cst_395 = arith.constant dense<0xFF800000> : vector<128xf32>
    %605 = vector.multi_reduction <maximumf>, %579, %cst_395 [0] : vector<7x128xf32> to vector<128xf32>
    %606 = vector.shape_cast %605 : vector<128xf32> to vector<1x128xf32>
    %c11_396 = arith.constant 11 : index
    %c0_397 = arith.constant 0 : index
    %607 = vector.load %arg7[%c11_396, %c0_397] : memref<30x128xf32, #tpu.memory_space<vmem>>, vector<1x128xf32>
    %608 = arith.maximumf %607, %606 : vector<1x128xf32>
    %c11_398 = arith.constant 11 : index
    %c0_399 = arith.constant 0 : index
    %609 = vector.load %arg7[%c11_398, %c0_399] : memref<30x128xf32, #tpu.memory_space<vmem>>, vector<1x128xf32>
    tpu.vector_store %arg7[%c11_398, %c0_399], %608 {strides = array<i32>} : memref<30x128xf32, #tpu.memory_space<vmem>>, vector<1x128xf32>,
    %c0_400 = arith.constant 0 : index
    %c0_401 = arith.constant 0 : index
    %c0_402 = arith.constant 0 : index
    %610 = vector.load %arg8[%c0_400, %c0_401, %c0_402] : memref<10x8x128xf32, #tpu.memory_space<vmem>>, vector<1x7x128xf32>
    %611 = vector.shape_cast %610 : vector<1x7x128xf32> to vector<7x128xf32>
    %c12 = arith.constant 12 : index
    %c0_403 = arith.constant 0 : index
    %612 = memref.load %arg2[%c12, %c0_403] : memref<30x10xf32, #tpu.memory_space<smem>>
    %613 = vector.broadcast %612 : f32 to vector<7x128xf32>
    %614 = arith.mulf %613, %611 : vector<7x128xf32>
    %c13 = arith.constant 13 : index
    %c0_404 = arith.constant 0 : index
    %615 = memref.load %arg2[%c13, %c0_404] : memref<30x10xf32, #tpu.memory_space<smem>>
    %616 = vector.broadcast %615 : f32 to vector<7x128xf32>
    %617 = arith.mulf %616, %611 : vector<7x128xf32>
    %c14 = arith.constant 14 : index
    %c0_405 = arith.constant 0 : index
    %618 = memref.load %arg2[%c14, %c0_405] : memref<30x10xf32, #tpu.memory_space<smem>>
    %619 = vector.broadcast %618 : f32 to vector<7x128xf32>
    %620 = arith.mulf %619, %611 : vector<7x128xf32>
    %c15 = arith.constant 15 : index
    %c0_406 = arith.constant 0 : index
    %621 = memref.load %arg2[%c15, %c0_406] : memref<30x10xf32, #tpu.memory_space<smem>>
    %622 = vector.broadcast %621 : f32 to vector<7x128xf32>
    %623 = arith.mulf %622, %611 : vector<7x128xf32>
    %c16 = arith.constant 16 : index
    %c0_407 = arith.constant 0 : index
    %624 = memref.load %arg2[%c16, %c0_407] : memref<30x10xf32, #tpu.memory_space<smem>>
    %625 = vector.broadcast %624 : f32 to vector<7x128xf32>
    %626 = arith.mulf %625, %611 : vector<7x128xf32>
    %c17 = arith.constant 17 : index
    %c0_408 = arith.constant 0 : index
    %627 = memref.load %arg2[%c17, %c0_408] : memref<30x10xf32, #tpu.memory_space<smem>>
    %628 = vector.broadcast %627 : f32 to vector<7x128xf32>
    %629 = arith.mulf %628, %611 : vector<7x128xf32>
    %c1_409 = arith.constant 1 : index
    %c0_410 = arith.constant 0 : index
    %c0_411 = arith.constant 0 : index
    %630 = vector.load %arg8[%c1_409, %c0_410, %c0_411] : memref<10x8x128xf32, #tpu.memory_space<vmem>>, vector<1x7x128xf32>
    %631 = vector.shape_cast %630 : vector<1x7x128xf32> to vector<7x128xf32>
    %c12_412 = arith.constant 12 : index
    %c1_413 = arith.constant 1 : index
    %632 = memref.load %arg2[%c12_412, %c1_413] : memref<30x10xf32, #tpu.memory_space<smem>>
    %633 = vector.broadcast %632 : f32 to vector<7x128xf32>
    %634 = arith.mulf %633, %631 : vector<7x128xf32>
    %635 = arith.addf %614, %634 : vector<7x128xf32>
    %c13_414 = arith.constant 13 : index
    %c1_415 = arith.constant 1 : index
    %636 = memref.load %arg2[%c13_414, %c1_415] : memref<30x10xf32, #tpu.memory_space<smem>>
    %637 = vector.broadcast %636 : f32 to vector<7x128xf32>
    %638 = arith.mulf %637, %631 : vector<7x128xf32>
    %639 = arith.addf %617, %638 : vector<7x128xf32>
    %c14_416 = arith.constant 14 : index
    %c1_417 = arith.constant 1 : index
    %640 = memref.load %arg2[%c14_416, %c1_417] : memref<30x10xf32, #tpu.memory_space<smem>>
    %641 = vector.broadcast %640 : f32 to vector<7x128xf32>
    %642 = arith.mulf %641, %631 : vector<7x128xf32>
    %643 = arith.addf %620, %642 : vector<7x128xf32>
    %c15_418 = arith.constant 15 : index
    %c1_419 = arith.constant 1 : index
    %644 = memref.load %arg2[%c15_418, %c1_419] : memref<30x10xf32, #tpu.memory_space<smem>>
    %645 = vector.broadcast %644 : f32 to vector<7x128xf32>
    %646 = arith.mulf %645, %631 : vector<7x128xf32>
    %647 = arith.addf %623, %646 : vector<7x128xf32>
    %c16_420 = arith.constant 16 : index
    %c1_421 = arith.constant 1 : index
    %648 = memref.load %arg2[%c16_420, %c1_421] : memref<30x10xf32, #tpu.memory_space<smem>>
    %649 = vector.broadcast %648 : f32 to vector<7x128xf32>
    %650 = arith.mulf %649, %631 : vector<7x128xf32>
    %651 = arith.addf %626, %650 : vector<7x128xf32>
    %c17_422 = arith.constant 17 : index
    %c1_423 = arith.constant 1 : index
    %652 = memref.load %arg2[%c17_422, %c1_423] : memref<30x10xf32, #tpu.memory_space<smem>>
    %653 = vector.broadcast %652 : f32 to vector<7x128xf32>
    %654 = arith.mulf %653, %631 : vector<7x128xf32>
    %655 = arith.addf %629, %654 : vector<7x128xf32>
    %c2_424 = arith.constant 2 : index
    %c0_425 = arith.constant 0 : index
    %c0_426 = arith.constant 0 : index
    %656 = vector.load %arg8[%c2_424, %c0_425, %c0_426] : memref<10x8x128xf32, #tpu.memory_space<vmem>>, vector<1x7x128xf32>
    %657 = vector.shape_cast %656 : vector<1x7x128xf32> to vector<7x128xf32>
    %c12_427 = arith.constant 12 : index
    %c2_428 = arith.constant 2 : index
    %658 = memref.load %arg2[%c12_427, %c2_428] : memref<30x10xf32, #tpu.memory_space<smem>>
    %659 = vector.broadcast %658 : f32 to vector<7x128xf32>
    %660 = arith.mulf %659, %657 : vector<7x128xf32>
    %661 = arith.addf %635, %660 : vector<7x128xf32>
    %c13_429 = arith.constant 13 : index
    %c2_430 = arith.constant 2 : index
    %662 = memref.load %arg2[%c13_429, %c2_430] : memref<30x10xf32, #tpu.memory_space<smem>>
    %663 = vector.broadcast %662 : f32 to vector<7x128xf32>
    %664 = arith.mulf %663, %657 : vector<7x128xf32>
    %665 = arith.addf %639, %664 : vector<7x128xf32>
    %c14_431 = arith.constant 14 : index
    %c2_432 = arith.constant 2 : index
    %666 = memref.load %arg2[%c14_431, %c2_432] : memref<30x10xf32, #tpu.memory_space<smem>>
    %667 = vector.broadcast %666 : f32 to vector<7x128xf32>
    %668 = arith.mulf %667, %657 : vector<7x128xf32>
    %669 = arith.addf %643, %668 : vector<7x128xf32>
    %c15_433 = arith.constant 15 : index
    %c2_434 = arith.constant 2 : index
    %670 = memref.load %arg2[%c15_433, %c2_434] : memref<30x10xf32, #tpu.memory_space<smem>>
    %671 = vector.broadcast %670 : f32 to vector<7x128xf32>
    %672 = arith.mulf %671, %657 : vector<7x128xf32>
    %673 = arith.addf %647, %672 : vector<7x128xf32>
    %c16_435 = arith.constant 16 : index
    %c2_436 = arith.constant 2 : index
    %674 = memref.load %arg2[%c16_435, %c2_436] : memref<30x10xf32, #tpu.memory_space<smem>>
    %675 = vector.broadcast %674 : f32 to vector<7x128xf32>
    %676 = arith.mulf %675, %657 : vector<7x128xf32>
    %677 = arith.addf %651, %676 : vector<7x128xf32>
    %c17_437 = arith.constant 17 : index
    %c2_438 = arith.constant 2 : index
    %678 = memref.load %arg2[%c17_437, %c2_438] : memref<30x10xf32, #tpu.memory_space<smem>>
    %679 = vector.broadcast %678 : f32 to vector<7x128xf32>
    %680 = arith.mulf %679, %657 : vector<7x128xf32>
    %681 = arith.addf %655, %680 : vector<7x128xf32>
    %c3_439 = arith.constant 3 : index
    %c0_440 = arith.constant 0 : index
    %c0_441 = arith.constant 0 : index
    %682 = vector.load %arg8[%c3_439, %c0_440, %c0_441] : memref<10x8x128xf32, #tpu.memory_space<vmem>>, vector<1x7x128xf32>
    %683 = vector.shape_cast %682 : vector<1x7x128xf32> to vector<7x128xf32>
    %c12_442 = arith.constant 12 : index
    %c3_443 = arith.constant 3 : index
    %684 = memref.load %arg2[%c12_442, %c3_443] : memref<30x10xf32, #tpu.memory_space<smem>>
    %685 = vector.broadcast %684 : f32 to vector<7x128xf32>
    %686 = arith.mulf %685, %683 : vector<7x128xf32>
    %687 = arith.addf %661, %686 : vector<7x128xf32>
    %c13_444 = arith.constant 13 : index
    %c3_445 = arith.constant 3 : index
    %688 = memref.load %arg2[%c13_444, %c3_445] : memref<30x10xf32, #tpu.memory_space<smem>>
    %689 = vector.broadcast %688 : f32 to vector<7x128xf32>
    %690 = arith.mulf %689, %683 : vector<7x128xf32>
    %691 = arith.addf %665, %690 : vector<7x128xf32>
    %c14_446 = arith.constant 14 : index
    %c3_447 = arith.constant 3 : index
    %692 = memref.load %arg2[%c14_446, %c3_447] : memref<30x10xf32, #tpu.memory_space<smem>>
    %693 = vector.broadcast %692 : f32 to vector<7x128xf32>
    %694 = arith.mulf %693, %683 : vector<7x128xf32>
    %695 = arith.addf %669, %694 : vector<7x128xf32>
    %c15_448 = arith.constant 15 : index
    %c3_449 = arith.constant 3 : index
    %696 = memref.load %arg2[%c15_448, %c3_449] : memref<30x10xf32, #tpu.memory_space<smem>>
    %697 = vector.broadcast %696 : f32 to vector<7x128xf32>
    %698 = arith.mulf %697, %683 : vector<7x128xf32>
    %699 = arith.addf %673, %698 : vector<7x128xf32>
    %c16_450 = arith.constant 16 : index
    %c3_451 = arith.constant 3 : index
    %700 = memref.load %arg2[%c16_450, %c3_451] : memref<30x10xf32, #tpu.memory_space<smem>>
    %701 = vector.broadcast %700 : f32 to vector<7x128xf32>
    %702 = arith.mulf %701, %683 : vector<7x128xf32>
    %703 = arith.addf %677, %702 : vector<7x128xf32>
    %c17_452 = arith.constant 17 : index
    %c3_453 = arith.constant 3 : index
    %704 = memref.load %arg2[%c17_452, %c3_453] : memref<30x10xf32, #tpu.memory_space<smem>>
    %705 = vector.broadcast %704 : f32 to vector<7x128xf32>
    %706 = arith.mulf %705, %683 : vector<7x128xf32>
    %707 = arith.addf %681, %706 : vector<7x128xf32>
    %c4_454 = arith.constant 4 : index
    %c0_455 = arith.constant 0 : index
    %c0_456 = arith.constant 0 : index
    %708 = vector.load %arg8[%c4_454, %c0_455, %c0_456] : memref<10x8x128xf32, #tpu.memory_space<vmem>>, vector<1x7x128xf32>
    %709 = vector.shape_cast %708 : vector<1x7x128xf32> to vector<7x128xf32>
    %c12_457 = arith.constant 12 : index
    %c4_458 = arith.constant 4 : index
    %710 = memref.load %arg2[%c12_457, %c4_458] : memref<30x10xf32, #tpu.memory_space<smem>>
    %711 = vector.broadcast %710 : f32 to vector<7x128xf32>
    %712 = arith.mulf %711, %709 : vector<7x128xf32>
    %713 = arith.addf %687, %712 : vector<7x128xf32>
    %c13_459 = arith.constant 13 : index
    %c4_460 = arith.constant 4 : index
    %714 = memref.load %arg2[%c13_459, %c4_460] : memref<30x10xf32, #tpu.memory_space<smem>>
    %715 = vector.broadcast %714 : f32 to vector<7x128xf32>
    %716 = arith.mulf %715, %709 : vector<7x128xf32>
    %717 = arith.addf %691, %716 : vector<7x128xf32>
    %c14_461 = arith.constant 14 : index
    %c4_462 = arith.constant 4 : index
    %718 = memref.load %arg2[%c14_461, %c4_462] : memref<30x10xf32, #tpu.memory_space<smem>>
    %719 = vector.broadcast %718 : f32 to vector<7x128xf32>
    %720 = arith.mulf %719, %709 : vector<7x128xf32>
    %721 = arith.addf %695, %720 : vector<7x128xf32>
    %c15_463 = arith.constant 15 : index
    %c4_464 = arith.constant 4 : index
    %722 = memref.load %arg2[%c15_463, %c4_464] : memref<30x10xf32, #tpu.memory_space<smem>>
    %723 = vector.broadcast %722 : f32 to vector<7x128xf32>
    %724 = arith.mulf %723, %709 : vector<7x128xf32>
    %725 = arith.addf %699, %724 : vector<7x128xf32>
    %c16_465 = arith.constant 16 : index
    %c4_466 = arith.constant 4 : index
    %726 = memref.load %arg2[%c16_465, %c4_466] : memref<30x10xf32, #tpu.memory_space<smem>>
    %727 = vector.broadcast %726 : f32 to vector<7x128xf32>
    %728 = arith.mulf %727, %709 : vector<7x128xf32>
    %729 = arith.addf %703, %728 : vector<7x128xf32>
    %c17_467 = arith.constant 17 : index
    %c4_468 = arith.constant 4 : index
    %730 = memref.load %arg2[%c17_467, %c4_468] : memref<30x10xf32, #tpu.memory_space<smem>>
    %731 = vector.broadcast %730 : f32 to vector<7x128xf32>
    %732 = arith.mulf %731, %709 : vector<7x128xf32>
    %733 = arith.addf %707, %732 : vector<7x128xf32>
    %c5_469 = arith.constant 5 : index
    %c0_470 = arith.constant 0 : index
    %c0_471 = arith.constant 0 : index
    %734 = vector.load %arg8[%c5_469, %c0_470, %c0_471] : memref<10x8x128xf32, #tpu.memory_space<vmem>>, vector<1x7x128xf32>
    %735 = vector.shape_cast %734 : vector<1x7x128xf32> to vector<7x128xf32>
    %c12_472 = arith.constant 12 : index
    %c5_473 = arith.constant 5 : index
    %736 = memref.load %arg2[%c12_472, %c5_473] : memref<30x10xf32, #tpu.memory_space<smem>>
    %737 = vector.broadcast %736 : f32 to vector<7x128xf32>
    %738 = arith.mulf %737, %735 : vector<7x128xf32>
    %739 = arith.addf %713, %738 : vector<7x128xf32>
    %c13_474 = arith.constant 13 : index
    %c5_475 = arith.constant 5 : index
    %740 = memref.load %arg2[%c13_474, %c5_475] : memref<30x10xf32, #tpu.memory_space<smem>>
    %741 = vector.broadcast %740 : f32 to vector<7x128xf32>
    %742 = arith.mulf %741, %735 : vector<7x128xf32>
    %743 = arith.addf %717, %742 : vector<7x128xf32>
    %c14_476 = arith.constant 14 : index
    %c5_477 = arith.constant 5 : index
    %744 = memref.load %arg2[%c14_476, %c5_477] : memref<30x10xf32, #tpu.memory_space<smem>>
    %745 = vector.broadcast %744 : f32 to vector<7x128xf32>
    %746 = arith.mulf %745, %735 : vector<7x128xf32>
    %747 = arith.addf %721, %746 : vector<7x128xf32>
    %c15_478 = arith.constant 15 : index
    %c5_479 = arith.constant 5 : index
    %748 = memref.load %arg2[%c15_478, %c5_479] : memref<30x10xf32, #tpu.memory_space<smem>>
    %749 = vector.broadcast %748 : f32 to vector<7x128xf32>
    %750 = arith.mulf %749, %735 : vector<7x128xf32>
    %751 = arith.addf %725, %750 : vector<7x128xf32>
    %c16_480 = arith.constant 16 : index
    %c5_481 = arith.constant 5 : index
    %752 = memref.load %arg2[%c16_480, %c5_481] : memref<30x10xf32, #tpu.memory_space<smem>>
    %753 = vector.broadcast %752 : f32 to vector<7x128xf32>
    %754 = arith.mulf %753, %735 : vector<7x128xf32>
    %755 = arith.addf %729, %754 : vector<7x128xf32>
    %c17_482 = arith.constant 17 : index
    %c5_483 = arith.constant 5 : index
    %756 = memref.load %arg2[%c17_482, %c5_483] : memref<30x10xf32, #tpu.memory_space<smem>>
    %757 = vector.broadcast %756 : f32 to vector<7x128xf32>
    %758 = arith.mulf %757, %735 : vector<7x128xf32>
    %759 = arith.addf %733, %758 : vector<7x128xf32>
    %c6_484 = arith.constant 6 : index
    %c0_485 = arith.constant 0 : index
    %c0_486 = arith.constant 0 : index
    %760 = vector.load %arg8[%c6_484, %c0_485, %c0_486] : memref<10x8x128xf32, #tpu.memory_space<vmem>>, vector<1x7x128xf32>
    %761 = vector.shape_cast %760 : vector<1x7x128xf32> to vector<7x128xf32>
    %c12_487 = arith.constant 12 : index
    %c6_488 = arith.constant 6 : index
    %762 = memref.load %arg2[%c12_487, %c6_488] : memref<30x10xf32, #tpu.memory_space<smem>>
    %763 = vector.broadcast %762 : f32 to vector<7x128xf32>
    %764 = arith.mulf %763, %761 : vector<7x128xf32>
    %765 = arith.addf %739, %764 : vector<7x128xf32>
    %c13_489 = arith.constant 13 : index
    %c6_490 = arith.constant 6 : index
    %766 = memref.load %arg2[%c13_489, %c6_490] : memref<30x10xf32, #tpu.memory_space<smem>>
    %767 = vector.broadcast %766 : f32 to vector<7x128xf32>
    %768 = arith.mulf %767, %761 : vector<7x128xf32>
    %769 = arith.addf %743, %768 : vector<7x128xf32>
    %c14_491 = arith.constant 14 : index
    %c6_492 = arith.constant 6 : index
    %770 = memref.load %arg2[%c14_491, %c6_492] : memref<30x10xf32, #tpu.memory_space<smem>>
    %771 = vector.broadcast %770 : f32 to vector<7x128xf32>
    %772 = arith.mulf %771, %761 : vector<7x128xf32>
    %773 = arith.addf %747, %772 : vector<7x128xf32>
    %c15_493 = arith.constant 15 : index
    %c6_494 = arith.constant 6 : index
    %774 = memref.load %arg2[%c15_493, %c6_494] : memref<30x10xf32, #tpu.memory_space<smem>>
    %775 = vector.broadcast %774 : f32 to vector<7x128xf32>
    %776 = arith.mulf %775, %761 : vector<7x128xf32>
    %777 = arith.addf %751, %776 : vector<7x128xf32>
    %c16_495 = arith.constant 16 : index
    %c6_496 = arith.constant 6 : index
    %778 = memref.load %arg2[%c16_495, %c6_496] : memref<30x10xf32, #tpu.memory_space<smem>>
    %779 = vector.broadcast %778 : f32 to vector<7x128xf32>
    %780 = arith.mulf %779, %761 : vector<7x128xf32>
    %781 = arith.addf %755, %780 : vector<7x128xf32>
    %c17_497 = arith.constant 17 : index
    %c6_498 = arith.constant 6 : index
    %782 = memref.load %arg2[%c17_497, %c6_498] : memref<30x10xf32, #tpu.memory_space<smem>>
    %783 = vector.broadcast %782 : f32 to vector<7x128xf32>
    %784 = arith.mulf %783, %761 : vector<7x128xf32>
    %785 = arith.addf %759, %784 : vector<7x128xf32>
    %c7_499 = arith.constant 7 : index
    %c0_500 = arith.constant 0 : index
    %c0_501 = arith.constant 0 : index
    %786 = vector.load %arg8[%c7_499, %c0_500, %c0_501] : memref<10x8x128xf32, #tpu.memory_space<vmem>>, vector<1x7x128xf32>
    %787 = vector.shape_cast %786 : vector<1x7x128xf32> to vector<7x128xf32>
    %c12_502 = arith.constant 12 : index
    %c7_503 = arith.constant 7 : index
    %788 = memref.load %arg2[%c12_502, %c7_503] : memref<30x10xf32, #tpu.memory_space<smem>>
    %789 = vector.broadcast %788 : f32 to vector<7x128xf32>
    %790 = arith.mulf %789, %787 : vector<7x128xf32>
    %791 = arith.addf %765, %790 : vector<7x128xf32>
    %c13_504 = arith.constant 13 : index
    %c7_505 = arith.constant 7 : index
    %792 = memref.load %arg2[%c13_504, %c7_505] : memref<30x10xf32, #tpu.memory_space<smem>>
    %793 = vector.broadcast %792 : f32 to vector<7x128xf32>
    %794 = arith.mulf %793, %787 : vector<7x128xf32>
    %795 = arith.addf %769, %794 : vector<7x128xf32>
    %c14_506 = arith.constant 14 : index
    %c7_507 = arith.constant 7 : index
    %796 = memref.load %arg2[%c14_506, %c7_507] : memref<30x10xf32, #tpu.memory_space<smem>>
    %797 = vector.broadcast %796 : f32 to vector<7x128xf32>
    %798 = arith.mulf %797, %787 : vector<7x128xf32>
    %799 = arith.addf %773, %798 : vector<7x128xf32>
    %c15_508 = arith.constant 15 : index
    %c7_509 = arith.constant 7 : index
    %800 = memref.load %arg2[%c15_508, %c7_509] : memref<30x10xf32, #tpu.memory_space<smem>>
    %801 = vector.broadcast %800 : f32 to vector<7x128xf32>
    %802 = arith.mulf %801, %787 : vector<7x128xf32>
    %803 = arith.addf %777, %802 : vector<7x128xf32>
    %c16_510 = arith.constant 16 : index
    %c7_511 = arith.constant 7 : index
    %804 = memref.load %arg2[%c16_510, %c7_511] : memref<30x10xf32, #tpu.memory_space<smem>>
    %805 = vector.broadcast %804 : f32 to vector<7x128xf32>
    %806 = arith.mulf %805, %787 : vector<7x128xf32>
    %807 = arith.addf %781, %806 : vector<7x128xf32>
    %c17_512 = arith.constant 17 : index
    %c7_513 = arith.constant 7 : index
    %808 = memref.load %arg2[%c17_512, %c7_513] : memref<30x10xf32, #tpu.memory_space<smem>>
    %809 = vector.broadcast %808 : f32 to vector<7x128xf32>
    %810 = arith.mulf %809, %787 : vector<7x128xf32>
    %811 = arith.addf %785, %810 : vector<7x128xf32>
    %c8_514 = arith.constant 8 : index
    %c0_515 = arith.constant 0 : index
    %c0_516 = arith.constant 0 : index
    %812 = vector.load %arg8[%c8_514, %c0_515, %c0_516] : memref<10x8x128xf32, #tpu.memory_space<vmem>>, vector<1x7x128xf32>
    %813 = vector.shape_cast %812 : vector<1x7x128xf32> to vector<7x128xf32>
    %c12_517 = arith.constant 12 : index
    %c8_518 = arith.constant 8 : index
    %814 = memref.load %arg2[%c12_517, %c8_518] : memref<30x10xf32, #tpu.memory_space<smem>>
    %815 = vector.broadcast %814 : f32 to vector<7x128xf32>
    %816 = arith.mulf %815, %813 : vector<7x128xf32>
    %817 = arith.addf %791, %816 : vector<7x128xf32>
    %c13_519 = arith.constant 13 : index
    %c8_520 = arith.constant 8 : index
    %818 = memref.load %arg2[%c13_519, %c8_520] : memref<30x10xf32, #tpu.memory_space<smem>>
    %819 = vector.broadcast %818 : f32 to vector<7x128xf32>
    %820 = arith.mulf %819, %813 : vector<7x128xf32>
    %821 = arith.addf %795, %820 : vector<7x128xf32>
    %c14_521 = arith.constant 14 : index
    %c8_522 = arith.constant 8 : index
    %822 = memref.load %arg2[%c14_521, %c8_522] : memref<30x10xf32, #tpu.memory_space<smem>>
    %823 = vector.broadcast %822 : f32 to vector<7x128xf32>
    %824 = arith.mulf %823, %813 : vector<7x128xf32>
    %825 = arith.addf %799, %824 : vector<7x128xf32>
    %c15_523 = arith.constant 15 : index
    %c8_524 = arith.constant 8 : index
    %826 = memref.load %arg2[%c15_523, %c8_524] : memref<30x10xf32, #tpu.memory_space<smem>>
    %827 = vector.broadcast %826 : f32 to vector<7x128xf32>
    %828 = arith.mulf %827, %813 : vector<7x128xf32>
    %829 = arith.addf %803, %828 : vector<7x128xf32>
    %c16_525 = arith.constant 16 : index
    %c8_526 = arith.constant 8 : index
    %830 = memref.load %arg2[%c16_525, %c8_526] : memref<30x10xf32, #tpu.memory_space<smem>>
    %831 = vector.broadcast %830 : f32 to vector<7x128xf32>
    %832 = arith.mulf %831, %813 : vector<7x128xf32>
    %833 = arith.addf %807, %832 : vector<7x128xf32>
    %c17_527 = arith.constant 17 : index
    %c8_528 = arith.constant 8 : index
    %834 = memref.load %arg2[%c17_527, %c8_528] : memref<30x10xf32, #tpu.memory_space<smem>>
    %835 = vector.broadcast %834 : f32 to vector<7x128xf32>
    %836 = arith.mulf %835, %813 : vector<7x128xf32>
    %837 = arith.addf %811, %836 : vector<7x128xf32>
    %c9_529 = arith.constant 9 : index
    %c0_530 = arith.constant 0 : index
    %c0_531 = arith.constant 0 : index
    %838 = vector.load %arg8[%c9_529, %c0_530, %c0_531] : memref<10x8x128xf32, #tpu.memory_space<vmem>>, vector<1x7x128xf32>
    %839 = vector.shape_cast %838 : vector<1x7x128xf32> to vector<7x128xf32>
    %c12_532 = arith.constant 12 : index
    %c9_533 = arith.constant 9 : index
    %840 = memref.load %arg2[%c12_532, %c9_533] : memref<30x10xf32, #tpu.memory_space<smem>>
    %841 = vector.broadcast %840 : f32 to vector<7x128xf32>
    %842 = arith.mulf %841, %839 : vector<7x128xf32>
    %843 = arith.addf %817, %842 : vector<7x128xf32>
    %c13_534 = arith.constant 13 : index
    %c9_535 = arith.constant 9 : index
    %844 = memref.load %arg2[%c13_534, %c9_535] : memref<30x10xf32, #tpu.memory_space<smem>>
    %845 = vector.broadcast %844 : f32 to vector<7x128xf32>
    %846 = arith.mulf %845, %839 : vector<7x128xf32>
    %847 = arith.addf %821, %846 : vector<7x128xf32>
    %c14_536 = arith.constant 14 : index
    %c9_537 = arith.constant 9 : index
    %848 = memref.load %arg2[%c14_536, %c9_537] : memref<30x10xf32, #tpu.memory_space<smem>>
    %849 = vector.broadcast %848 : f32 to vector<7x128xf32>
    %850 = arith.mulf %849, %839 : vector<7x128xf32>
    %851 = arith.addf %825, %850 : vector<7x128xf32>
    %c15_538 = arith.constant 15 : index
    %c9_539 = arith.constant 9 : index
    %852 = memref.load %arg2[%c15_538, %c9_539] : memref<30x10xf32, #tpu.memory_space<smem>>
    %853 = vector.broadcast %852 : f32 to vector<7x128xf32>
    %854 = arith.mulf %853, %839 : vector<7x128xf32>
    %855 = arith.addf %829, %854 : vector<7x128xf32>
    %c16_540 = arith.constant 16 : index
    %c9_541 = arith.constant 9 : index
    %856 = memref.load %arg2[%c16_540, %c9_541] : memref<30x10xf32, #tpu.memory_space<smem>>
    %857 = vector.broadcast %856 : f32 to vector<7x128xf32>
    %858 = arith.mulf %857, %839 : vector<7x128xf32>
    %859 = arith.addf %833, %858 : vector<7x128xf32>
    %c17_542 = arith.constant 17 : index
    %c9_543 = arith.constant 9 : index
    %860 = memref.load %arg2[%c17_542, %c9_543] : memref<30x10xf32, #tpu.memory_space<smem>>
    %861 = vector.broadcast %860 : f32 to vector<7x128xf32>
    %862 = arith.mulf %861, %839 : vector<7x128xf32>
    %863 = arith.addf %837, %862 : vector<7x128xf32>
    %cst_544 = arith.constant dense<0xFF800000> : vector<128xf32>
    %864 = vector.multi_reduction <maximumf>, %843, %cst_544 [0] : vector<7x128xf32> to vector<128xf32>
    %865 = vector.shape_cast %864 : vector<128xf32> to vector<1x128xf32>
    %c12_545 = arith.constant 12 : index
    %c0_546 = arith.constant 0 : index
    %866 = vector.load %arg7[%c12_545, %c0_546] : memref<30x128xf32, #tpu.memory_space<vmem>>, vector<1x128xf32>
    %867 = arith.maximumf %866, %865 : vector<1x128xf32>
    %c12_547 = arith.constant 12 : index
    %c0_548 = arith.constant 0 : index
    %868 = vector.load %arg7[%c12_547, %c0_548] : memref<30x128xf32, #tpu.memory_space<vmem>>, vector<1x128xf32>
    tpu.vector_store %arg7[%c12_547, %c0_548], %867 {strides = array<i32>} : memref<30x128xf32, #tpu.memory_space<vmem>>, vector<1x128xf32>,
    %cst_549 = arith.constant dense<0xFF800000> : vector<128xf32>
    %869 = vector.multi_reduction <maximumf>, %847, %cst_549 [0] : vector<7x128xf32> to vector<128xf32>
    %870 = vector.shape_cast %869 : vector<128xf32> to vector<1x128xf32>
    %c13_550 = arith.constant 13 : index
    %c0_551 = arith.constant 0 : index
    %871 = vector.load %arg7[%c13_550, %c0_551] : memref<30x128xf32, #tpu.memory_space<vmem>>, vector<1x128xf32>
    %872 = arith.maximumf %871, %870 : vector<1x128xf32>
    %c13_552 = arith.constant 13 : index
    %c0_553 = arith.constant 0 : index
    %873 = vector.load %arg7[%c13_552, %c0_553] : memref<30x128xf32, #tpu.memory_space<vmem>>, vector<1x128xf32>
    tpu.vector_store %arg7[%c13_552, %c0_553], %872 {strides = array<i32>} : memref<30x128xf32, #tpu.memory_space<vmem>>, vector<1x128xf32>,
    %cst_554 = arith.constant dense<0xFF800000> : vector<128xf32>
    %874 = vector.multi_reduction <maximumf>, %851, %cst_554 [0] : vector<7x128xf32> to vector<128xf32>
    %875 = vector.shape_cast %874 : vector<128xf32> to vector<1x128xf32>
    %c14_555 = arith.constant 14 : index
    %c0_556 = arith.constant 0 : index
    %876 = vector.load %arg7[%c14_555, %c0_556] : memref<30x128xf32, #tpu.memory_space<vmem>>, vector<1x128xf32>
    %877 = arith.maximumf %876, %875 : vector<1x128xf32>
    %c14_557 = arith.constant 14 : index
    %c0_558 = arith.constant 0 : index
    %878 = vector.load %arg7[%c14_557, %c0_558] : memref<30x128xf32, #tpu.memory_space<vmem>>, vector<1x128xf32>
    tpu.vector_store %arg7[%c14_557, %c0_558], %877 {strides = array<i32>} : memref<30x128xf32, #tpu.memory_space<vmem>>, vector<1x128xf32>,
    %cst_559 = arith.constant dense<0xFF800000> : vector<128xf32>
    %879 = vector.multi_reduction <maximumf>, %855, %cst_559 [0] : vector<7x128xf32> to vector<128xf32>
    %880 = vector.shape_cast %879 : vector<128xf32> to vector<1x128xf32>
    %c15_560 = arith.constant 15 : index
    %c0_561 = arith.constant 0 : index
    %881 = vector.load %arg7[%c15_560, %c0_561] : memref<30x128xf32, #tpu.memory_space<vmem>>, vector<1x128xf32>
    %882 = arith.maximumf %881, %880 : vector<1x128xf32>
    %c15_562 = arith.constant 15 : index
    %c0_563 = arith.constant 0 : index
    %883 = vector.load %arg7[%c15_562, %c0_563] : memref<30x128xf32, #tpu.memory_space<vmem>>, vector<1x128xf32>
    tpu.vector_store %arg7[%c15_562, %c0_563], %882 {strides = array<i32>} : memref<30x128xf32, #tpu.memory_space<vmem>>, vector<1x128xf32>,
    %cst_564 = arith.constant dense<0xFF800000> : vector<128xf32>
    %884 = vector.multi_reduction <maximumf>, %859, %cst_564 [0] : vector<7x128xf32> to vector<128xf32>
    %885 = vector.shape_cast %884 : vector<128xf32> to vector<1x128xf32>
    %c16_565 = arith.constant 16 : index
    %c0_566 = arith.constant 0 : index
    %886 = vector.load %arg7[%c16_565, %c0_566] : memref<30x128xf32, #tpu.memory_space<vmem>>, vector<1x128xf32>
    %887 = arith.maximumf %886, %885 : vector<1x128xf32>
    %c16_567 = arith.constant 16 : index
    %c0_568 = arith.constant 0 : index
    %888 = vector.load %arg7[%c16_567, %c0_568] : memref<30x128xf32, #tpu.memory_space<vmem>>, vector<1x128xf32>
    tpu.vector_store %arg7[%c16_567, %c0_568], %887 {strides = array<i32>} : memref<30x128xf32, #tpu.memory_space<vmem>>, vector<1x128xf32>,
    %cst_569 = arith.constant dense<0xFF800000> : vector<128xf32>
    %889 = vector.multi_reduction <maximumf>, %863, %cst_569 [0] : vector<7x128xf32> to vector<128xf32>
    %890 = vector.shape_cast %889 : vector<128xf32> to vector<1x128xf32>
    %c17_570 = arith.constant 17 : index
    %c0_571 = arith.constant 0 : index
    %891 = vector.load %arg7[%c17_570, %c0_571] : memref<30x128xf32, #tpu.memory_space<vmem>>, vector<1x128xf32>
    %892 = arith.maximumf %891, %890 : vector<1x128xf32>
    %c17_572 = arith.constant 17 : index
    %c0_573 = arith.constant 0 : index
    %893 = vector.load %arg7[%c17_572, %c0_573] : memref<30x128xf32, #tpu.memory_space<vmem>>, vector<1x128xf32>
    tpu.vector_store %arg7[%c17_572, %c0_573], %892 {strides = array<i32>} : memref<30x128xf32, #tpu.memory_space<vmem>>, vector<1x128xf32>,
    %c0_574 = arith.constant 0 : index
    %c0_575 = arith.constant 0 : index
    %c0_576 = arith.constant 0 : index
    %894 = vector.load %arg8[%c0_574, %c0_575, %c0_576] : memref<10x8x128xf32, #tpu.memory_space<vmem>>, vector<1x7x128xf32>
    %895 = vector.shape_cast %894 : vector<1x7x128xf32> to vector<7x128xf32>
    %c18 = arith.constant 18 : index
    %c0_577 = arith.constant 0 : index
    %896 = memref.load %arg2[%c18, %c0_577] : memref<30x10xf32, #tpu.memory_space<smem>>
    %897 = vector.broadcast %896 : f32 to vector<7x128xf32>
    %898 = arith.mulf %897, %895 : vector<7x128xf32>
    %c19 = arith.constant 19 : index
    %c0_578 = arith.constant 0 : index
    %899 = memref.load %arg2[%c19, %c0_578] : memref<30x10xf32, #tpu.memory_space<smem>>
    %900 = vector.broadcast %899 : f32 to vector<7x128xf32>
    %901 = arith.mulf %900, %895 : vector<7x128xf32>
    %c20 = arith.constant 20 : index
    %c0_579 = arith.constant 0 : index
    %902 = memref.load %arg2[%c20, %c0_579] : memref<30x10xf32, #tpu.memory_space<smem>>
    %903 = vector.broadcast %902 : f32 to vector<7x128xf32>
    %904 = arith.mulf %903, %895 : vector<7x128xf32>
    %c21 = arith.constant 21 : index
    %c0_580 = arith.constant 0 : index
    %905 = memref.load %arg2[%c21, %c0_580] : memref<30x10xf32, #tpu.memory_space<smem>>
    %906 = vector.broadcast %905 : f32 to vector<7x128xf32>
    %907 = arith.mulf %906, %895 : vector<7x128xf32>
    %c22 = arith.constant 22 : index
    %c0_581 = arith.constant 0 : index
    %908 = memref.load %arg2[%c22, %c0_581] : memref<30x10xf32, #tpu.memory_space<smem>>
    %909 = vector.broadcast %908 : f32 to vector<7x128xf32>
    %910 = arith.mulf %909, %895 : vector<7x128xf32>
    %c23 = arith.constant 23 : index
    %c0_582 = arith.constant 0 : index
    %911 = memref.load %arg2[%c23, %c0_582] : memref<30x10xf32, #tpu.memory_space<smem>>
    %912 = vector.broadcast %911 : f32 to vector<7x128xf32>
    %913 = arith.mulf %912, %895 : vector<7x128xf32>
    %c1_583 = arith.constant 1 : index
    %c0_584 = arith.constant 0 : index
    %c0_585 = arith.constant 0 : index
    %914 = vector.load %arg8[%c1_583, %c0_584, %c0_585] : memref<10x8x128xf32, #tpu.memory_space<vmem>>, vector<1x7x128xf32>
    %915 = vector.shape_cast %914 : vector<1x7x128xf32> to vector<7x128xf32>
    %c18_586 = arith.constant 18 : index
    %c1_587 = arith.constant 1 : index
    %916 = memref.load %arg2[%c18_586, %c1_587] : memref<30x10xf32, #tpu.memory_space<smem>>
    %917 = vector.broadcast %916 : f32 to vector<7x128xf32>
    %918 = arith.mulf %917, %915 : vector<7x128xf32>
    %919 = arith.addf %898, %918 : vector<7x128xf32>
    %c19_588 = arith.constant 19 : index
    %c1_589 = arith.constant 1 : index
    %920 = memref.load %arg2[%c19_588, %c1_589] : memref<30x10xf32, #tpu.memory_space<smem>>
    %921 = vector.broadcast %920 : f32 to vector<7x128xf32>
    %922 = arith.mulf %921, %915 : vector<7x128xf32>
    %923 = arith.addf %901, %922 : vector<7x128xf32>
    %c20_590 = arith.constant 20 : index
    %c1_591 = arith.constant 1 : index
    %924 = memref.load %arg2[%c20_590, %c1_591] : memref<30x10xf32, #tpu.memory_space<smem>>
    %925 = vector.broadcast %924 : f32 to vector<7x128xf32>
    %926 = arith.mulf %925, %915 : vector<7x128xf32>
    %927 = arith.addf %904, %926 : vector<7x128xf32>
    %c21_592 = arith.constant 21 : index
    %c1_593 = arith.constant 1 : index
    %928 = memref.load %arg2[%c21_592, %c1_593] : memref<30x10xf32, #tpu.memory_space<smem>>
    %929 = vector.broadcast %928 : f32 to vector<7x128xf32>
    %930 = arith.mulf %929, %915 : vector<7x128xf32>
    %931 = arith.addf %907, %930 : vector<7x128xf32>
    %c22_594 = arith.constant 22 : index
    %c1_595 = arith.constant 1 : index
    %932 = memref.load %arg2[%c22_594, %c1_595] : memref<30x10xf32, #tpu.memory_space<smem>>
    %933 = vector.broadcast %932 : f32 to vector<7x128xf32>
    %934 = arith.mulf %933, %915 : vector<7x128xf32>
    %935 = arith.addf %910, %934 : vector<7x128xf32>
    %c23_596 = arith.constant 23 : index
    %c1_597 = arith.constant 1 : index
    %936 = memref.load %arg2[%c23_596, %c1_597] : memref<30x10xf32, #tpu.memory_space<smem>>
    %937 = vector.broadcast %936 : f32 to vector<7x128xf32>
    %938 = arith.mulf %937, %915 : vector<7x128xf32>
    %939 = arith.addf %913, %938 : vector<7x128xf32>
    %c2_598 = arith.constant 2 : index
    %c0_599 = arith.constant 0 : index
    %c0_600 = arith.constant 0 : index
    %940 = vector.load %arg8[%c2_598, %c0_599, %c0_600] : memref<10x8x128xf32, #tpu.memory_space<vmem>>, vector<1x7x128xf32>
    %941 = vector.shape_cast %940 : vector<1x7x128xf32> to vector<7x128xf32>
    %c18_601 = arith.constant 18 : index
    %c2_602 = arith.constant 2 : index
    %942 = memref.load %arg2[%c18_601, %c2_602] : memref<30x10xf32, #tpu.memory_space<smem>>
    %943 = vector.broadcast %942 : f32 to vector<7x128xf32>
    %944 = arith.mulf %943, %941 : vector<7x128xf32>
    %945 = arith.addf %919, %944 : vector<7x128xf32>
    %c19_603 = arith.constant 19 : index
    %c2_604 = arith.constant 2 : index
    %946 = memref.load %arg2[%c19_603, %c2_604] : memref<30x10xf32, #tpu.memory_space<smem>>
    %947 = vector.broadcast %946 : f32 to vector<7x128xf32>
    %948 = arith.mulf %947, %941 : vector<7x128xf32>
    %949 = arith.addf %923, %948 : vector<7x128xf32>
    %c20_605 = arith.constant 20 : index
    %c2_606 = arith.constant 2 : index
    %950 = memref.load %arg2[%c20_605, %c2_606] : memref<30x10xf32, #tpu.memory_space<smem>>
    %951 = vector.broadcast %950 : f32 to vector<7x128xf32>
    %952 = arith.mulf %951, %941 : vector<7x128xf32>
    %953 = arith.addf %927, %952 : vector<7x128xf32>
    %c21_607 = arith.constant 21 : index
    %c2_608 = arith.constant 2 : index
    %954 = memref.load %arg2[%c21_607, %c2_608] : memref<30x10xf32, #tpu.memory_space<smem>>
    %955 = vector.broadcast %954 : f32 to vector<7x128xf32>
    %956 = arith.mulf %955, %941 : vector<7x128xf32>
    %957 = arith.addf %931, %956 : vector<7x128xf32>
    %c22_609 = arith.constant 22 : index
    %c2_610 = arith.constant 2 : index
    %958 = memref.load %arg2[%c22_609, %c2_610] : memref<30x10xf32, #tpu.memory_space<smem>>
    %959 = vector.broadcast %958 : f32 to vector<7x128xf32>
    %960 = arith.mulf %959, %941 : vector<7x128xf32>
    %961 = arith.addf %935, %960 : vector<7x128xf32>
    %c23_611 = arith.constant 23 : index
    %c2_612 = arith.constant 2 : index
    %962 = memref.load %arg2[%c23_611, %c2_612] : memref<30x10xf32, #tpu.memory_space<smem>>
    %963 = vector.broadcast %962 : f32 to vector<7x128xf32>
    %964 = arith.mulf %963, %941 : vector<7x128xf32>
    %965 = arith.addf %939, %964 : vector<7x128xf32>
    %c3_613 = arith.constant 3 : index
    %c0_614 = arith.constant 0 : index
    %c0_615 = arith.constant 0 : index
    %966 = vector.load %arg8[%c3_613, %c0_614, %c0_615] : memref<10x8x128xf32, #tpu.memory_space<vmem>>, vector<1x7x128xf32>
    %967 = vector.shape_cast %966 : vector<1x7x128xf32> to vector<7x128xf32>
    %c18_616 = arith.constant 18 : index
    %c3_617 = arith.constant 3 : index
    %968 = memref.load %arg2[%c18_616, %c3_617] : memref<30x10xf32, #tpu.memory_space<smem>>
    %969 = vector.broadcast %968 : f32 to vector<7x128xf32>
    %970 = arith.mulf %969, %967 : vector<7x128xf32>
    %971 = arith.addf %945, %970 : vector<7x128xf32>
    %c19_618 = arith.constant 19 : index
    %c3_619 = arith.constant 3 : index
    %972 = memref.load %arg2[%c19_618, %c3_619] : memref<30x10xf32, #tpu.memory_space<smem>>
    %973 = vector.broadcast %972 : f32 to vector<7x128xf32>
    %974 = arith.mulf %973, %967 : vector<7x128xf32>
    %975 = arith.addf %949, %974 : vector<7x128xf32>
    %c20_620 = arith.constant 20 : index
    %c3_621 = arith.constant 3 : index
    %976 = memref.load %arg2[%c20_620, %c3_621] : memref<30x10xf32, #tpu.memory_space<smem>>
    %977 = vector.broadcast %976 : f32 to vector<7x128xf32>
    %978 = arith.mulf %977, %967 : vector<7x128xf32>
    %979 = arith.addf %953, %978 : vector<7x128xf32>
    %c21_622 = arith.constant 21 : index
    %c3_623 = arith.constant 3 : index
    %980 = memref.load %arg2[%c21_622, %c3_623] : memref<30x10xf32, #tpu.memory_space<smem>>
    %981 = vector.broadcast %980 : f32 to vector<7x128xf32>
    %982 = arith.mulf %981, %967 : vector<7x128xf32>
    %983 = arith.addf %957, %982 : vector<7x128xf32>
    %c22_624 = arith.constant 22 : index
    %c3_625 = arith.constant 3 : index
    %984 = memref.load %arg2[%c22_624, %c3_625] : memref<30x10xf32, #tpu.memory_space<smem>>
    %985 = vector.broadcast %984 : f32 to vector<7x128xf32>
    %986 = arith.mulf %985, %967 : vector<7x128xf32>
    %987 = arith.addf %961, %986 : vector<7x128xf32>
    %c23_626 = arith.constant 23 : index
    %c3_627 = arith.constant 3 : index
    %988 = memref.load %arg2[%c23_626, %c3_627] : memref<30x10xf32, #tpu.memory_space<smem>>
    %989 = vector.broadcast %988 : f32 to vector<7x128xf32>
    %990 = arith.mulf %989, %967 : vector<7x128xf32>
    %991 = arith.addf %965, %990 : vector<7x128xf32>
    %c4_628 = arith.constant 4 : index
    %c0_629 = arith.constant 0 : index
    %c0_630 = arith.constant 0 : index
    %992 = vector.load %arg8[%c4_628, %c0_629, %c0_630] : memref<10x8x128xf32, #tpu.memory_space<vmem>>, vector<1x7x128xf32>
    %993 = vector.shape_cast %992 : vector<1x7x128xf32> to vector<7x128xf32>
    %c18_631 = arith.constant 18 : index
    %c4_632 = arith.constant 4 : index
    %994 = memref.load %arg2[%c18_631, %c4_632] : memref<30x10xf32, #tpu.memory_space<smem>>
    %995 = vector.broadcast %994 : f32 to vector<7x128xf32>
    %996 = arith.mulf %995, %993 : vector<7x128xf32>
    %997 = arith.addf %971, %996 : vector<7x128xf32>
    %c19_633 = arith.constant 19 : index
    %c4_634 = arith.constant 4 : index
    %998 = memref.load %arg2[%c19_633, %c4_634] : memref<30x10xf32, #tpu.memory_space<smem>>
    %999 = vector.broadcast %998 : f32 to vector<7x128xf32>
    %1000 = arith.mulf %999, %993 : vector<7x128xf32>
    %1001 = arith.addf %975, %1000 : vector<7x128xf32>
    %c20_635 = arith.constant 20 : index
    %c4_636 = arith.constant 4 : index
    %1002 = memref.load %arg2[%c20_635, %c4_636] : memref<30x10xf32, #tpu.memory_space<smem>>
    %1003 = vector.broadcast %1002 : f32 to vector<7x128xf32>
    %1004 = arith.mulf %1003, %993 : vector<7x128xf32>
    %1005 = arith.addf %979, %1004 : vector<7x128xf32>
    %c21_637 = arith.constant 21 : index
    %c4_638 = arith.constant 4 : index
    %1006 = memref.load %arg2[%c21_637, %c4_638] : memref<30x10xf32, #tpu.memory_space<smem>>
    %1007 = vector.broadcast %1006 : f32 to vector<7x128xf32>
    %1008 = arith.mulf %1007, %993 : vector<7x128xf32>
    %1009 = arith.addf %983, %1008 : vector<7x128xf32>
    %c22_639 = arith.constant 22 : index
    %c4_640 = arith.constant 4 : index
    %1010 = memref.load %arg2[%c22_639, %c4_640] : memref<30x10xf32, #tpu.memory_space<smem>>
    %1011 = vector.broadcast %1010 : f32 to vector<7x128xf32>
    %1012 = arith.mulf %1011, %993 : vector<7x128xf32>
    %1013 = arith.addf %987, %1012 : vector<7x128xf32>
    %c23_641 = arith.constant 23 : index
    %c4_642 = arith.constant 4 : index
    %1014 = memref.load %arg2[%c23_641, %c4_642] : memref<30x10xf32, #tpu.memory_space<smem>>
    %1015 = vector.broadcast %1014 : f32 to vector<7x128xf32>
    %1016 = arith.mulf %1015, %993 : vector<7x128xf32>
    %1017 = arith.addf %991, %1016 : vector<7x128xf32>
    %c5_643 = arith.constant 5 : index
    %c0_644 = arith.constant 0 : index
    %c0_645 = arith.constant 0 : index
    %1018 = vector.load %arg8[%c5_643, %c0_644, %c0_645] : memref<10x8x128xf32, #tpu.memory_space<vmem>>, vector<1x7x128xf32>
    %1019 = vector.shape_cast %1018 : vector<1x7x128xf32> to vector<7x128xf32>
    %c18_646 = arith.constant 18 : index
    %c5_647 = arith.constant 5 : index
    %1020 = memref.load %arg2[%c18_646, %c5_647] : memref<30x10xf32, #tpu.memory_space<smem>>
    %1021 = vector.broadcast %1020 : f32 to vector<7x128xf32>
    %1022 = arith.mulf %1021, %1019 : vector<7x128xf32>
    %1023 = arith.addf %997, %1022 : vector<7x128xf32>
    %c19_648 = arith.constant 19 : index
    %c5_649 = arith.constant 5 : index
    %1024 = memref.load %arg2[%c19_648, %c5_649] : memref<30x10xf32, #tpu.memory_space<smem>>
    %1025 = vector.broadcast %1024 : f32 to vector<7x128xf32>
    %1026 = arith.mulf %1025, %1019 : vector<7x128xf32>
    %1027 = arith.addf %1001, %1026 : vector<7x128xf32>
    %c20_650 = arith.constant 20 : index
    %c5_651 = arith.constant 5 : index
    %1028 = memref.load %arg2[%c20_650, %c5_651] : memref<30x10xf32, #tpu.memory_space<smem>>
    %1029 = vector.broadcast %1028 : f32 to vector<7x128xf32>
    %1030 = arith.mulf %1029, %1019 : vector<7x128xf32>
    %1031 = arith.addf %1005, %1030 : vector<7x128xf32>
    %c21_652 = arith.constant 21 : index
    %c5_653 = arith.constant 5 : index
    %1032 = memref.load %arg2[%c21_652, %c5_653] : memref<30x10xf32, #tpu.memory_space<smem>>
    %1033 = vector.broadcast %1032 : f32 to vector<7x128xf32>
    %1034 = arith.mulf %1033, %1019 : vector<7x128xf32>
    %1035 = arith.addf %1009, %1034 : vector<7x128xf32>
    %c22_654 = arith.constant 22 : index
    %c5_655 = arith.constant 5 : index
    %1036 = memref.load %arg2[%c22_654, %c5_655] : memref<30x10xf32, #tpu.memory_space<smem>>
    %1037 = vector.broadcast %1036 : f32 to vector<7x128xf32>
    %1038 = arith.mulf %1037, %1019 : vector<7x128xf32>
    %1039 = arith.addf %1013, %1038 : vector<7x128xf32>
    %c23_656 = arith.constant 23 : index
    %c5_657 = arith.constant 5 : index
    %1040 = memref.load %arg2[%c23_656, %c5_657] : memref<30x10xf32, #tpu.memory_space<smem>>
    %1041 = vector.broadcast %1040 : f32 to vector<7x128xf32>
    %1042 = arith.mulf %1041, %1019 : vector<7x128xf32>
    %1043 = arith.addf %1017, %1042 : vector<7x128xf32>
    %c6_658 = arith.constant 6 : index
    %c0_659 = arith.constant 0 : index
    %c0_660 = arith.constant 0 : index
    %1044 = vector.load %arg8[%c6_658, %c0_659, %c0_660] : memref<10x8x128xf32, #tpu.memory_space<vmem>>, vector<1x7x128xf32>
    %1045 = vector.shape_cast %1044 : vector<1x7x128xf32> to vector<7x128xf32>
    %c18_661 = arith.constant 18 : index
    %c6_662 = arith.constant 6 : index
    %1046 = memref.load %arg2[%c18_661, %c6_662] : memref<30x10xf32, #tpu.memory_space<smem>>
    %1047 = vector.broadcast %1046 : f32 to vector<7x128xf32>
    %1048 = arith.mulf %1047, %1045 : vector<7x128xf32>
    %1049 = arith.addf %1023, %1048 : vector<7x128xf32>
    %c19_663 = arith.constant 19 : index
    %c6_664 = arith.constant 6 : index
    %1050 = memref.load %arg2[%c19_663, %c6_664] : memref<30x10xf32, #tpu.memory_space<smem>>
    %1051 = vector.broadcast %1050 : f32 to vector<7x128xf32>
    %1052 = arith.mulf %1051, %1045 : vector<7x128xf32>
    %1053 = arith.addf %1027, %1052 : vector<7x128xf32>
    %c20_665 = arith.constant 20 : index
    %c6_666 = arith.constant 6 : index
    %1054 = memref.load %arg2[%c20_665, %c6_666] : memref<30x10xf32, #tpu.memory_space<smem>>
    %1055 = vector.broadcast %1054 : f32 to vector<7x128xf32>
    %1056 = arith.mulf %1055, %1045 : vector<7x128xf32>
    %1057 = arith.addf %1031, %1056 : vector<7x128xf32>
    %c21_667 = arith.constant 21 : index
    %c6_668 = arith.constant 6 : index
    %1058 = memref.load %arg2[%c21_667, %c6_668] : memref<30x10xf32, #tpu.memory_space<smem>>
    %1059 = vector.broadcast %1058 : f32 to vector<7x128xf32>
    %1060 = arith.mulf %1059, %1045 : vector<7x128xf32>
    %1061 = arith.addf %1035, %1060 : vector<7x128xf32>
    %c22_669 = arith.constant 22 : index
    %c6_670 = arith.constant 6 : index
    %1062 = memref.load %arg2[%c22_669, %c6_670] : memref<30x10xf32, #tpu.memory_space<smem>>
    %1063 = vector.broadcast %1062 : f32 to vector<7x128xf32>
    %1064 = arith.mulf %1063, %1045 : vector<7x128xf32>
    %1065 = arith.addf %1039, %1064 : vector<7x128xf32>
    %c23_671 = arith.constant 23 : index
    %c6_672 = arith.constant 6 : index
    %1066 = memref.load %arg2[%c23_671, %c6_672] : memref<30x10xf32, #tpu.memory_space<smem>>
    %1067 = vector.broadcast %1066 : f32 to vector<7x128xf32>
    %1068 = arith.mulf %1067, %1045 : vector<7x128xf32>
    %1069 = arith.addf %1043, %1068 : vector<7x128xf32>
    %c7_673 = arith.constant 7 : index
    %c0_674 = arith.constant 0 : index
    %c0_675 = arith.constant 0 : index
    %1070 = vector.load %arg8[%c7_673, %c0_674, %c0_675] : memref<10x8x128xf32, #tpu.memory_space<vmem>>, vector<1x7x128xf32>
    %1071 = vector.shape_cast %1070 : vector<1x7x128xf32> to vector<7x128xf32>
    %c18_676 = arith.constant 18 : index
    %c7_677 = arith.constant 7 : index
    %1072 = memref.load %arg2[%c18_676, %c7_677] : memref<30x10xf32, #tpu.memory_space<smem>>
    %1073 = vector.broadcast %1072 : f32 to vector<7x128xf32>
    %1074 = arith.mulf %1073, %1071 : vector<7x128xf32>
    %1075 = arith.addf %1049, %1074 : vector<7x128xf32>
    %c19_678 = arith.constant 19 : index
    %c7_679 = arith.constant 7 : index
    %1076 = memref.load %arg2[%c19_678, %c7_679] : memref<30x10xf32, #tpu.memory_space<smem>>
    %1077 = vector.broadcast %1076 : f32 to vector<7x128xf32>
    %1078 = arith.mulf %1077, %1071 : vector<7x128xf32>
    %1079 = arith.addf %1053, %1078 : vector<7x128xf32>
    %c20_680 = arith.constant 20 : index
    %c7_681 = arith.constant 7 : index
    %1080 = memref.load %arg2[%c20_680, %c7_681] : memref<30x10xf32, #tpu.memory_space<smem>>
    %1081 = vector.broadcast %1080 : f32 to vector<7x128xf32>
    %1082 = arith.mulf %1081, %1071 : vector<7x128xf32>
    %1083 = arith.addf %1057, %1082 : vector<7x128xf32>
    %c21_682 = arith.constant 21 : index
    %c7_683 = arith.constant 7 : index
    %1084 = memref.load %arg2[%c21_682, %c7_683] : memref<30x10xf32, #tpu.memory_space<smem>>
    %1085 = vector.broadcast %1084 : f32 to vector<7x128xf32>
    %1086 = arith.mulf %1085, %1071 : vector<7x128xf32>
    %1087 = arith.addf %1061, %1086 : vector<7x128xf32>
    %c22_684 = arith.constant 22 : index
    %c7_685 = arith.constant 7 : index
    %1088 = memref.load %arg2[%c22_684, %c7_685] : memref<30x10xf32, #tpu.memory_space<smem>>
    %1089 = vector.broadcast %1088 : f32 to vector<7x128xf32>
    %1090 = arith.mulf %1089, %1071 : vector<7x128xf32>
    %1091 = arith.addf %1065, %1090 : vector<7x128xf32>
    %c23_686 = arith.constant 23 : index
    %c7_687 = arith.constant 7 : index
    %1092 = memref.load %arg2[%c23_686, %c7_687] : memref<30x10xf32, #tpu.memory_space<smem>>
    %1093 = vector.broadcast %1092 : f32 to vector<7x128xf32>
    %1094 = arith.mulf %1093, %1071 : vector<7x128xf32>
    %1095 = arith.addf %1069, %1094 : vector<7x128xf32>
    %c8_688 = arith.constant 8 : index
    %c0_689 = arith.constant 0 : index
    %c0_690 = arith.constant 0 : index
    %1096 = vector.load %arg8[%c8_688, %c0_689, %c0_690] : memref<10x8x128xf32, #tpu.memory_space<vmem>>, vector<1x7x128xf32>
    %1097 = vector.shape_cast %1096 : vector<1x7x128xf32> to vector<7x128xf32>
    %c18_691 = arith.constant 18 : index
    %c8_692 = arith.constant 8 : index
    %1098 = memref.load %arg2[%c18_691, %c8_692] : memref<30x10xf32, #tpu.memory_space<smem>>
    %1099 = vector.broadcast %1098 : f32 to vector<7x128xf32>
    %1100 = arith.mulf %1099, %1097 : vector<7x128xf32>
    %1101 = arith.addf %1075, %1100 : vector<7x128xf32>
    %c19_693 = arith.constant 19 : index
    %c8_694 = arith.constant 8 : index
    %1102 = memref.load %arg2[%c19_693, %c8_694] : memref<30x10xf32, #tpu.memory_space<smem>>
    %1103 = vector.broadcast %1102 : f32 to vector<7x128xf32>
    %1104 = arith.mulf %1103, %1097 : vector<7x128xf32>
    %1105 = arith.addf %1079, %1104 : vector<7x128xf32>
    %c20_695 = arith.constant 20 : index
    %c8_696 = arith.constant 8 : index
    %1106 = memref.load %arg2[%c20_695, %c8_696] : memref<30x10xf32, #tpu.memory_space<smem>>
    %1107 = vector.broadcast %1106 : f32 to vector<7x128xf32>
    %1108 = arith.mulf %1107, %1097 : vector<7x128xf32>
    %1109 = arith.addf %1083, %1108 : vector<7x128xf32>
    %c21_697 = arith.constant 21 : index
    %c8_698 = arith.constant 8 : index
    %1110 = memref.load %arg2[%c21_697, %c8_698] : memref<30x10xf32, #tpu.memory_space<smem>>
    %1111 = vector.broadcast %1110 : f32 to vector<7x128xf32>
    %1112 = arith.mulf %1111, %1097 : vector<7x128xf32>
    %1113 = arith.addf %1087, %1112 : vector<7x128xf32>
    %c22_699 = arith.constant 22 : index
    %c8_700 = arith.constant 8 : index
    %1114 = memref.load %arg2[%c22_699, %c8_700] : memref<30x10xf32, #tpu.memory_space<smem>>
    %1115 = vector.broadcast %1114 : f32 to vector<7x128xf32>
    %1116 = arith.mulf %1115, %1097 : vector<7x128xf32>
    %1117 = arith.addf %1091, %1116 : vector<7x128xf32>
    %c23_701 = arith.constant 23 : index
    %c8_702 = arith.constant 8 : index
    %1118 = memref.load %arg2[%c23_701, %c8_702] : memref<30x10xf32, #tpu.memory_space<smem>>
    %1119 = vector.broadcast %1118 : f32 to vector<7x128xf32>
    %1120 = arith.mulf %1119, %1097 : vector<7x128xf32>
    %1121 = arith.addf %1095, %1120 : vector<7x128xf32>
    %c9_703 = arith.constant 9 : index
    %c0_704 = arith.constant 0 : index
    %c0_705 = arith.constant 0 : index
    %1122 = vector.load %arg8[%c9_703, %c0_704, %c0_705] : memref<10x8x128xf32, #tpu.memory_space<vmem>>, vector<1x7x128xf32>
    %1123 = vector.shape_cast %1122 : vector<1x7x128xf32> to vector<7x128xf32>
    %c18_706 = arith.constant 18 : index
    %c9_707 = arith.constant 9 : index
    %1124 = memref.load %arg2[%c18_706, %c9_707] : memref<30x10xf32, #tpu.memory_space<smem>>
    %1125 = vector.broadcast %1124 : f32 to vector<7x128xf32>
    %1126 = arith.mulf %1125, %1123 : vector<7x128xf32>
    %1127 = arith.addf %1101, %1126 : vector<7x128xf32>
    %c19_708 = arith.constant 19 : index
    %c9_709 = arith.constant 9 : index
    %1128 = memref.load %arg2[%c19_708, %c9_709] : memref<30x10xf32, #tpu.memory_space<smem>>
    %1129 = vector.broadcast %1128 : f32 to vector<7x128xf32>
    %1130 = arith.mulf %1129, %1123 : vector<7x128xf32>
    %1131 = arith.addf %1105, %1130 : vector<7x128xf32>
    %c20_710 = arith.constant 20 : index
    %c9_711 = arith.constant 9 : index
    %1132 = memref.load %arg2[%c20_710, %c9_711] : memref<30x10xf32, #tpu.memory_space<smem>>
    %1133 = vector.broadcast %1132 : f32 to vector<7x128xf32>
    %1134 = arith.mulf %1133, %1123 : vector<7x128xf32>
    %1135 = arith.addf %1109, %1134 : vector<7x128xf32>
    %c21_712 = arith.constant 21 : index
    %c9_713 = arith.constant 9 : index
    %1136 = memref.load %arg2[%c21_712, %c9_713] : memref<30x10xf32, #tpu.memory_space<smem>>
    %1137 = vector.broadcast %1136 : f32 to vector<7x128xf32>
    %1138 = arith.mulf %1137, %1123 : vector<7x128xf32>
    %1139 = arith.addf %1113, %1138 : vector<7x128xf32>
    %c22_714 = arith.constant 22 : index
    %c9_715 = arith.constant 9 : index
    %1140 = memref.load %arg2[%c22_714, %c9_715] : memref<30x10xf32, #tpu.memory_space<smem>>
    %1141 = vector.broadcast %1140 : f32 to vector<7x128xf32>
    %1142 = arith.mulf %1141, %1123 : vector<7x128xf32>
    %1143 = arith.addf %1117, %1142 : vector<7x128xf32>
    %c23_716 = arith.constant 23 : index
    %c9_717 = arith.constant 9 : index
    %1144 = memref.load %arg2[%c23_716, %c9_717] : memref<30x10xf32, #tpu.memory_space<smem>>
    %1145 = vector.broadcast %1144 : f32 to vector<7x128xf32>
    %1146 = arith.mulf %1145, %1123 : vector<7x128xf32>
    %1147 = arith.addf %1121, %1146 : vector<7x128xf32>
    %cst_718 = arith.constant dense<0xFF800000> : vector<128xf32>
    %1148 = vector.multi_reduction <maximumf>, %1127, %cst_718 [0] : vector<7x128xf32> to vector<128xf32>
    %1149 = vector.shape_cast %1148 : vector<128xf32> to vector<1x128xf32>
    %c18_719 = arith.constant 18 : index
    %c0_720 = arith.constant 0 : index
    %1150 = vector.load %arg7[%c18_719, %c0_720] : memref<30x128xf32, #tpu.memory_space<vmem>>, vector<1x128xf32>
    %1151 = arith.maximumf %1150, %1149 : vector<1x128xf32>
    %c18_721 = arith.constant 18 : index
    %c0_722 = arith.constant 0 : index
    %1152 = vector.load %arg7[%c18_721, %c0_722] : memref<30x128xf32, #tpu.memory_space<vmem>>, vector<1x128xf32>
    tpu.vector_store %arg7[%c18_721, %c0_722], %1151 {strides = array<i32>} : memref<30x128xf32, #tpu.memory_space<vmem>>, vector<1x128xf32>,
    %cst_723 = arith.constant dense<0xFF800000> : vector<128xf32>
    %1153 = vector.multi_reduction <maximumf>, %1131, %cst_723 [0] : vector<7x128xf32> to vector<128xf32>
    %1154 = vector.shape_cast %1153 : vector<128xf32> to vector<1x128xf32>
    %c19_724 = arith.constant 19 : index
    %c0_725 = arith.constant 0 : index
    %1155 = vector.load %arg7[%c19_724, %c0_725] : memref<30x128xf32, #tpu.memory_space<vmem>>, vector<1x128xf32>
    %1156 = arith.maximumf %1155, %1154 : vector<1x128xf32>
    %c19_726 = arith.constant 19 : index
    %c0_727 = arith.constant 0 : index
    %1157 = vector.load %arg7[%c19_726, %c0_727] : memref<30x128xf32, #tpu.memory_space<vmem>>, vector<1x128xf32>
    tpu.vector_store %arg7[%c19_726, %c0_727], %1156 {strides = array<i32>} : memref<30x128xf32, #tpu.memory_space<vmem>>, vector<1x128xf32>,
    %cst_728 = arith.constant dense<0xFF800000> : vector<128xf32>
    %1158 = vector.multi_reduction <maximumf>, %1135, %cst_728 [0] : vector<7x128xf32> to vector<128xf32>
    %1159 = vector.shape_cast %1158 : vector<128xf32> to vector<1x128xf32>
    %c20_729 = arith.constant 20 : index
    %c0_730 = arith.constant 0 : index
    %1160 = vector.load %arg7[%c20_729, %c0_730] : memref<30x128xf32, #tpu.memory_space<vmem>>, vector<1x128xf32>
    %1161 = arith.maximumf %1160, %1159 : vector<1x128xf32>
    %c20_731 = arith.constant 20 : index
    %c0_732 = arith.constant 0 : index
    %1162 = vector.load %arg7[%c20_731, %c0_732] : memref<30x128xf32, #tpu.memory_space<vmem>>, vector<1x128xf32>
    tpu.vector_store %arg7[%c20_731, %c0_732], %1161 {strides = array<i32>} : memref<30x128xf32, #tpu.memory_space<vmem>>, vector<1x128xf32>,
    %cst_733 = arith.constant dense<0xFF800000> : vector<128xf32>
    %1163 = vector.multi_reduction <maximumf>, %1139, %cst_733 [0] : vector<7x128xf32> to vector<128xf32>
    %1164 = vector.shape_cast %1163 : vector<128xf32> to vector<1x128xf32>
    %c21_734 = arith.constant 21 : index
    %c0_735 = arith.constant 0 : index
    %1165 = vector.load %arg7[%c21_734, %c0_735] : memref<30x128xf32, #tpu.memory_space<vmem>>, vector<1x128xf32>
    %1166 = arith.maximumf %1165, %1164 : vector<1x128xf32>
    %c21_736 = arith.constant 21 : index
    %c0_737 = arith.constant 0 : index
    %1167 = vector.load %arg7[%c21_736, %c0_737] : memref<30x128xf32, #tpu.memory_space<vmem>>, vector<1x128xf32>
    tpu.vector_store %arg7[%c21_736, %c0_737], %1166 {strides = array<i32>} : memref<30x128xf32, #tpu.memory_space<vmem>>, vector<1x128xf32>,
    %cst_738 = arith.constant dense<0xFF800000> : vector<128xf32>
    %1168 = vector.multi_reduction <maximumf>, %1143, %cst_738 [0] : vector<7x128xf32> to vector<128xf32>
    %1169 = vector.shape_cast %1168 : vector<128xf32> to vector<1x128xf32>
    %c22_739 = arith.constant 22 : index
    %c0_740 = arith.constant 0 : index
    %1170 = vector.load %arg7[%c22_739, %c0_740] : memref<30x128xf32, #tpu.memory_space<vmem>>, vector<1x128xf32>
    %1171 = arith.maximumf %1170, %1169 : vector<1x128xf32>
    %c22_741 = arith.constant 22 : index
    %c0_742 = arith.constant 0 : index
    %1172 = vector.load %arg7[%c22_741, %c0_742] : memref<30x128xf32, #tpu.memory_space<vmem>>, vector<1x128xf32>
    tpu.vector_store %arg7[%c22_741, %c0_742], %1171 {strides = array<i32>} : memref<30x128xf32, #tpu.memory_space<vmem>>, vector<1x128xf32>,
    %cst_743 = arith.constant dense<0xFF800000> : vector<128xf32>
    %1173 = vector.multi_reduction <maximumf>, %1147, %cst_743 [0] : vector<7x128xf32> to vector<128xf32>
    %1174 = vector.shape_cast %1173 : vector<128xf32> to vector<1x128xf32>
    %c23_744 = arith.constant 23 : index
    %c0_745 = arith.constant 0 : index
    %1175 = vector.load %arg7[%c23_744, %c0_745] : memref<30x128xf32, #tpu.memory_space<vmem>>, vector<1x128xf32>
    %1176 = arith.maximumf %1175, %1174 : vector<1x128xf32>
    %c23_746 = arith.constant 23 : index
    %c0_747 = arith.constant 0 : index
    %1177 = vector.load %arg7[%c23_746, %c0_747] : memref<30x128xf32, #tpu.memory_space<vmem>>, vector<1x128xf32>
    tpu.vector_store %arg7[%c23_746, %c0_747], %1176 {strides = array<i32>} : memref<30x128xf32, #tpu.memory_space<vmem>>, vector<1x128xf32>,
    %c0_748 = arith.constant 0 : index
    %c0_749 = arith.constant 0 : index
    %c0_750 = arith.constant 0 : index
    %1178 = vector.load %arg8[%c0_748, %c0_749, %c0_750] : memref<10x8x128xf32, #tpu.memory_space<vmem>>, vector<1x7x128xf32>
    %1179 = vector.shape_cast %1178 : vector<1x7x128xf32> to vector<7x128xf32>
    %c24 = arith.constant 24 : index
    %c0_751 = arith.constant 0 : index
    %1180 = memref.load %arg2[%c24, %c0_751] : memref<30x10xf32, #tpu.memory_space<smem>>
    %1181 = vector.broadcast %1180 : f32 to vector<7x128xf32>
    %1182 = arith.mulf %1181, %1179 : vector<7x128xf32>
    %c25 = arith.constant 25 : index
    %c0_752 = arith.constant 0 : index
    %1183 = memref.load %arg2[%c25, %c0_752] : memref<30x10xf32, #tpu.memory_space<smem>>
    %1184 = vector.broadcast %1183 : f32 to vector<7x128xf32>
    %1185 = arith.mulf %1184, %1179 : vector<7x128xf32>
    %c26 = arith.constant 26 : index
    %c0_753 = arith.constant 0 : index
    %1186 = memref.load %arg2[%c26, %c0_753] : memref<30x10xf32, #tpu.memory_space<smem>>
    %1187 = vector.broadcast %1186 : f32 to vector<7x128xf32>
    %1188 = arith.mulf %1187, %1179 : vector<7x128xf32>
    %c27 = arith.constant 27 : index
    %c0_754 = arith.constant 0 : index
    %1189 = memref.load %arg2[%c27, %c0_754] : memref<30x10xf32, #tpu.memory_space<smem>>
    %1190 = vector.broadcast %1189 : f32 to vector<7x128xf32>
    %1191 = arith.mulf %1190, %1179 : vector<7x128xf32>
    %c28 = arith.constant 28 : index
    %c0_755 = arith.constant 0 : index
    %1192 = memref.load %arg2[%c28, %c0_755] : memref<30x10xf32, #tpu.memory_space<smem>>
    %1193 = vector.broadcast %1192 : f32 to vector<7x128xf32>
    %1194 = arith.mulf %1193, %1179 : vector<7x128xf32>
    %c29 = arith.constant 29 : index
    %c0_756 = arith.constant 0 : index
    %1195 = memref.load %arg2[%c29, %c0_756] : memref<30x10xf32, #tpu.memory_space<smem>>
    %1196 = vector.broadcast %1195 : f32 to vector<7x128xf32>
    %1197 = arith.mulf %1196, %1179 : vector<7x128xf32>
    %c1_757 = arith.constant 1 : index
    %c0_758 = arith.constant 0 : index
    %c0_759 = arith.constant 0 : index
    %1198 = vector.load %arg8[%c1_757, %c0_758, %c0_759] : memref<10x8x128xf32, #tpu.memory_space<vmem>>, vector<1x7x128xf32>
    %1199 = vector.shape_cast %1198 : vector<1x7x128xf32> to vector<7x128xf32>
    %c24_760 = arith.constant 24 : index
    %c1_761 = arith.constant 1 : index
    %1200 = memref.load %arg2[%c24_760, %c1_761] : memref<30x10xf32, #tpu.memory_space<smem>>
    %1201 = vector.broadcast %1200 : f32 to vector<7x128xf32>
    %1202 = arith.mulf %1201, %1199 : vector<7x128xf32>
    %1203 = arith.addf %1182, %1202 : vector<7x128xf32>
    %c25_762 = arith.constant 25 : index
    %c1_763 = arith.constant 1 : index
    %1204 = memref.load %arg2[%c25_762, %c1_763] : memref<30x10xf32, #tpu.memory_space<smem>>
    %1205 = vector.broadcast %1204 : f32 to vector<7x128xf32>
    %1206 = arith.mulf %1205, %1199 : vector<7x128xf32>
    %1207 = arith.addf %1185, %1206 : vector<7x128xf32>
    %c26_764 = arith.constant 26 : index
    %c1_765 = arith.constant 1 : index
    %1208 = memref.load %arg2[%c26_764, %c1_765] : memref<30x10xf32, #tpu.memory_space<smem>>
    %1209 = vector.broadcast %1208 : f32 to vector<7x128xf32>
    %1210 = arith.mulf %1209, %1199 : vector<7x128xf32>
    %1211 = arith.addf %1188, %1210 : vector<7x128xf32>
    %c27_766 = arith.constant 27 : index
    %c1_767 = arith.constant 1 : index
    %1212 = memref.load %arg2[%c27_766, %c1_767] : memref<30x10xf32, #tpu.memory_space<smem>>
    %1213 = vector.broadcast %1212 : f32 to vector<7x128xf32>
    %1214 = arith.mulf %1213, %1199 : vector<7x128xf32>
    %1215 = arith.addf %1191, %1214 : vector<7x128xf32>
    %c28_768 = arith.constant 28 : index
    %c1_769 = arith.constant 1 : index
    %1216 = memref.load %arg2[%c28_768, %c1_769] : memref<30x10xf32, #tpu.memory_space<smem>>
    %1217 = vector.broadcast %1216 : f32 to vector<7x128xf32>
    %1218 = arith.mulf %1217, %1199 : vector<7x128xf32>
    %1219 = arith.addf %1194, %1218 : vector<7x128xf32>
    %c29_770 = arith.constant 29 : index
    %c1_771 = arith.constant 1 : index
    %1220 = memref.load %arg2[%c29_770, %c1_771] : memref<30x10xf32, #tpu.memory_space<smem>>
    %1221 = vector.broadcast %1220 : f32 to vector<7x128xf32>
    %1222 = arith.mulf %1221, %1199 : vector<7x128xf32>
    %1223 = arith.addf %1197, %1222 : vector<7x128xf32>
    %c2_772 = arith.constant 2 : index
    %c0_773 = arith.constant 0 : index
    %c0_774 = arith.constant 0 : index
    %1224 = vector.load %arg8[%c2_772, %c0_773, %c0_774] : memref<10x8x128xf32, #tpu.memory_space<vmem>>, vector<1x7x128xf32>
    %1225 = vector.shape_cast %1224 : vector<1x7x128xf32> to vector<7x128xf32>
    %c24_775 = arith.constant 24 : index
    %c2_776 = arith.constant 2 : index
    %1226 = memref.load %arg2[%c24_775, %c2_776] : memref<30x10xf32, #tpu.memory_space<smem>>
    %1227 = vector.broadcast %1226 : f32 to vector<7x128xf32>
    %1228 = arith.mulf %1227, %1225 : vector<7x128xf32>
    %1229 = arith.addf %1203, %1228 : vector<7x128xf32>
    %c25_777 = arith.constant 25 : index
    %c2_778 = arith.constant 2 : index
    %1230 = memref.load %arg2[%c25_777, %c2_778] : memref<30x10xf32, #tpu.memory_space<smem>>
    %1231 = vector.broadcast %1230 : f32 to vector<7x128xf32>
    %1232 = arith.mulf %1231, %1225 : vector<7x128xf32>
    %1233 = arith.addf %1207, %1232 : vector<7x128xf32>
    %c26_779 = arith.constant 26 : index
    %c2_780 = arith.constant 2 : index
    %1234 = memref.load %arg2[%c26_779, %c2_780] : memref<30x10xf32, #tpu.memory_space<smem>>
    %1235 = vector.broadcast %1234 : f32 to vector<7x128xf32>
    %1236 = arith.mulf %1235, %1225 : vector<7x128xf32>
    %1237 = arith.addf %1211, %1236 : vector<7x128xf32>
    %c27_781 = arith.constant 27 : index
    %c2_782 = arith.constant 2 : index
    %1238 = memref.load %arg2[%c27_781, %c2_782] : memref<30x10xf32, #tpu.memory_space<smem>>
    %1239 = vector.broadcast %1238 : f32 to vector<7x128xf32>
    %1240 = arith.mulf %1239, %1225 : vector<7x128xf32>
    %1241 = arith.addf %1215, %1240 : vector<7x128xf32>
    %c28_783 = arith.constant 28 : index
    %c2_784 = arith.constant 2 : index
    %1242 = memref.load %arg2[%c28_783, %c2_784] : memref<30x10xf32, #tpu.memory_space<smem>>
    %1243 = vector.broadcast %1242 : f32 to vector<7x128xf32>
    %1244 = arith.mulf %1243, %1225 : vector<7x128xf32>
    %1245 = arith.addf %1219, %1244 : vector<7x128xf32>
    %c29_785 = arith.constant 29 : index
    %c2_786 = arith.constant 2 : index
    %1246 = memref.load %arg2[%c29_785, %c2_786] : memref<30x10xf32, #tpu.memory_space<smem>>
    %1247 = vector.broadcast %1246 : f32 to vector<7x128xf32>
    %1248 = arith.mulf %1247, %1225 : vector<7x128xf32>
    %1249 = arith.addf %1223, %1248 : vector<7x128xf32>
    %c3_787 = arith.constant 3 : index
    %c0_788 = arith.constant 0 : index
    %c0_789 = arith.constant 0 : index
    %1250 = vector.load %arg8[%c3_787, %c0_788, %c0_789] : memref<10x8x128xf32, #tpu.memory_space<vmem>>, vector<1x7x128xf32>
    %1251 = vector.shape_cast %1250 : vector<1x7x128xf32> to vector<7x128xf32>
    %c24_790 = arith.constant 24 : index
    %c3_791 = arith.constant 3 : index
    %1252 = memref.load %arg2[%c24_790, %c3_791] : memref<30x10xf32, #tpu.memory_space<smem>>
    %1253 = vector.broadcast %1252 : f32 to vector<7x128xf32>
    %1254 = arith.mulf %1253, %1251 : vector<7x128xf32>
    %1255 = arith.addf %1229, %1254 : vector<7x128xf32>
    %c25_792 = arith.constant 25 : index
    %c3_793 = arith.constant 3 : index
    %1256 = memref.load %arg2[%c25_792, %c3_793] : memref<30x10xf32, #tpu.memory_space<smem>>
    %1257 = vector.broadcast %1256 : f32 to vector<7x128xf32>
    %1258 = arith.mulf %1257, %1251 : vector<7x128xf32>
    %1259 = arith.addf %1233, %1258 : vector<7x128xf32>
    %c26_794 = arith.constant 26 : index
    %c3_795 = arith.constant 3 : index
    %1260 = memref.load %arg2[%c26_794, %c3_795] : memref<30x10xf32, #tpu.memory_space<smem>>
    %1261 = vector.broadcast %1260 : f32 to vector<7x128xf32>
    %1262 = arith.mulf %1261, %1251 : vector<7x128xf32>
    %1263 = arith.addf %1237, %1262 : vector<7x128xf32>
    %c27_796 = arith.constant 27 : index
    %c3_797 = arith.constant 3 : index
    %1264 = memref.load %arg2[%c27_796, %c3_797] : memref<30x10xf32, #tpu.memory_space<smem>>
    %1265 = vector.broadcast %1264 : f32 to vector<7x128xf32>
    %1266 = arith.mulf %1265, %1251 : vector<7x128xf32>
    %1267 = arith.addf %1241, %1266 : vector<7x128xf32>
    %c28_798 = arith.constant 28 : index
    %c3_799 = arith.constant 3 : index
    %1268 = memref.load %arg2[%c28_798, %c3_799] : memref<30x10xf32, #tpu.memory_space<smem>>
    %1269 = vector.broadcast %1268 : f32 to vector<7x128xf32>
    %1270 = arith.mulf %1269, %1251 : vector<7x128xf32>
    %1271 = arith.addf %1245, %1270 : vector<7x128xf32>
    %c29_800 = arith.constant 29 : index
    %c3_801 = arith.constant 3 : index
    %1272 = memref.load %arg2[%c29_800, %c3_801] : memref<30x10xf32, #tpu.memory_space<smem>>
    %1273 = vector.broadcast %1272 : f32 to vector<7x128xf32>
    %1274 = arith.mulf %1273, %1251 : vector<7x128xf32>
    %1275 = arith.addf %1249, %1274 : vector<7x128xf32>
    %c4_802 = arith.constant 4 : index
    %c0_803 = arith.constant 0 : index
    %c0_804 = arith.constant 0 : index
    %1276 = vector.load %arg8[%c4_802, %c0_803, %c0_804] : memref<10x8x128xf32, #tpu.memory_space<vmem>>, vector<1x7x128xf32>
    %1277 = vector.shape_cast %1276 : vector<1x7x128xf32> to vector<7x128xf32>
    %c24_805 = arith.constant 24 : index
    %c4_806 = arith.constant 4 : index
    %1278 = memref.load %arg2[%c24_805, %c4_806] : memref<30x10xf32, #tpu.memory_space<smem>>
    %1279 = vector.broadcast %1278 : f32 to vector<7x128xf32>
    %1280 = arith.mulf %1279, %1277 : vector<7x128xf32>
    %1281 = arith.addf %1255, %1280 : vector<7x128xf32>
    %c25_807 = arith.constant 25 : index
    %c4_808 = arith.constant 4 : index
    %1282 = memref.load %arg2[%c25_807, %c4_808] : memref<30x10xf32, #tpu.memory_space<smem>>
    %1283 = vector.broadcast %1282 : f32 to vector<7x128xf32>
    %1284 = arith.mulf %1283, %1277 : vector<7x128xf32>
    %1285 = arith.addf %1259, %1284 : vector<7x128xf32>
    %c26_809 = arith.constant 26 : index
    %c4_810 = arith.constant 4 : index
    %1286 = memref.load %arg2[%c26_809, %c4_810] : memref<30x10xf32, #tpu.memory_space<smem>>
    %1287 = vector.broadcast %1286 : f32 to vector<7x128xf32>
    %1288 = arith.mulf %1287, %1277 : vector<7x128xf32>
    %1289 = arith.addf %1263, %1288 : vector<7x128xf32>
    %c27_811 = arith.constant 27 : index
    %c4_812 = arith.constant 4 : index
    %1290 = memref.load %arg2[%c27_811, %c4_812] : memref<30x10xf32, #tpu.memory_space<smem>>
    %1291 = vector.broadcast %1290 : f32 to vector<7x128xf32>
    %1292 = arith.mulf %1291, %1277 : vector<7x128xf32>
    %1293 = arith.addf %1267, %1292 : vector<7x128xf32>
    %c28_813 = arith.constant 28 : index
    %c4_814 = arith.constant 4 : index
    %1294 = memref.load %arg2[%c28_813, %c4_814] : memref<30x10xf32, #tpu.memory_space<smem>>
    %1295 = vector.broadcast %1294 : f32 to vector<7x128xf32>
    %1296 = arith.mulf %1295, %1277 : vector<7x128xf32>
    %1297 = arith.addf %1271, %1296 : vector<7x128xf32>
    %c29_815 = arith.constant 29 : index
    %c4_816 = arith.constant 4 : index
    %1298 = memref.load %arg2[%c29_815, %c4_816] : memref<30x10xf32, #tpu.memory_space<smem>>
    %1299 = vector.broadcast %1298 : f32 to vector<7x128xf32>
    %1300 = arith.mulf %1299, %1277 : vector<7x128xf32>
    %1301 = arith.addf %1275, %1300 : vector<7x128xf32>
    %c5_817 = arith.constant 5 : index
    %c0_818 = arith.constant 0 : index
    %c0_819 = arith.constant 0 : index
    %1302 = vector.load %arg8[%c5_817, %c0_818, %c0_819] : memref<10x8x128xf32, #tpu.memory_space<vmem>>, vector<1x7x128xf32>
    %1303 = vector.shape_cast %1302 : vector<1x7x128xf32> to vector<7x128xf32>
    %c24_820 = arith.constant 24 : index
    %c5_821 = arith.constant 5 : index
    %1304 = memref.load %arg2[%c24_820, %c5_821] : memref<30x10xf32, #tpu.memory_space<smem>>
    %1305 = vector.broadcast %1304 : f32 to vector<7x128xf32>
    %1306 = arith.mulf %1305, %1303 : vector<7x128xf32>
    %1307 = arith.addf %1281, %1306 : vector<7x128xf32>
    %c25_822 = arith.constant 25 : index
    %c5_823 = arith.constant 5 : index
    %1308 = memref.load %arg2[%c25_822, %c5_823] : memref<30x10xf32, #tpu.memory_space<smem>>
    %1309 = vector.broadcast %1308 : f32 to vector<7x128xf32>
    %1310 = arith.mulf %1309, %1303 : vector<7x128xf32>
    %1311 = arith.addf %1285, %1310 : vector<7x128xf32>
    %c26_824 = arith.constant 26 : index
    %c5_825 = arith.constant 5 : index
    %1312 = memref.load %arg2[%c26_824, %c5_825] : memref<30x10xf32, #tpu.memory_space<smem>>
    %1313 = vector.broadcast %1312 : f32 to vector<7x128xf32>
    %1314 = arith.mulf %1313, %1303 : vector<7x128xf32>
    %1315 = arith.addf %1289, %1314 : vector<7x128xf32>
    %c27_826 = arith.constant 27 : index
    %c5_827 = arith.constant 5 : index
    %1316 = memref.load %arg2[%c27_826, %c5_827] : memref<30x10xf32, #tpu.memory_space<smem>>
    %1317 = vector.broadcast %1316 : f32 to vector<7x128xf32>
    %1318 = arith.mulf %1317, %1303 : vector<7x128xf32>
    %1319 = arith.addf %1293, %1318 : vector<7x128xf32>
    %c28_828 = arith.constant 28 : index
    %c5_829 = arith.constant 5 : index
    %1320 = memref.load %arg2[%c28_828, %c5_829] : memref<30x10xf32, #tpu.memory_space<smem>>
    %1321 = vector.broadcast %1320 : f32 to vector<7x128xf32>
    %1322 = arith.mulf %1321, %1303 : vector<7x128xf32>
    %1323 = arith.addf %1297, %1322 : vector<7x128xf32>
    %c29_830 = arith.constant 29 : index
    %c5_831 = arith.constant 5 : index
    %1324 = memref.load %arg2[%c29_830, %c5_831] : memref<30x10xf32, #tpu.memory_space<smem>>
    %1325 = vector.broadcast %1324 : f32 to vector<7x128xf32>
    %1326 = arith.mulf %1325, %1303 : vector<7x128xf32>
    %1327 = arith.addf %1301, %1326 : vector<7x128xf32>
    %c6_832 = arith.constant 6 : index
    %c0_833 = arith.constant 0 : index
    %c0_834 = arith.constant 0 : index
    %1328 = vector.load %arg8[%c6_832, %c0_833, %c0_834] : memref<10x8x128xf32, #tpu.memory_space<vmem>>, vector<1x7x128xf32>
    %1329 = vector.shape_cast %1328 : vector<1x7x128xf32> to vector<7x128xf32>
    %c24_835 = arith.constant 24 : index
    %c6_836 = arith.constant 6 : index
    %1330 = memref.load %arg2[%c24_835, %c6_836] : memref<30x10xf32, #tpu.memory_space<smem>>
    %1331 = vector.broadcast %1330 : f32 to vector<7x128xf32>
    %1332 = arith.mulf %1331, %1329 : vector<7x128xf32>
    %1333 = arith.addf %1307, %1332 : vector<7x128xf32>
    %c25_837 = arith.constant 25 : index
    %c6_838 = arith.constant 6 : index
    %1334 = memref.load %arg2[%c25_837, %c6_838] : memref<30x10xf32, #tpu.memory_space<smem>>
    %1335 = vector.broadcast %1334 : f32 to vector<7x128xf32>
    %1336 = arith.mulf %1335, %1329 : vector<7x128xf32>
    %1337 = arith.addf %1311, %1336 : vector<7x128xf32>
    %c26_839 = arith.constant 26 : index
    %c6_840 = arith.constant 6 : index
    %1338 = memref.load %arg2[%c26_839, %c6_840] : memref<30x10xf32, #tpu.memory_space<smem>>
    %1339 = vector.broadcast %1338 : f32 to vector<7x128xf32>
    %1340 = arith.mulf %1339, %1329 : vector<7x128xf32>
    %1341 = arith.addf %1315, %1340 : vector<7x128xf32>
    %c27_841 = arith.constant 27 : index
    %c6_842 = arith.constant 6 : index
    %1342 = memref.load %arg2[%c27_841, %c6_842] : memref<30x10xf32, #tpu.memory_space<smem>>
    %1343 = vector.broadcast %1342 : f32 to vector<7x128xf32>
    %1344 = arith.mulf %1343, %1329 : vector<7x128xf32>
    %1345 = arith.addf %1319, %1344 : vector<7x128xf32>
    %c28_843 = arith.constant 28 : index
    %c6_844 = arith.constant 6 : index
    %1346 = memref.load %arg2[%c28_843, %c6_844] : memref<30x10xf32, #tpu.memory_space<smem>>
    %1347 = vector.broadcast %1346 : f32 to vector<7x128xf32>
    %1348 = arith.mulf %1347, %1329 : vector<7x128xf32>
    %1349 = arith.addf %1323, %1348 : vector<7x128xf32>
    %c29_845 = arith.constant 29 : index
    %c6_846 = arith.constant 6 : index
    %1350 = memref.load %arg2[%c29_845, %c6_846] : memref<30x10xf32, #tpu.memory_space<smem>>
    %1351 = vector.broadcast %1350 : f32 to vector<7x128xf32>
    %1352 = arith.mulf %1351, %1329 : vector<7x128xf32>
    %1353 = arith.addf %1327, %1352 : vector<7x128xf32>
    %c7_847 = arith.constant 7 : index
    %c0_848 = arith.constant 0 : index
    %c0_849 = arith.constant 0 : index
    %1354 = vector.load %arg8[%c7_847, %c0_848, %c0_849] : memref<10x8x128xf32, #tpu.memory_space<vmem>>, vector<1x7x128xf32>
    %1355 = vector.shape_cast %1354 : vector<1x7x128xf32> to vector<7x128xf32>
    %c24_850 = arith.constant 24 : index
    %c7_851 = arith.constant 7 : index
    %1356 = memref.load %arg2[%c24_850, %c7_851] : memref<30x10xf32, #tpu.memory_space<smem>>
    %1357 = vector.broadcast %1356 : f32 to vector<7x128xf32>
    %1358 = arith.mulf %1357, %1355 : vector<7x128xf32>
    %1359 = arith.addf %1333, %1358 : vector<7x128xf32>
    %c25_852 = arith.constant 25 : index
    %c7_853 = arith.constant 7 : index
    %1360 = memref.load %arg2[%c25_852, %c7_853] : memref<30x10xf32, #tpu.memory_space<smem>>
    %1361 = vector.broadcast %1360 : f32 to vector<7x128xf32>
    %1362 = arith.mulf %1361, %1355 : vector<7x128xf32>
    %1363 = arith.addf %1337, %1362 : vector<7x128xf32>
    %c26_854 = arith.constant 26 : index
    %c7_855 = arith.constant 7 : index
    %1364 = memref.load %arg2[%c26_854, %c7_855] : memref<30x10xf32, #tpu.memory_space<smem>>
    %1365 = vector.broadcast %1364 : f32 to vector<7x128xf32>
    %1366 = arith.mulf %1365, %1355 : vector<7x128xf32>
    %1367 = arith.addf %1341, %1366 : vector<7x128xf32>
    %c27_856 = arith.constant 27 : index
    %c7_857 = arith.constant 7 : index
    %1368 = memref.load %arg2[%c27_856, %c7_857] : memref<30x10xf32, #tpu.memory_space<smem>>
    %1369 = vector.broadcast %1368 : f32 to vector<7x128xf32>
    %1370 = arith.mulf %1369, %1355 : vector<7x128xf32>
    %1371 = arith.addf %1345, %1370 : vector<7x128xf32>
    %c28_858 = arith.constant 28 : index
    %c7_859 = arith.constant 7 : index
    %1372 = memref.load %arg2[%c28_858, %c7_859] : memref<30x10xf32, #tpu.memory_space<smem>>
    %1373 = vector.broadcast %1372 : f32 to vector<7x128xf32>
    %1374 = arith.mulf %1373, %1355 : vector<7x128xf32>
    %1375 = arith.addf %1349, %1374 : vector<7x128xf32>
    %c29_860 = arith.constant 29 : index
    %c7_861 = arith.constant 7 : index
    %1376 = memref.load %arg2[%c29_860, %c7_861] : memref<30x10xf32, #tpu.memory_space<smem>>
    %1377 = vector.broadcast %1376 : f32 to vector<7x128xf32>
    %1378 = arith.mulf %1377, %1355 : vector<7x128xf32>
    %1379 = arith.addf %1353, %1378 : vector<7x128xf32>
    %c8_862 = arith.constant 8 : index
    %c0_863 = arith.constant 0 : index
    %c0_864 = arith.constant 0 : index
    %1380 = vector.load %arg8[%c8_862, %c0_863, %c0_864] : memref<10x8x128xf32, #tpu.memory_space<vmem>>, vector<1x7x128xf32>
    %1381 = vector.shape_cast %1380 : vector<1x7x128xf32> to vector<7x128xf32>
    %c24_865 = arith.constant 24 : index
    %c8_866 = arith.constant 8 : index
    %1382 = memref.load %arg2[%c24_865, %c8_866] : memref<30x10xf32, #tpu.memory_space<smem>>
    %1383 = vector.broadcast %1382 : f32 to vector<7x128xf32>
    %1384 = arith.mulf %1383, %1381 : vector<7x128xf32>
    %1385 = arith.addf %1359, %1384 : vector<7x128xf32>
    %c25_867 = arith.constant 25 : index
    %c8_868 = arith.constant 8 : index
    %1386 = memref.load %arg2[%c25_867, %c8_868] : memref<30x10xf32, #tpu.memory_space<smem>>
    %1387 = vector.broadcast %1386 : f32 to vector<7x128xf32>
    %1388 = arith.mulf %1387, %1381 : vector<7x128xf32>
    %1389 = arith.addf %1363, %1388 : vector<7x128xf32>
    %c26_869 = arith.constant 26 : index
    %c8_870 = arith.constant 8 : index
    %1390 = memref.load %arg2[%c26_869, %c8_870] : memref<30x10xf32, #tpu.memory_space<smem>>
    %1391 = vector.broadcast %1390 : f32 to vector<7x128xf32>
    %1392 = arith.mulf %1391, %1381 : vector<7x128xf32>
    %1393 = arith.addf %1367, %1392 : vector<7x128xf32>
    %c27_871 = arith.constant 27 : index
    %c8_872 = arith.constant 8 : index
    %1394 = memref.load %arg2[%c27_871, %c8_872] : memref<30x10xf32, #tpu.memory_space<smem>>
    %1395 = vector.broadcast %1394 : f32 to vector<7x128xf32>
    %1396 = arith.mulf %1395, %1381 : vector<7x128xf32>
    %1397 = arith.addf %1371, %1396 : vector<7x128xf32>
    %c28_873 = arith.constant 28 : index
    %c8_874 = arith.constant 8 : index
    %1398 = memref.load %arg2[%c28_873, %c8_874] : memref<30x10xf32, #tpu.memory_space<smem>>
    %1399 = vector.broadcast %1398 : f32 to vector<7x128xf32>
    %1400 = arith.mulf %1399, %1381 : vector<7x128xf32>
    %1401 = arith.addf %1375, %1400 : vector<7x128xf32>
    %c29_875 = arith.constant 29 : index
    %c8_876 = arith.constant 8 : index
    %1402 = memref.load %arg2[%c29_875, %c8_876] : memref<30x10xf32, #tpu.memory_space<smem>>
    %1403 = vector.broadcast %1402 : f32 to vector<7x128xf32>
    %1404 = arith.mulf %1403, %1381 : vector<7x128xf32>
    %1405 = arith.addf %1379, %1404 : vector<7x128xf32>
    %c9_877 = arith.constant 9 : index
    %c0_878 = arith.constant 0 : index
    %c0_879 = arith.constant 0 : index
    %1406 = vector.load %arg8[%c9_877, %c0_878, %c0_879] : memref<10x8x128xf32, #tpu.memory_space<vmem>>, vector<1x7x128xf32>
    %1407 = vector.shape_cast %1406 : vector<1x7x128xf32> to vector<7x128xf32>
    %c24_880 = arith.constant 24 : index
    %c9_881 = arith.constant 9 : index
    %1408 = memref.load %arg2[%c24_880, %c9_881] : memref<30x10xf32, #tpu.memory_space<smem>>
    %1409 = vector.broadcast %1408 : f32 to vector<7x128xf32>
    %1410 = arith.mulf %1409, %1407 : vector<7x128xf32>
    %1411 = arith.addf %1385, %1410 : vector<7x128xf32>
    %c25_882 = arith.constant 25 : index
    %c9_883 = arith.constant 9 : index
    %1412 = memref.load %arg2[%c25_882, %c9_883] : memref<30x10xf32, #tpu.memory_space<smem>>
    %1413 = vector.broadcast %1412 : f32 to vector<7x128xf32>
    %1414 = arith.mulf %1413, %1407 : vector<7x128xf32>
    %1415 = arith.addf %1389, %1414 : vector<7x128xf32>
    %c26_884 = arith.constant 26 : index
    %c9_885 = arith.constant 9 : index
    %1416 = memref.load %arg2[%c26_884, %c9_885] : memref<30x10xf32, #tpu.memory_space<smem>>
    %1417 = vector.broadcast %1416 : f32 to vector<7x128xf32>
    %1418 = arith.mulf %1417, %1407 : vector<7x128xf32>
    %1419 = arith.addf %1393, %1418 : vector<7x128xf32>
    %c27_886 = arith.constant 27 : index
    %c9_887 = arith.constant 9 : index
    %1420 = memref.load %arg2[%c27_886, %c9_887] : memref<30x10xf32, #tpu.memory_space<smem>>
    %1421 = vector.broadcast %1420 : f32 to vector<7x128xf32>
    %1422 = arith.mulf %1421, %1407 : vector<7x128xf32>
    %1423 = arith.addf %1397, %1422 : vector<7x128xf32>
    %c28_888 = arith.constant 28 : index
    %c9_889 = arith.constant 9 : index
    %1424 = memref.load %arg2[%c28_888, %c9_889] : memref<30x10xf32, #tpu.memory_space<smem>>
    %1425 = vector.broadcast %1424 : f32 to vector<7x128xf32>
    %1426 = arith.mulf %1425, %1407 : vector<7x128xf32>
    %1427 = arith.addf %1401, %1426 : vector<7x128xf32>
    %c29_890 = arith.constant 29 : index
    %c9_891 = arith.constant 9 : index
    %1428 = memref.load %arg2[%c29_890, %c9_891] : memref<30x10xf32, #tpu.memory_space<smem>>
    %1429 = vector.broadcast %1428 : f32 to vector<7x128xf32>
    %1430 = arith.mulf %1429, %1407 : vector<7x128xf32>
    %1431 = arith.addf %1405, %1430 : vector<7x128xf32>
    %cst_892 = arith.constant dense<0xFF800000> : vector<128xf32>
    %1432 = vector.multi_reduction <maximumf>, %1411, %cst_892 [0] : vector<7x128xf32> to vector<128xf32>
    %1433 = vector.shape_cast %1432 : vector<128xf32> to vector<1x128xf32>
    %c24_893 = arith.constant 24 : index
    %c0_894 = arith.constant 0 : index
    %1434 = vector.load %arg7[%c24_893, %c0_894] : memref<30x128xf32, #tpu.memory_space<vmem>>, vector<1x128xf32>
    %1435 = arith.maximumf %1434, %1433 : vector<1x128xf32>
    %c24_895 = arith.constant 24 : index
    %c0_896 = arith.constant 0 : index
    %1436 = vector.load %arg7[%c24_895, %c0_896] : memref<30x128xf32, #tpu.memory_space<vmem>>, vector<1x128xf32>
    tpu.vector_store %arg7[%c24_895, %c0_896], %1435 {strides = array<i32>} : memref<30x128xf32, #tpu.memory_space<vmem>>, vector<1x128xf32>,
    %cst_897 = arith.constant dense<0xFF800000> : vector<128xf32>
    %1437 = vector.multi_reduction <maximumf>, %1415, %cst_897 [0] : vector<7x128xf32> to vector<128xf32>
    %1438 = vector.shape_cast %1437 : vector<128xf32> to vector<1x128xf32>
    %c25_898 = arith.constant 25 : index
    %c0_899 = arith.constant 0 : index
    %1439 = vector.load %arg7[%c25_898, %c0_899] : memref<30x128xf32, #tpu.memory_space<vmem>>, vector<1x128xf32>
    %1440 = arith.maximumf %1439, %1438 : vector<1x128xf32>
    %c25_900 = arith.constant 25 : index
    %c0_901 = arith.constant 0 : index
    %1441 = vector.load %arg7[%c25_900, %c0_901] : memref<30x128xf32, #tpu.memory_space<vmem>>, vector<1x128xf32>
    tpu.vector_store %arg7[%c25_900, %c0_901], %1440 {strides = array<i32>} : memref<30x128xf32, #tpu.memory_space<vmem>>, vector<1x128xf32>,
    %cst_902 = arith.constant dense<0xFF800000> : vector<128xf32>
    %1442 = vector.multi_reduction <maximumf>, %1419, %cst_902 [0] : vector<7x128xf32> to vector<128xf32>
    %1443 = vector.shape_cast %1442 : vector<128xf32> to vector<1x128xf32>
    %c26_903 = arith.constant 26 : index
    %c0_904 = arith.constant 0 : index
    %1444 = vector.load %arg7[%c26_903, %c0_904] : memref<30x128xf32, #tpu.memory_space<vmem>>, vector<1x128xf32>
    %1445 = arith.maximumf %1444, %1443 : vector<1x128xf32>
    %c26_905 = arith.constant 26 : index
    %c0_906 = arith.constant 0 : index
    %1446 = vector.load %arg7[%c26_905, %c0_906] : memref<30x128xf32, #tpu.memory_space<vmem>>, vector<1x128xf32>
    tpu.vector_store %arg7[%c26_905, %c0_906], %1445 {strides = array<i32>} : memref<30x128xf32, #tpu.memory_space<vmem>>, vector<1x128xf32>,
    %cst_907 = arith.constant dense<0xFF800000> : vector<128xf32>
    %1447 = vector.multi_reduction <maximumf>, %1423, %cst_907 [0] : vector<7x128xf32> to vector<128xf32>
    %1448 = vector.shape_cast %1447 : vector<128xf32> to vector<1x128xf32>
    %c27_908 = arith.constant 27 : index
    %c0_909 = arith.constant 0 : index
    %1449 = vector.load %arg7[%c27_908, %c0_909] : memref<30x128xf32, #tpu.memory_space<vmem>>, vector<1x128xf32>
    %1450 = arith.maximumf %1449, %1448 : vector<1x128xf32>
    %c27_910 = arith.constant 27 : index
    %c0_911 = arith.constant 0 : index
    %1451 = vector.load %arg7[%c27_910, %c0_911] : memref<30x128xf32, #tpu.memory_space<vmem>>, vector<1x128xf32>
    tpu.vector_store %arg7[%c27_910, %c0_911], %1450 {strides = array<i32>} : memref<30x128xf32, #tpu.memory_space<vmem>>, vector<1x128xf32>,
    %cst_912 = arith.constant dense<0xFF800000> : vector<128xf32>
    %1452 = vector.multi_reduction <maximumf>, %1427, %cst_912 [0] : vector<7x128xf32> to vector<128xf32>
    %1453 = vector.shape_cast %1452 : vector<128xf32> to vector<1x128xf32>
    %c28_913 = arith.constant 28 : index
    %c0_914 = arith.constant 0 : index
    %1454 = vector.load %arg7[%c28_913, %c0_914] : memref<30x128xf32, #tpu.memory_space<vmem>>, vector<1x128xf32>
    %1455 = arith.maximumf %1454, %1453 : vector<1x128xf32>
    %c28_915 = arith.constant 28 : index
    %c0_916 = arith.constant 0 : index
    %1456 = vector.load %arg7[%c28_915, %c0_916] : memref<30x128xf32, #tpu.memory_space<vmem>>, vector<1x128xf32>
    tpu.vector_store %arg7[%c28_915, %c0_916], %1455 {strides = array<i32>} : memref<30x128xf32, #tpu.memory_space<vmem>>, vector<1x128xf32>,
    %cst_917 = arith.constant dense<0xFF800000> : vector<128xf32>
    %1457 = vector.multi_reduction <maximumf>, %1431, %cst_917 [0] : vector<7x128xf32> to vector<128xf32>
    %1458 = vector.shape_cast %1457 : vector<128xf32> to vector<1x128xf32>
    %c29_918 = arith.constant 29 : index
    %c0_919 = arith.constant 0 : index
    %1459 = vector.load %arg7[%c29_918, %c0_919] : memref<30x128xf32, #tpu.memory_space<vmem>>, vector<1x128xf32>
    %1460 = arith.maximumf %1459, %1458 : vector<1x128xf32>
    %c29_920 = arith.constant 29 : index
    %c0_921 = arith.constant 0 : index
    %1461 = vector.load %arg7[%c29_920, %c0_921] : memref<30x128xf32, #tpu.memory_space<vmem>>, vector<1x128xf32>
    tpu.vector_store %arg7[%c29_920, %c0_921], %1460 {strides = array<i32>} : memref<30x128xf32, #tpu.memory_space<vmem>>, vector<1x128xf32>,
    %c0_922 = arith.constant 0 : index
    %c0_923 = arith.constant 0 : index
    %1462 = vector.load %arg7[%c0_922, %c0_923] : memref<30x128xf32, #tpu.memory_space<vmem>>, vector<30x128xf32>
    %c0_924 = arith.constant 0 : index
    %c0_925 = arith.constant 0 : index
    %1463 = vector.load %arg3[%c0_924, %c0_925] : memref<30x1xf32, #tpu.memory_space<vmem>>, vector<30x1xf32>
    %1464 = vector.broadcast %1463 : vector<30x1xf32> to vector<30x128xf32>
    %1465 = arith.addf %1462, %1464 : vector<30x128xf32>
    %cst_926 = arith.constant dense<0xFF800000> : vector<128xf32>
    %1466 = vector.multi_reduction <maximumf>, %1465, %cst_926 [0] : vector<30x128xf32> to vector<128xf32>
    %1467 = vector.shape_cast %1466 : vector<128xf32> to vector<1x128xf32>
    %1468 = vector.broadcast %1467 : vector<1x128xf32> to vector<30x128xf32>
    %1469 = arith.subf %1465, %1468 : vector<30x128xf32>
    %1470 = math.exp %1469 : vector<30x128xf32>
    %cst_927 = arith.constant dense<0.000000e+00> : vector<128xf32>
    %1471 = vector.multi_reduction <add>, %1470, %cst_927 [0] : vector<30x128xf32> to vector<128xf32>
    %1472 = vector.shape_cast %1471 : vector<128xf32> to vector<1x128xf32>
    %c0_928 = arith.constant 0 : index
    %c0_929 = arith.constant 0 : index
    %1473 = vector.load %arg4[%c0_928, %c0_929] : memref<30x1xf32, #tpu.memory_space<vmem>>, vector<30x1xf32>
    %1474 = vector.broadcast %1473 : vector<30x1xf32> to vector<30x128xf32>
    %1475 = arith.mulf %1470, %1474 : vector<30x128xf32>
    %cst_930 = arith.constant dense<0.000000e+00> : vector<128xf32>
    %1476 = vector.multi_reduction <add>, %1475, %cst_930 [0] : vector<30x128xf32> to vector<128xf32>
    %1477 = vector.shape_cast %1476 : vector<128xf32> to vector<1x128xf32>
    %1478 = arith.divf %1477, %1472 : vector<1x128xf32>
    %c0_931 = arith.constant 0 : index
    %1479 = memref.load %arg5[%c0_931] : memref<1xf32, #tpu.memory_space<smem>>
    %1480 = vector.broadcast %1479 : f32 to vector<1x128xf32>
    %1481 = arith.addf %1478, %1480 : vector<1x128xf32>
    %c0_932 = arith.constant 0 : index
    %c0_933 = arith.constant 0 : index
    %1482 = vector.load %arg6[%c0_932, %c0_933] : memref<1x128xf32, #tpu.memory_space<vmem>>, vector<1x128xf32>
    tpu.vector_store %arg6[%c0_932, %c0_933], %1481 {strides = array<i32>} : memref<1x128xf32, #tpu.memory_space<vmem>>, vector<1x128xf32>,
    return
  }
  func.func @transform_0(%arg0: i32) -> (i32, i32) {
    %c0_i32 = arith.constant 0 : i32
    %c0_i32_0 = arith.constant 0 : i32
    return %c0_i32, %arg0 : i32, i32
  }
  func.func @transform_1(%arg0: i32) -> (i32, i32) {
    %c0_i32 = arith.constant 0 : i32
    %c0_i32_0 = arith.constant 0 : i32
    %c0_i32_1 = arith.constant 0 : i32
    return %c0_i32, %c0_i32_0 : i32, i32
  }
  func.func @transform_2(%arg0: i32) -> (i32, i32) {
    %c0_i32 = arith.constant 0 : i32
    %c0_i32_0 = arith.constant 0 : i32
    %c0_i32_1 = arith.constant 0 : i32
    return %c0_i32, %c0_i32_0 : i32, i32
  }
  func.func @transform_3(%arg0: i32) -> (i32, i32) {
    %c0_i32 = arith.constant 0 : i32
    %c0_i32_0 = arith.constant 0 : i32
    %c0_i32_1 = arith.constant 0 : i32
    return %c0_i32, %c0_i32_0 : i32, i32
  }
  func.func @transform_4(%arg0: i32) -> i32 {
    %c0_i32 = arith.constant 0 : i32
    %c0_i32_0 = arith.constant 0 : i32
    return %c0_i32 : i32
  }
  func.func @transform_5(%arg0: i32) -> (i32, i32) {
    %c0_i32 = arith.constant 0 : i32
    %c0_i32_0 = arith.constant 0 : i32
    return %c0_i32, %arg0 : i32, i32
  }
}

</mosaic_0001>

<bundles_post_ra>
// kernel: cnn_stocks_forward.1
= control target key start
LH: loop header
LB: loop body
LE: loop exit
PB: predicated region body
PF: predicated region fallthrough
CT: control target
= control target key end

     0   :  { %11 = vsyncpa [#allocation6], 0  ;;  %s3150_s0 = inlined_call_operand.vmem [shape: f32[16,128], index: 0, kind: input, shape index: {}]   ;;  %s3151_s1 = inlined_call_operand.vmem [shape: f32[30,10], index: 1, kind: input, shape index: {}]   ;;  %s3152_s2 = inlined_call_operand.vmem [shape: f32[30,1], index: 2, kind: input, shape index: {}]   ;;  %s3153_s3 = inlined_call_operand.vmem [shape: f32[30,1], index: 3, kind: input, shape index: {}]   ;;  %s3154_s4 = inlined_call_operand.<no memory space> [shape: f32[1], index: 4, kind: input, shape index: {}]   ;;  %s3155_s5 = inlined_call_operand.vmem [shape: f32[1,128], index: 5, kind: output, shape index: {}]  }
   0x1   :  { %s19_s20 = sshll.u32 %s3151_s1, 4  ;;  %s20_s20 = int_to_ptr.vmem [resolvable:$true] %s19_s20 }
   0x2   :  { %s2020_s21 = scalar_lea.vmem %s20_s20, 512  ;;  %p2025_p1 = scmp.lt.s32.totalorder %s20_s20, %s20_s20 }
   0x3   :  { %p2021_p0 = scmp.ne.s32.totalorder %s20_s20, %s2020_s21  ;;  %p2026_p2 = scmp.lt.s32.totalorder %s2020_s21, %s2020_s21 }
   0x5   :  { %p2027_p3 = por %p2026_p2, %p2025_p1 }
   0x7   :  { %p2028_p4 = pnand %p2027_p3, %p2021_p0 }
   0x9   :  { %2031 = shalt.err (!%p2028_p4)
}
   0xa   :  { %s2034_s22 = smov [#allocation5]   ;;  %s2035_s23 = smov 128  }
   0xb   :  { %s2036_s24 = smov 8  }
   0xc   :  { %25 = dma.vmem_to_smem %s20_s20, 512, %s2034_s22, [#allocation6], %s2035_s23, %s2035_s23, %s2036_s24  }
   0xd   :  { %2032 = dma.done.wait [#allocation6], 512  }
   0xe   :  { %2033 = vsyncadd [#allocation6], 4294966784 }
   0xf   :  { %35 = sfence }
  0x10   :  { %v1597_v0 = vld [vmem:[%s3152_s2 + $0x18] sm:$0x3f]  ;;  %v1595_v1 = vld [vmem:[%s3152_s2 + $0x8] sm:$0xff]  ;;  %v2037_v2 = vmov 0   ;;  %v2038_v3 = vmov -inf   ;;  %s2078_s28 = sld [smem:[#allocation5]] }
  0x11   :  { %2009 = vset.pattern.permute.xlu1 %v2037_v2  ;;  %2008 = vset.pattern.permute.xlu0 %v2037_v2  ;;  %36 = vst [vmem:[#allocation2] sm:$0xff] %v2038_v3  ;;  %37 = vst [vmem:[#allocation2 + $0x8] sm:$0xff] %v2038_v3  ;;  %v1596_v4 = vld [vmem:[%s3152_s2 + $0x10] sm:$0xff]  ;;  %v1594_v5 = vld [vmem:[%s3152_s2] sm:$0xff]  ;;  %s1704_s1 = sld [smem:[#allocation5 + $0x80]]  ;;  %s2127_s11 = sld [smem:[#allocation5 + $0x81]] }
  0x12   :  { %38 = vst [vmem:[#allocation2 + $0x10] sm:$0xff] %v2038_v3  ;;  %39 = vst [vmem:[#allocation2 + $0x18] sm:$0x3f] %v2038_v3  ;;  %1615 = vperm.xlu0 %2008, %v1597_v0   ;;  %1605 = vperm.xlu1 %2009, %v1595_v1   ;;  %v40_v6 = vld [vmem:[%s3150_s0] sm:$0x7f]  ;;  %s1705_s27 = sld [smem:[#allocation5 + $0x100]] }
  0x13   :  { %41 = vst [vmem:[#allocation3] sm:$0x7f] %v40_v6  ;;  %v42_v7 = vld [vmem:[%s3150_s0 + $0x1] sm:$0x7f]  ;;  %v63_v14 = vld [vmem:[%s3150_s0 + $0x8] sm:$0x7f] }
  0x14   :  { %v45_v8 = vld [vmem:[%s3150_s0 + $0x2] sm:$0x7f]  ;;  %44 = vst [vmem:[#allocation3 + $0x8] sm:$0x7f] %v42_v7  ;;  %v66_v15 = vld [vmem:[%s3150_s0 + $0x9] sm:$0x7f] }
  0x15   :  { %v48_v9 = vld [vmem:[%s3150_s0 + $0x3] sm:$0x7f]  ;;  %47 = vst [vmem:[#allocation3 + $0x10] sm:$0x7f] %v45_v8  ;;  %65 = vst [vmem:[#allocation3 + $0x40] sm:$0x7f] %v63_v14 }
  0x16   :  { %50 = vst [vmem:[#allocation3 + $0x18] sm:$0x7f] %v48_v9  ;;  %v51_v10 = vld [vmem:[%s3150_s0 + $0x4] sm:$0x7f]  ;;  %1610 = vperm.xlu1 %2009, %v1596_v4   ;;  %1600 = vperm.xlu0 %2008, %v1594_v5   ;;  %68 = vst [vmem:[#allocation3 + $0x48] sm:$0x7f] %v66_v15  ;;  %v71_v18 = vstv %s2078_s28 }
  0x17   :  { %v54_v11 = vld [vmem:[%s3150_s0 + $0x5] sm:$0x7f]  ;;  %53 = vst [vmem:[#allocation3 + $0x20] sm:$0x7f] %v51_v10  ;;  %s1706_s8 = sld [smem:[#allocation5 + $0x180]]  ;;  %s2129_s12 = sld [smem:[#allocation5 + $0x101]]  ;;  %v74_v23 = vstv %s1704_s1  ;;  %v94_v36 = vstv %s2127_s11 }
  0x18   :  { %v57_v12 = vld [vmem:[%s3150_s0 + $0x6] sm:$0x7f]  ;;  %56 = vst [vmem:[#allocation3 + $0x28] sm:$0x7f] %v54_v11  ;;  %s1707_s9 = sld [smem:[#allocation5 + $0x200]]  ;;  %s2131_s13 = sld [smem:[#allocation5 + $0x181]]  ;;  %v77_v24 = vstv %s1705_s27 }
  0x19   :  { %59 = vst [vmem:[#allocation3 + $0x30] sm:$0x7f] %v57_v12  ;;  %v60_v13 = vld [vmem:[%s3150_s0 + $0x7] sm:$0x7f]  ;;  %s2122_s10 = sld [smem:[#allocation5 + $0x280]]  ;;  %s2124_s0 = sld [smem:[#allocation5 + $0x1]] }
  0x1a   :  { %62 = vst [vmem:[#allocation3 + $0x38] sm:$0x7f] %v60_v13  ;;  %v1656_v16 = vld [vmem:[%s3153_s3 + $0x8] sm:$0xff]  ;;  %v1655_v17 = vld [vmem:[%s3153_s3] sm:$0xff]  ;;  %s2133_s14 = sld [smem:[#allocation5 + $0x201]]  ;;  %v1657_v21 = vld [vmem:[%s3153_s3 + $0x10] sm:$0xff] }
  0x1b   :  { %1666 = vperm.xlu1 %2009, %v1656_v16   ;;  %1661 = vperm.xlu0 %2008, %v1655_v17   ;;  %v69_v19 = vld [vmem:[#allocation3] sm:$0x7f]  ;;  %v1658_v20 = vld [vmem:[%s3153_s3 + $0x18] sm:$0x3f]  ;;  %s2141_s28 = sld [smem:[#allocation5 + $0x281]]  ;;  %s2143_s18 = sld [smem:[#allocation5 + $0x2]] }
  0x1c   :  { %v72_v22 = vmul.f32 %v71_v18, %v69_v19  ;;  %v88_v25 = vld [vmem:[#allocation3 + $0x8] sm:$0x7f]  ;;  %s2145_s19 = sld [smem:[#allocation5 + $0x82]]  ;;  %v75_v26 = vmul.f32 %v74_v23, %v69_v19  ;;  %v78_v27 = vmul.f32 %v77_v24, %v69_v19  ;;  %s2159_s23 = sld [smem:[#allocation5 + $0x3]]  ;;  %v113_v42 = vld [vmem:[#allocation3 + $0x10] sm:$0x7f] }
  0x1d   :  { %v80_v28 = vstv %s1706_s8  ;;  %s2147_s20 = sld [smem:[#allocation5 + $0x102]]  ;;  %v98_v37 = vstv %s2129_s12  ;;  %s2161_s24 = sld [smem:[#allocation5 + $0x83]]  ;;  %v95_v38 = vmul.f32 %v94_v36, %v88_v25  ;;  %v138_v59 = vld [vmem:[#allocation3 + $0x18] sm:$0x7f]  ;;  %vm313_vm0 = vcmask 1046528  }
  0x1e   :  { %v83_v29 = vstv %s1707_s9  ;;  %s2149_s3 = sld [smem:[#allocation5 + $0x182]]  ;;  %v81_v30 = vmul.f32 %v80_v28, %v69_v19  ;;  %v99_v39 = vmul.f32 %v98_v37, %v88_v25  ;;  %v102_v40 = vstv %s2131_s13  ;;  %s2165_s25 = sld [smem:[#allocation5 + $0x103]]  ;;  %v163_v16 = vld [vmem:[#allocation3 + $0x20] sm:$0x7f] }
  0x1f   :  { %1676 = vperm.xlu1 %2009, %v1658_v20   ;;  %1671 = vperm.xlu0 %2008, %v1657_v21   ;;  %v84_v31 = vmul.f32 %v83_v29, %v69_v19  ;;  %v86_v32 = vstv %s2122_s10  ;;  %v90_v33 = vstv %s2124_s0  ;;  %s2153_s21 = sld [smem:[#allocation5 + $0x202]]  ;;  %s2167_s26 = sld [smem:[#allocation5 + $0x183]]  ;;  %v103_v44 = vmul.f32 %v102_v40, %v88_v25  ;;  %v188_v37 = vld [vmem:[#allocation3 + $0x28] sm:$0x7f] }
  0x20   :  { %s2155_s22 = sld [smem:[#allocation5 + $0x282]]  ;;  %v87_v34 = vmul.f32 %v86_v32, %v69_v19  ;;  %v91_v35 = vmul.f32 %v90_v33, %v88_v25  ;;  %v106_v41 = vstv %s2133_s14  ;;  %s2170_s1 = sld [smem:[#allocation5 + $0x203]]  ;;  %v96_v47 = vadd.f32 %v95_v38, %v75_v26 }
  0x21   :  { %v107_v45 = vmul.f32 %v106_v41, %v88_v25  ;;  %v110_v46 = vstv %s2141_s28  ;;  %v100_v48 = vadd.f32 %v99_v39, %v78_v27  ;;  %v115_v50 = vstv %s2143_s18  ;;  %s2173_s27 = sld [smem:[#allocation5 + $0x283]]  ;;  %s2175_s29 = sld [smem:[#allocation5 + $0x4]] }
  0x22   :  { %v92_v43 = vadd.f32 %v91_v35, %v72_v22  ;;  %v111_v49 = vmul.f32 %v110_v46, %v88_v25  ;;  %v104_v51 = vadd.f32 %v103_v44, %v81_v30  ;;  %v116_v53 = vmul.f32 %v115_v50, %v113_v42  ;;  %s2180_s30 = sld [smem:[#allocation5 + $0x84]]  ;;  %s2193_s10 = sld [smem:[#allocation5 + $0x5]] }
  0x23   :  { %v108_v52 = vadd.f32 %v107_v45, %v84_v31  ;;  %v119_v54 = vstv %s2145_s19  ;;  %v123_v57 = vstv %s2147_s20  ;;  %s2182_s6 = sld [smem:[#allocation5 + $0x104]]  ;;  %v140_v3 = vstv %s2159_s23  ;;  %s2198_s0 = sld [smem:[#allocation5 + $0x85]] }
  0x24   :  { %v112_v55 = vadd.f32 %v111_v49, %v87_v34  ;;  %v120_v56 = vmul.f32 %v119_v54, %v113_v42  ;;  %v127_v58 = vstv %s2149_s3  ;;  %v117_v60 = vadd.f32 %v116_v53, %v92_v43  ;;  %s2185_s7 = sld [smem:[#allocation5 + $0x184]]  ;;  %s2200_s11 = sld [smem:[#allocation5 + $0x105]]  ;;  %v213_v54 = vld [vmem:[#allocation3 + $0x30] sm:$0x7f] }
  0x25   :  { %v124_v61 = vmul.f32 %v123_v57, %v113_v42  ;;  %v128_v62 = vmul.f32 %v127_v58, %v113_v42  ;;  %v131_v63 = vstv %s2153_s21  ;;  %s2189_s8 = sld [smem:[#allocation5 + $0x204]]  ;;  %v141_v7 = vmul.f32 %v140_v3, %v138_v59  ;;  %s2205_s12 = sld [smem:[#allocation5 + $0x185]] }
  0x26   :  { %v121_v0 = vadd.f32 %v120_v56, %v96_v47  ;;  %v132_v1 = vmul.f32 %v131_v63, %v113_v42  ;;  %v135_v2 = vstv %s2155_s22  ;;  %s2191_s9 = sld [smem:[#allocation5 + $0x284]]  ;;  %v144_v9 = vstv %s2161_s24  ;;  %s2207_s13 = sld [smem:[#allocation5 + $0x205]] }
  0x27   :  { %v125_v4 = vadd.f32 %v124_v61, %v100_v48  ;;  %v129_v5 = vadd.f32 %v128_v62, %v104_v51  ;;  %v136_v6 = vmul.f32 %v135_v2, %v113_v42  ;;  %v148_v10 = vstv %s2165_s25  ;;  %s2209_s14 = sld [smem:[#allocation5 + $0x285]]  ;;  %s2213_s15 = sld [smem:[#allocation5 + $0x6]] }
  0x28   :  { %v133_v8 = vadd.f32 %v132_v1, %v108_v52  ;;  %v152_v11 = vstv %s2167_s26  ;;  %v142_v13 = vadd.f32 %v141_v7, %v117_v60  ;;  %v145_v14 = vmul.f32 %v144_v9, %v138_v59  ;;  %s2215_s2 = sld [smem:[#allocation5 + $0x86]]  ;;  %s2231_s19 = sld [smem:[#allocation5 + $0x7]]  ;;  %v238_v7 = vld [vmem:[#allocation3 + $0x38] sm:$0x7f] }
  0x29   :  { %v137_v12 = vadd.f32 %v136_v6, %v112_v55  ;;  %v149_v15 = vmul.f32 %v148_v10, %v138_v59  ;;  %v153_v17 = vmul.f32 %v152_v11, %v138_v59  ;;  %v156_v18 = vstv %s2170_s1  ;;  %s2217_s16 = sld [smem:[#allocation5 + $0x106]]  ;;  %s2233_s20 = sld [smem:[#allocation5 + $0x87]] }
  0x2a   :  { %v160_v19 = vstv %s2173_s27  ;;  %v165_v20 = vstv %s2175_s29  ;;  %v146_v21 = vadd.f32 %v145_v14, %v121_v0  ;;  %v157_v23 = vmul.f32 %v156_v18, %v138_v59  ;;  %s2222_s17 = sld [smem:[#allocation5 + $0x186]]  ;;  %s2237_s3 = sld [smem:[#allocation5 + $0x107]] }
  0x2b   :  { %v150_v22 = vadd.f32 %v149_v15, %v125_v4  ;;  %v161_v24 = vmul.f32 %v160_v19, %v138_v59  ;;  %v154_v25 = vadd.f32 %v153_v17, %v129_v5  ;;  %v166_v26 = vmul.f32 %v165_v20, %v163_v16  ;;  %s2224_s28 = sld [smem:[#allocation5 + $0x206]]  ;;  %s2239_s21 = sld [smem:[#allocation5 + $0x187]] }
  0x2c   :  { %v169_v27 = vstv %s2180_s30  ;;  %v173_v28 = vstv %s2182_s6  ;;  %v158_v29 = vadd.f32 %v157_v23, %v133_v8  ;;  %v177_v34 = vstv %s2185_s7  ;;  %s2229_s18 = sld [smem:[#allocation5 + $0x286]]  ;;  %s2241_s22 = sld [smem:[#allocation5 + $0x207]] }
  0x2d   :  { %v162_v30 = vadd.f32 %v161_v24, %v137_v12  ;;  %v170_v31 = vmul.f32 %v169_v27, %v163_v16  ;;  %v174_v32 = vmul.f32 %v173_v28, %v163_v16  ;;  %v167_v33 = vadd.f32 %v166_v26, %v142_v13  ;;  %s2246_s23 = sld [smem:[#allocation5 + $0x287]]  ;;  %s2248_s24 = sld [smem:[#allocation5 + $0x8]]  ;;  %v263_v28 = vld [vmem:[#allocation3 + $0x40] sm:$0x7f] }
  0x2e   :  { %v181_v35 = vstv %s2189_s8  ;;  %v185_v36 = vstv %s2191_s9  ;;  %v178_v40 = vmul.f32 %v177_v34, %v163_v16  ;;  %v190_v43 = vstv %s2193_s10  ;;  %s2253_s25 = sld [smem:[#allocation5 + $0x88]]  ;;  %s2265_s30 = sld [smem:[#allocation5 + $0x9]] }
  0x2f   :  { %v171_v38 = vadd.f32 %v170_v31, %v146_v21  ;;  %v175_v39 = vadd.f32 %v174_v32, %v150_v22  ;;  %v182_v41 = vmul.f32 %v181_v35, %v163_v16  ;;  %v186_v42 = vmul.f32 %v185_v36, %v163_v16  ;;  %s2255_s26 = sld [smem:[#allocation5 + $0x108]]  ;;  %s2270_s6 = sld [smem:[#allocation5 + $0x89]] }
  0x30   :  { %v194_v44 = vstv %s2198_s0  ;;  %v198_v45 = vstv %s2200_s11  ;;  %v179_v46 = vadd.f32 %v178_v40, %v154_v25  ;;  %v191_v48 = vmul.f32 %v190_v43, %v188_v37  ;;  %s2257_s1 = sld [smem:[#allocation5 + $0x188]]  ;;  %s2272_s7 = sld [smem:[#allocation5 + $0x109]] }
  0x31   :  { %v183_v47 = vadd.f32 %v182_v41, %v158_v29  ;;  %v195_v49 = vmul.f32 %v194_v44, %v188_v37  ;;  %v187_v50 = vadd.f32 %v186_v42, %v162_v30  ;;  %v199_v51 = vmul.f32 %v198_v45, %v188_v37  ;;  %s2261_s27 = sld [smem:[#allocation5 + $0x208]]  ;;  %s2277_s8 = sld [smem:[#allocation5 + $0x189]] }
  0x32   :  { %v202_v52 = vstv %s2205_s12  ;;  %v206_v53 = vstv %s2207_s13  ;;  %v192_v55 = vadd.f32 %v191_v48, %v167_v33  ;;  %v210_v60 = vstv %s2209_s14  ;;  %s2263_s29 = sld [smem:[#allocation5 + $0x288]]  ;;  %s2279_s9 = sld [smem:[#allocation5 + $0x209]] }
  0x33   :  { %v196_v56 = vadd.f32 %v195_v49, %v171_v38  ;;  %v203_v57 = vmul.f32 %v202_v52, %v188_v37  ;;  %v207_v58 = vmul.f32 %v206_v53, %v188_v37  ;;  %v200_v59 = vadd.f32 %v199_v51, %v175_v39  ;;  %s2281_s10 = sld [smem:[#allocation5 + $0x289]]  ;;  %s2285_s0 = sld [smem:[#allocation5 + $0x300]]  ;;  %v288_v49 = vld [vmem:[#allocation3 + $0x48] sm:$0x7f] }
  0x34   :  { %v215_v61 = vstv %s2213_s15  ;;  %v219_v62 = vstv %s2215_s2  ;;  %v211_v1 = vmul.f32 %v210_v60, %v188_v37  ;;  %v223_v4 = vstv %s2217_s16  ;;  %s2287_s11 = sld [smem:[#allocation5 + $0x380]]  ;;  %s2323_s2 = sld [smem:[#allocation5 + $0x301]] }
  0x35   :  { %v204_v63 = vadd.f32 %v203_v57, %v179_v46  ;;  %v208_v0 = vadd.f32 %v207_v58, %v183_v47  ;;  %v216_v2 = vmul.f32 %v215_v61, %v213_v54  ;;  %v220_v3 = vmul.f32 %v219_v62, %v213_v54  ;;  %s2297_s12 = sld [smem:[#allocation5 + $0x400]]  ;;  %s2329_s16 = sld [smem:[#allocation5 + $0x381]] }
  0x36   :  { %v227_v5 = vstv %s2222_s17  ;;  %v231_v6 = vstv %s2224_s28  ;;  %v212_v8 = vadd.f32 %v211_v1, %v187_v50  ;;  %v224_v10 = vmul.f32 %v223_v4, %v213_v54  ;;  %s2302_s13 = sld [smem:[#allocation5 + $0x480]]  ;;  %s2331_s17 = sld [smem:[#allocation5 + $0x401]] }
  0x37   :  { %v217_v9 = vadd.f32 %v216_v2, %v192_v55  ;;  %v228_v11 = vmul.f32 %v227_v5, %v213_v54  ;;  %v221_v12 = vadd.f32 %v220_v3, %v196_v56  ;;  %v232_v13 = vmul.f32 %v231_v6, %v213_v54  ;;  %s2312_s14 = sld [smem:[#allocation5 + $0x500]]  ;;  %s2336_s28 = sld [smem:[#allocation5 + $0x481]] }
  0x38   :  { %v235_v14 = vstv %s2229_s18  ;;  %v240_v15 = vstv %s2231_s19  ;;  %v225_v16 = vadd.f32 %v224_v10, %v200_v59  ;;  %v244_v21 = vstv %s2233_s20  ;;  %s2319_s15 = sld [smem:[#allocation5 + $0x580]]  ;;  %s2339_s18 = sld [smem:[#allocation5 + $0x501]] }
  0x39   :  { %v229_v17 = vadd.f32 %v228_v11, %v204_v63  ;;  %v236_v18 = vmul.f32 %v235_v14, %v213_v54  ;;  %v241_v19 = vmul.f32 %v240_v15, %v238_v7  ;;  %v233_v20 = vadd.f32 %v232_v13, %v208_v0  ;;  %v2305_v14 = vld [vmem:[#allocation3] sm:$0x7f]  ;;  %s2341_s19 = sld [smem:[#allocation5 + $0x581]]  ;;  %s2344_s20 = sld [smem:[#allocation5 + $0x302]] }
  0x3a   :  { %v248_v22 = vstv %s2237_s3  ;;  %v252_v23 = vstv %s2239_s21  ;;  %v245_v26 = vmul.f32 %v244_v21, %v238_v7  ;;  %v256_v30 = vstv %s2241_s22  ;;  %s2347_s3 = sld [smem:[#allocation5 + $0x382]] }
  0x3b   :  { %v237_v24 = vadd.f32 %v236_v18, %v212_v8  ;;  %v242_v25 = vadd.f32 %v241_v19, %v217_v9  ;;  %v249_v27 = vmul.f32 %v248_v22, %v238_v7  ;;  %v253_v29 = vmul.f32 %v252_v23, %v238_v7  ;;  %s2349_s21 = sld [smem:[#allocation5 + $0x402]] }
  0x3c   :  { %v260_v31 = vstv %s2246_s23  ;;  %v265_v32 = vstv %s2248_s24  ;;  %v246_v33 = vadd.f32 %v245_v26, %v221_v12  ;;  %v257_v35 = vmul.f32 %v256_v30, %v238_v7  ;;  %s2353_s22 = sld [smem:[#allocation5 + $0x482]] }
  0x3d   :  { %v250_v34 = vadd.f32 %v249_v27, %v225_v16  ;;  %v261_v36 = vmul.f32 %v260_v31, %v238_v7  ;;  %v254_v37 = vadd.f32 %v253_v29, %v229_v17  ;;  %v266_v38 = vmul.f32 %v265_v32, %v263_v28  ;;  %s2355_s23 = sld [smem:[#allocation5 + $0x502]] }
  0x3e   :  { %v269_v39 = vstv %s2253_s25  ;;  %v273_v40 = vstv %s2255_s26  ;;  %v258_v41 = vadd.f32 %v257_v35, %v233_v20  ;;  %v277_v46 = vstv %s2257_s1  ;;  %s2357_s24 = sld [smem:[#allocation5 + $0x582]]  ;;  %s2361_s25 = sld [smem:[#allocation5 + $0x303]] }
  0x3f   :  { %v262_v42 = vadd.f32 %v261_v36, %v237_v24  ;;  %v270_v43 = vmul.f32 %v269_v39, %v263_v28  ;;  %v274_v44 = vmul.f32 %v273_v40, %v263_v28  ;;  %v267_v45 = vadd.f32 %v266_v38, %v242_v25  ;;  %s2363_s26 = sld [smem:[#allocation5 + $0x383]] }
  0x40   :  { %v281_v47 = vstv %s2261_s27  ;;  %v285_v48 = vstv %s2263_s29  ;;  %v278_v52 = vmul.f32 %v277_v46, %v263_v28  ;;  %v290_v55 = vstv %s2265_s30  ;;  %s2366_s1 = sld [smem:[#allocation5 + $0x403]] }
  0x41   :  { %v271_v50 = vadd.f32 %v270_v43, %v246_v33  ;;  %v275_v51 = vadd.f32 %v274_v44, %v250_v34  ;;  %v282_v53 = vmul.f32 %v281_v47, %v263_v28  ;;  %v286_v54 = vmul.f32 %v285_v48, %v263_v28  ;;  %v321_v43 = vld [vmem:[#allocation2] sm:$0x1]  ;;  %s2371_s27 = sld [smem:[#allocation5 + $0x483]] }
  0x42   :  { %v294_v56 = vstv %s2270_s6  ;;  %v298_v57 = vstv %s2272_s7  ;;  %v279_v58 = vadd.f32 %v278_v52, %v254_v37  ;;  %v291_v60 = vmul.f32 %v290_v55, %v288_v49  ;;  %s2373_s29 = sld [smem:[#allocation5 + $0x503]]  ;;  %s2382_s6 = sld [smem:[#allocation5 + $0x304]] }
  0x43   :  { %v283_v59 = vadd.f32 %v282_v53, %v258_v41  ;;  %v295_v61 = vmul.f32 %v294_v56, %v288_v49  ;;  %v287_v62 = vadd.f32 %v286_v54, %v262_v42  ;;  %v299_v63 = vmul.f32 %v298_v57, %v288_v49  ;;  %v351_v56 = vld [vmem:[#allocation2 + $0x3] sm:$0x1]  ;;  %s2380_s30 = sld [smem:[#allocation5 + $0x583]]  ;;  %s2385_s7 = sld [smem:[#allocation5 + $0x384]] }
  0x44   :  { %v302_v0 = vstv %s2277_s8  ;;  %v306_v1 = vstv %s2279_s9  ;;  %v292_v2 = vadd.f32 %v291_v60, %v267_v45  ;;  %v310_v7 = vstv %s2281_s10  ;;  %s2389_s8 = sld [smem:[#allocation5 + $0x404]] }
  0x45   :  { %v296_v3 = vadd.f32 %v295_v61, %v271_v50  ;;  %v303_v4 = vmul.f32 %v302_v0, %v288_v49  ;;  %v307_v5 = vmul.f32 %v306_v1, %v288_v49  ;;  %v300_v6 = vadd.f32 %v299_v63, %v275_v51  ;;  %v341_v50 = vld [vmem:[#allocation2 + $0x2] sm:$0x1]  ;;  %s2391_s9 = sld [smem:[#allocation5 + $0x484]] }
  0x46   :  { %v376_v8 = vstv %s2285_s0  ;;  %v379_v9 = vstv %s2287_s11  ;;  %v311_v12 = vmul.f32 %v310_v7, %v288_v49  ;;  %v314_v13 = vsel %vm313_vm0, %v292_v2, -inf  ;;  %v331_v49 = vld [vmem:[#allocation2 + $0x1] sm:$0x1]  ;;  %v361_v2 = vld [vmem:[#allocation2 + $0x4] sm:$0x1]  ;;  %s2393_s10 = sld [smem:[#allocation5 + $0x504]] }
  0x47   :  { %v304_v10 = vadd.f32 %v303_v4, %v279_v58  ;;  %v308_v11 = vadd.f32 %v307_v5, %v283_v59  ;;  %v315_v15 = vrot.slane %v314_v13, 4  ;;  %v324_v16 = vsel %vm313_vm0, %v296_v3, -inf  ;;  %v393_v4 = vld [vmem:[#allocation3 + $0x8] sm:$0x7f]  ;;  %s2398_s0 = sld [smem:[#allocation5 + $0x584]]  ;;  %s2400_s11 = sld [smem:[#allocation5 + $0x305]] }
  0x48   :  { %v334_v17 = vsel %vm313_vm0, %v300_v6, -inf  ;;  %v2310_v18 = vmul.f32 %v376_v8, %v2305_v14  ;;  %v312_v19 = vadd.f32 %v311_v12, %v287_v62  ;;  %v325_v20 = vrot.slane %v324_v16, 4  ;;  %v371_v12 = vld [vmem:[#allocation2 + $0x5] sm:$0x1] }
  0x49   :  { %v335_v21 = vrot.slane %v334_v17, 4  ;;  %v344_v22 = vsel %vm313_vm0, %v304_v10, -inf  ;;  %v316_v23 = vmax.f32 %v314_v13, %v315_v15  ;;  %v354_v25 = vsel %vm313_vm0, %v308_v11, -inf }
  0x4a   :  { %v345_v24 = vrot.slane %v344_v22, 4  ;;  %v2317_v26 = vmul.f32 %v379_v9, %v2305_v14  ;;  %v326_v27 = vmax.f32 %v324_v16, %v325_v20  ;;  %v355_v29 = vrot.slane %v354_v25, 4 }
  0x4b   :  { %v336_v28 = vmax.f32 %v334_v17, %v335_v21  ;;  %v364_v30 = vsel %vm313_vm0, %v312_v19, -inf  ;;  %v317_v31 = vrot.slane %v316_v23, 2  ;;  %v382_v34 = vstv %s2297_s12  ;;  %s2405_s12 = sld [smem:[#allocation5 + $0x385]] }
  0x4c   :  { %v346_v32 = vmax.f32 %v344_v22, %v345_v24  ;;  %v365_v33 = vrot.slane %v364_v30, 4  ;;  %v327_v35 = vrot.slane %v326_v27, 2  ;;  %v356_v37 = vmax.f32 %v354_v25, %v355_v29 }
  0x4d   :  { %v337_v36 = vrot.slane %v336_v28, 2  ;;  %v2326_v38 = vmul.f32 %v382_v34, %v2305_v14  ;;  %v318_v39 = vmax.f32 %v316_v23, %v317_v31  ;;  %v385_v42 = vstv %s2302_s13  ;;  %v418_v31 = vld [vmem:[#allocation3 + $0x10] sm:$0x7f]  ;;  %s2407_s13 = sld [smem:[#allocation5 + $0x405]] }
  0x4e   :  { %v347_v40 = vrot.slane %v346_v32, 2  ;;  %v366_v41 = vmax.f32 %v364_v30, %v365_v33  ;;  %v328_v44 = vmax.f32 %v326_v27, %v327_v35  ;;  %v357_v46 = vrot.slane %v356_v37, 2 }
  0x4f   :  { %v338_v45 = vmax.f32 %v336_v28, %v337_v36  ;;  %v2334_v47 = vmul.f32 %v385_v42, %v2305_v14  ;;  %v319_v48 = vrot.slane %v318_v39, 1  ;;  %v388_v53 = vstv %s2312_s14  ;;  %s2409_s14 = sld [smem:[#allocation5 + $0x485]] }
  0x50   :  { %v348_v51 = vmax.f32 %v346_v32, %v347_v40  ;;  %v367_v52 = vrot.slane %v366_v41, 2  ;;  %v329_v54 = vrot.slane %v328_v44, 1  ;;  %v358_v57 = vmax.f32 %v356_v37, %v357_v46 }
  0x51   :  { %v339_v55 = vrot.slane %v338_v45, 1  ;;  %v389_v58 = vmul.f32 %v388_v53, %v2305_v14  ;;  %v320_v59 = vmax.f32 %v318_v39, %v319_v48  ;;  %v391_v62 = vstv %s2319_s15  ;;  %s2413_s15 = sld [smem:[#allocation5 + $0x505]] }
  0x52   :  { %v349_v60 = vrot.slane %v348_v51, 1  ;;  %v368_v61 = vmax.f32 %v366_v41, %v367_v52  ;;  %v330_v63 = vmax.f32 %v328_v44, %v329_v54  ;;  %v359_v1 = vrot.slane %v358_v57, 1 }
  0x53   :  { %v340_v0 = vmax.f32 %v338_v45, %v339_v55  ;;  %v392_v3 = vmul.f32 %v391_v62, %v2305_v14  ;;  %v322_v5 = vmax.f32 %v321_v43, %v320_v59  ;;  %v395_v8 = vstv %s2323_s2  ;;  %s2415_s2 = sld [smem:[#allocation5 + $0x585]] }
  0x54   :  { %v350_v6 = vmax.f32 %v348_v51, %v349_v60  ;;  %v369_v7 = vrot.slane %v368_v61, 1  ;;  %v332_v9 = vmax.f32 %v331_v49, %v330_v63  ;;  %v360_v11 = vmax.f32 %v358_v57, %v359_v1  ;;  %v443_v49 = vld [vmem:[#allocation3 + $0x18] sm:$0x7f] }
  0x55   :  { %v342_v10 = vmax.f32 %v341_v50, %v340_v0  ;;  %v396_v13 = vmul.f32 %v395_v8, %v393_v4  ;;  %323 = vst [vmem:[#allocation2] sm:$0x1] %v322_v5  ;;  %v399_v16 = vstv %s2329_s16  ;;  %v403_v17 = vstv %s2331_s17  ;;  %s2417_s16 = sld [smem:[#allocation5 + $0x306]] }
  0x56   :  { %v352_v14 = vmax.f32 %v351_v56, %v350_v6  ;;  %v370_v15 = vmax.f32 %v368_v61, %v369_v7  ;;  %333 = vst [vmem:[#allocation2 + $0x1] sm:$0x1] %v332_v9  ;;  %v362_v19 = vmax.f32 %v361_v2, %v360_v11  ;;  %v400_v21 = vmul.f32 %v399_v16, %v393_v4  ;;  %s2422_s17 = sld [smem:[#allocation5 + $0x386]] }
  0x57   :  { %343 = vst [vmem:[#allocation2 + $0x2] sm:$0x1] %v342_v10  ;;  %v397_v20 = vadd.f32 %v396_v13, %v2310_v18  ;;  %v404_v22 = vmul.f32 %v403_v17, %v393_v4  ;;  %v407_v24 = vstv %s2336_s28  ;;  %v411_v25 = vstv %s2339_s18  ;;  %s2424_s28 = sld [smem:[#allocation5 + $0x406]] }
  0x58   :  { %353 = vst [vmem:[#allocation2 + $0x3] sm:$0x1] %v352_v14  ;;  %v372_v23 = vmax.f32 %v371_v12, %v370_v15  ;;  %v415_v27 = vstv %s2341_s19  ;;  %363 = vst [vmem:[#allocation2 + $0x4] sm:$0x1] %v362_v19  ;;  %v401_v28 = vadd.f32 %v400_v21, %v2317_v26  ;;  %v408_v29 = vmul.f32 %v407_v24, %v393_v4  ;;  %v493_v21 = vld [vmem:[#allocation3 + $0x28] sm:$0x7f] }
  0x59   :  { %v405_v18 = vadd.f32 %v404_v22, %v2326_v38  ;;  %v412_v30 = vmul.f32 %v411_v25, %v393_v4  ;;  %v416_v32 = vmul.f32 %v415_v27, %v393_v4  ;;  %v420_v33 = vstv %s2344_s20  ;;  %s2429_s18 = sld [smem:[#allocation5 + $0x486]] }
  0x5a   :  { %373 = vst [vmem:[#allocation2 + $0x5] sm:$0x1] %v372_v23  ;;  %v424_v34 = vstv %s2347_s3  ;;  %v428_v35 = vstv %s2349_s21  ;;  %v409_v36 = vadd.f32 %v408_v29, %v2334_v47  ;;  %v421_v26 = vmul.f32 %v420_v33, %v418_v31  ;;  %s2431_s19 = sld [smem:[#allocation5 + $0x506]]  ;;  %s2437_s3 = sld [smem:[#allocation5 + $0x307]] }
  0x5b   :  { %v413_v37 = vadd.f32 %v412_v30, %v389_v58  ;;  %v425_v38 = vmul.f32 %v424_v34, %v418_v31  ;;  %v417_v39 = vadd.f32 %v416_v32, %v392_v3  ;;  %v429_v40 = vmul.f32 %v428_v35, %v418_v31  ;;  %v468_v3 = vld [vmem:[#allocation3 + $0x20] sm:$0x7f]  ;;  %s2433_s20 = sld [smem:[#allocation5 + $0x586]]  ;;  %s2439_s21 = sld [smem:[#allocation5 + $0x387]] }
  0x5c   :  { %v432_v41 = vstv %s2353_s22  ;;  %v436_v42 = vstv %s2355_s23  ;;  %v422_v43 = vadd.f32 %v421_v26, %v397_v20  ;;  %v440_v48 = vstv %s2357_s24  ;;  %s2441_s22 = sld [smem:[#allocation5 + $0x407]] }
  0x5d   :  { %v426_v44 = vadd.f32 %v425_v38, %v401_v28  ;;  %v433_v45 = vmul.f32 %v432_v41, %v418_v31  ;;  %v437_v46 = vmul.f32 %v436_v42, %v418_v31  ;;  %v430_v47 = vadd.f32 %v429_v40, %v405_v18  ;;  %s2446_s23 = sld [smem:[#allocation5 + $0x487]]  ;;  %v518_v42 = vld [vmem:[#allocation3 + $0x30] sm:$0x7f] }
  0x5e   :  { %v445_v50 = vstv %s2361_s25  ;;  %v449_v51 = vstv %s2363_s26  ;;  %v441_v54 = vmul.f32 %v440_v48, %v418_v31  ;;  %v453_v57 = vstv %s2366_s1  ;;  %s2448_s24 = sld [smem:[#allocation5 + $0x507]]  ;;  %s2455_s26 = sld [smem:[#allocation5 + $0x308]] }
  0x5f   :  { %v434_v52 = vadd.f32 %v433_v45, %v409_v36  ;;  %v438_v53 = vadd.f32 %v437_v46, %v413_v37  ;;  %v446_v55 = vmul.f32 %v445_v50, %v443_v49  ;;  %v450_v56 = vmul.f32 %v449_v51, %v443_v49  ;;  %s2453_s25 = sld [smem:[#allocation5 + $0x587]]  ;;  %s2457_s1 = sld [smem:[#allocation5 + $0x388]] }
  0x60   :  { %v457_v58 = vstv %s2371_s27  ;;  %v461_v59 = vstv %s2373_s29  ;;  %v442_v60 = vadd.f32 %v441_v54, %v417_v39  ;;  %v454_v62 = vmul.f32 %v453_v57, %v443_v49  ;;  %s2461_s27 = sld [smem:[#allocation5 + $0x408]] }
  0x61   :  { %v447_v61 = vadd.f32 %v446_v55, %v422_v43  ;;  %v458_v63 = vmul.f32 %v457_v58, %v443_v49  ;;  %v451_v0 = vadd.f32 %v450_v56, %v426_v44  ;;  %v462_v1 = vmul.f32 %v461_v59, %v443_v49  ;;  %s2463_s29 = sld [smem:[#allocation5 + $0x488]] }
  0x62   :  { %v465_v2 = vstv %s2380_s30  ;;  %v470_v4 = vstv %s2382_s6  ;;  %v455_v5 = vadd.f32 %v454_v62, %v430_v47  ;;  %v474_v10 = vstv %s2385_s7  ;;  %s2465_s30 = sld [smem:[#allocation5 + $0x508]]  ;;  %s2472_s7 = sld [smem:[#allocation5 + $0x309]] }
  0x63   :  { %v459_v6 = vadd.f32 %v458_v63, %v434_v52  ;;  %v466_v7 = vmul.f32 %v465_v2, %v443_v49  ;;  %v471_v8 = vmul.f32 %v470_v4, %v468_v3  ;;  %v463_v9 = vadd.f32 %v462_v1, %v438_v53  ;;  %s2470_s6 = sld [smem:[#allocation5 + $0x588]] }
  0x64   :  { %v478_v11 = vstv %s2389_s8  ;;  %v482_v12 = vstv %s2391_s9  ;;  %v475_v15 = vmul.f32 %v474_v10, %v468_v3  ;;  %v486_v19 = vstv %s2393_s10  ;;  %s2477_s8 = sld [smem:[#allocation5 + $0x389]] }
  0x65   :  { %v467_v13 = vadd.f32 %v466_v7, %v442_v60  ;;  %v472_v14 = vadd.f32 %v471_v8, %v447_v61  ;;  %v479_v16 = vmul.f32 %v478_v11, %v468_v3  ;;  %v483_v17 = vmul.f32 %v482_v12, %v468_v3  ;;  %v543_v61 = vld [vmem:[#allocation3 + $0x38] sm:$0x7f]  ;;  %s2479_s9 = sld [smem:[#allocation5 + $0x409]] }
  0x66   :  { %v490_v20 = vstv %s2398_s0  ;;  %v495_v22 = vstv %s2400_s11  ;;  %v476_v23 = vadd.f32 %v475_v15, %v451_v0  ;;  %v487_v25 = vmul.f32 %v486_v19, %v468_v3  ;;  %s2481_s10 = sld [smem:[#allocation5 + $0x489]]  ;;  %v568_v15 = vld [vmem:[#allocation3 + $0x40] sm:$0x7f] }
  0x67   :  { %v480_v24 = vadd.f32 %v479_v16, %v455_v5  ;;  %v491_v27 = vmul.f32 %v490_v20, %v468_v3  ;;  %v484_v28 = vadd.f32 %v483_v17, %v459_v6  ;;  %v496_v18 = vmul.f32 %v495_v22, %v493_v21  ;;  %s2485_s0 = sld [smem:[#allocation5 + $0x509]] }
  0x68   :  { %v499_v29 = vstv %s2405_s12  ;;  %v503_v30 = vstv %s2407_s13  ;;  %v488_v31 = vadd.f32 %v487_v25, %v463_v9  ;;  %v507_v36 = vstv %s2409_s14  ;;  %s2487_s11 = sld [smem:[#allocation5 + $0x589]]  ;;  %s2492_s12 = sld [smem:[#allocation5 + $0x600]] }
  0x69   :  { %v492_v32 = vadd.f32 %v491_v27, %v467_v13  ;;  %v500_v33 = vmul.f32 %v499_v29, %v493_v21  ;;  %v504_v34 = vmul.f32 %v503_v30, %v493_v21  ;;  %v497_v35 = vadd.f32 %v496_v18, %v472_v14  ;;  %s2494_s13 = sld [smem:[#allocation5 + $0x680]] }
  0x6a   :  { %v511_v37 = vstv %s2413_s15  ;;  %v515_v26 = vstv %s2415_s2  ;;  %v508_v40 = vmul.f32 %v507_v36, %v493_v21  ;;  %v520_v44 = vstv %s2417_s16  ;;  %s2504_s14 = sld [smem:[#allocation5 + $0x700]] }
  0x6b   :  { %v501_v38 = vadd.f32 %v500_v33, %v476_v23  ;;  %v505_v39 = vadd.f32 %v504_v34, %v480_v24  ;;  %v512_v41 = vmul.f32 %v511_v37, %v493_v21  ;;  %v516_v43 = vmul.f32 %v515_v26, %v493_v21  ;;  %v593_v33 = vld [vmem:[#allocation3 + $0x48] sm:$0x7f]  ;;  %s2511_s15 = sld [smem:[#allocation5 + $0x780]] }
  0x6c   :  { %v524_v45 = vstv %s2422_s17  ;;  %v528_v46 = vstv %s2424_s28  ;;  %v509_v47 = vadd.f32 %v508_v40, %v484_v28  ;;  %v521_v49 = vmul.f32 %v520_v44, %v518_v42  ;;  %s2518_s2 = sld [smem:[#allocation5 + $0x800]]  ;;  %s2529_s17 = sld [smem:[#allocation5 + $0x601]] }
  0x6d   :  { %v513_v48 = vadd.f32 %v512_v41, %v488_v31  ;;  %v525_v50 = vmul.f32 %v524_v45, %v518_v42  ;;  %v517_v51 = vadd.f32 %v516_v43, %v492_v32  ;;  %v529_v52 = vmul.f32 %v528_v46, %v518_v42  ;;  %s2523_s16 = sld [smem:[#allocation5 + $0x880]]  ;;  %s2534_s28 = sld [smem:[#allocation5 + $0x681]] }
  0x6e   :  { %v532_v53 = vstv %s2429_s18  ;;  %v536_v54 = vstv %s2431_s19  ;;  %v522_v55 = vadd.f32 %v521_v49, %v497_v35  ;;  %v540_v60 = vstv %s2433_s20  ;;  %s2537_s18 = sld [smem:[#allocation5 + $0x701]] }
  0x6f   :  { %v526_v56 = vadd.f32 %v525_v50, %v501_v38  ;;  %v533_v57 = vmul.f32 %v532_v53, %v518_v42  ;;  %v537_v58 = vmul.f32 %v536_v54, %v518_v42  ;;  %v530_v59 = vadd.f32 %v529_v52, %v505_v39  ;;  %v2506_v54 = vld [vmem:[#allocation3] sm:$0x7f]  ;;  %s2542_s19 = sld [smem:[#allocation5 + $0x781]] }
  0x70   :  { %v545_v62 = vstv %s2437_s3  ;;  %v549_v63 = vstv %s2439_s21  ;;  %v541_v2 = vmul.f32 %v540_v60, %v518_v42  ;;  %v553_v5 = vstv %s2441_s22  ;;  %s2545_s20 = sld [smem:[#allocation5 + $0x801]]  ;;  %s2550_s21 = sld [smem:[#allocation5 + $0x602]] }
  0x71   :  { %v534_v0 = vadd.f32 %v533_v57, %v509_v47  ;;  %v538_v1 = vadd.f32 %v537_v58, %v513_v48  ;;  %v546_v3 = vmul.f32 %v545_v62, %v543_v61  ;;  %v550_v4 = vmul.f32 %v549_v63, %v543_v61  ;;  %s2547_s3 = sld [smem:[#allocation5 + $0x881]]  ;;  %s2553_s22 = sld [smem:[#allocation5 + $0x682]] }
  0x72   :  { %v557_v6 = vstv %s2446_s23  ;;  %v561_v7 = vstv %s2448_s24  ;;  %v542_v8 = vadd.f32 %v541_v2, %v517_v51  ;;  %v554_v10 = vmul.f32 %v553_v5, %v543_v61  ;;  %s2555_s23 = sld [smem:[#allocation5 + $0x702]] }
  0x73   :  { %v547_v9 = vadd.f32 %v546_v3, %v522_v55  ;;  %v558_v11 = vmul.f32 %v557_v6, %v543_v61  ;;  %v551_v12 = vadd.f32 %v550_v4, %v526_v56  ;;  %v562_v13 = vmul.f32 %v561_v7, %v543_v61  ;;  %s2558_s24 = sld [smem:[#allocation5 + $0x782]] }
  0x74   :  { %v565_v14 = vstv %s2453_s25  ;;  %v570_v16 = vstv %s2455_s26  ;;  %v555_v17 = vadd.f32 %v554_v10, %v530_v59  ;;  %v574_v23 = vstv %s2457_s1  ;;  %s2561_s25 = sld [smem:[#allocation5 + $0x802]]  ;;  %s2566_s1 = sld [smem:[#allocation5 + $0x603]] }
  0x75   :  { %v559_v19 = vadd.f32 %v558_v11, %v534_v0  ;;  %v566_v20 = vmul.f32 %v565_v14, %v543_v61  ;;  %v571_v21 = vmul.f32 %v570_v16, %v568_v15  ;;  %v563_v22 = vadd.f32 %v562_v13, %v538_v1  ;;  %s2563_s26 = sld [smem:[#allocation5 + $0x882]] }
  0x76   :  { %v578_v24 = vstv %s2461_s27  ;;  %v582_v25 = vstv %s2463_s29  ;;  %v575_v18 = vmul.f32 %v574_v23, %v568_v15  ;;  %v586_v31 = vstv %s2465_s30  ;;  %s2569_s27 = sld [smem:[#allocation5 + $0x683]] }
  0x77   :  { %v567_v27 = vadd.f32 %v566_v20, %v542_v8  ;;  %v572_v28 = vadd.f32 %v571_v21, %v547_v9  ;;  %v579_v29 = vmul.f32 %v578_v24, %v568_v15  ;;  %v583_v30 = vmul.f32 %v582_v25, %v568_v15  ;;  %v625_v24 = vld [vmem:[#allocation2 + $0x6] sm:$0x1]  ;;  %s2571_s29 = sld [smem:[#allocation5 + $0x703]] }
  0x78   :  { %v590_v32 = vstv %s2470_s6  ;;  %v595_v34 = vstv %s2472_s7  ;;  %v576_v35 = vadd.f32 %v575_v18, %v551_v12  ;;  %v587_v37 = vmul.f32 %v586_v31, %v568_v15  ;;  %s2578_s30 = sld [smem:[#allocation5 + $0x783]] }
  0x79   :  { %v580_v36 = vadd.f32 %v579_v29, %v555_v17  ;;  %v591_v26 = vmul.f32 %v590_v32, %v568_v15  ;;  %v584_v38 = vadd.f32 %v583_v30, %v559_v19  ;;  %v596_v39 = vmul.f32 %v595_v34, %v593_v33  ;;  %v635_v30 = vld [vmem:[#allocation2 + $0x7] sm:$0x1]  ;;  %s2580_s6 = sld [smem:[#allocation5 + $0x803]] }
  0x7a   :  { %v599_v40 = vstv %s2477_s8  ;;  %v603_v41 = vstv %s2479_s9  ;;  %v588_v42 = vadd.f32 %v587_v37, %v563_v22  ;;  %v607_v47 = vstv %s2481_s10  ;;  %s2584_s7 = sld [smem:[#allocation5 + $0x883]]  ;;  %s2589_s8 = sld [smem:[#allocation5 + $0x604]] }
  0x7b   :  { %v592_v43 = vadd.f32 %v591_v26, %v567_v27  ;;  %v600_v44 = vmul.f32 %v599_v40, %v593_v33  ;;  %v604_v45 = vmul.f32 %v603_v41, %v593_v33  ;;  %v597_v46 = vadd.f32 %v596_v39, %v572_v28  ;;  %v655_v40 = vld [vmem:[#allocation2 + $0x9] sm:$0x1]  ;;  %s2591_s9 = sld [smem:[#allocation5 + $0x684]] }
  0x7c   :  { %v611_v48 = vstv %s2485_s0  ;;  %v615_v49 = vstv %s2487_s11  ;;  %v608_v52 = vmul.f32 %v607_v47, %v593_v33  ;;  %v680_v57 = vstv %s2492_s12  ;;  %s2593_s10 = sld [smem:[#allocation5 + $0x704]] }
  0x7d   :  { %v601_v50 = vadd.f32 %v600_v44, %v576_v35  ;;  %v605_v51 = vadd.f32 %v604_v45, %v580_v36  ;;  %v612_v53 = vmul.f32 %v611_v48, %v593_v33  ;;  %v616_v55 = vmul.f32 %v615_v49, %v593_v33  ;;  %v645_v35 = vld [vmem:[#allocation2 + $0x8] sm:$0x1]  ;;  %s2598_s0 = sld [smem:[#allocation5 + $0x784]] }
  0x7e   :  { %v618_v56 = vsel %vm313_vm0, %v597_v46, -inf  ;;  %v683_v58 = vstv %s2494_s13  ;;  %v609_v59 = vadd.f32 %v608_v52, %v584_v38  ;;  %v2516_v2 = vmul.f32 %v680_v57, %v2506_v54  ;;  %v675_v57 = vld [vmem:[#allocation2 + $0xb] sm:$0x1]  ;;  %s2600_s11 = sld [smem:[#allocation5 + $0x804]]  ;;  %s2607_s13 = sld [smem:[#allocation5 + $0x605]] }
  0x7f   :  { %v613_v60 = vadd.f32 %v612_v53, %v588_v42  ;;  %v619_v61 = vrot.slane %v618_v56, 4  ;;  %v628_v62 = vsel %vm313_vm0, %v601_v50, -inf  ;;  %v617_v63 = vadd.f32 %v616_v55, %v592_v43  ;;  %v697_v43 = vld [vmem:[#allocation3 + $0x8] sm:$0x7f]  ;;  %s2605_s12 = sld [smem:[#allocation5 + $0x884]] }
  0x80   :  { %v629_v0 = vrot.slane %v628_v62, 4  ;;  %v638_v1 = vsel %vm313_vm0, %v605_v51, -inf  ;;  %v648_v5 = vsel %vm313_vm0, %v609_v59, -inf  ;;  %v2526_v14 = vmul.f32 %v683_v58, %v2506_v54  ;;  %v665_v50 = vld [vmem:[#allocation2 + $0xa] sm:$0x1] }
  0x81   :  { %v620_v3 = vmax.f32 %v618_v56, %v619_v61  ;;  %v639_v4 = vrot.slane %v638_v1, 4  ;;  %v658_v6 = vsel %vm313_vm0, %v613_v60, -inf  ;;  %v649_v8 = vrot.slane %v648_v5, 4 }
  0x82   :  { %v630_v7 = vmax.f32 %v628_v62, %v629_v0  ;;  %v659_v9 = vrot.slane %v658_v6, 4  ;;  %v668_v10 = vsel %vm313_vm0, %v617_v63, -inf  ;;  %v686_v19 = vstv %s2504_s14  ;;  %s2609_s14 = sld [smem:[#allocation5 + $0x685]] }
  0x83   :  { %v621_v11 = vrot.slane %v620_v3, 2  ;;  %v640_v12 = vmax.f32 %v638_v1, %v639_v4  ;;  %v669_v13 = vrot.slane %v668_v10, 4  ;;  %v650_v16 = vmax.f32 %v648_v5, %v649_v8 }
  0x84   :  { %v631_v15 = vrot.slane %v630_v7, 2  ;;  %v660_v17 = vmax.f32 %v658_v6, %v659_v9  ;;  %v2532_v23 = vmul.f32 %v686_v19, %v2506_v54  ;;  %v689_v18 = vstv %s2511_s15  ;;  %s2613_s15 = sld [smem:[#allocation5 + $0x705]] }
  0x85   :  { %v622_v20 = vmax.f32 %v620_v3, %v621_v11  ;;  %v641_v21 = vrot.slane %v640_v12, 2  ;;  %v670_v22 = vmax.f32 %v668_v10, %v669_v13  ;;  %v651_v27 = vrot.slane %v650_v16, 2 }
  0x86   :  { %v632_v25 = vmax.f32 %v630_v7, %v631_v15  ;;  %v661_v28 = vrot.slane %v660_v17, 2  ;;  %v2540_v33 = vmul.f32 %v689_v18, %v2506_v54  ;;  %v692_v26 = vstv %s2518_s2  ;;  %v722_v7 = vld [vmem:[#allocation3 + $0x10] sm:$0x7f]  ;;  %v747_v18 = vld [vmem:[#allocation3 + $0x18] sm:$0x7f]  ;;  %s2615_s2 = sld [smem:[#allocation5 + $0x785]] }
  0x87   :  { %v623_v29 = vrot.slane %v622_v20, 1  ;;  %v642_v31 = vmax.f32 %v640_v12, %v641_v21  ;;  %v671_v32 = vrot.slane %v670_v22, 2  ;;  %v652_v36 = vmax.f32 %v650_v16, %v651_v27 }
  0x88   :  { %v633_v34 = vrot.slane %v632_v25, 1  ;;  %v662_v37 = vmax.f32 %v660_v17, %v661_v28  ;;  %v693_v42 = vmul.f32 %v692_v26, %v2506_v54  ;;  %v695_v47 = vstv %s2523_s16  ;;  %s2617_s16 = sld [smem:[#allocation5 + $0x805]] }
  0x89   :  { %v624_v38 = vmax.f32 %v622_v20, %v623_v29  ;;  %v643_v39 = vrot.slane %v642_v31, 1  ;;  %v672_v41 = vmax.f32 %v670_v22, %v671_v32  ;;  %v653_v45 = vrot.slane %v652_v36, 1 }
  0x8a   :  { %v634_v44 = vmax.f32 %v632_v25, %v633_v34  ;;  %v663_v46 = vrot.slane %v662_v37, 1  ;;  %v696_v52 = vmul.f32 %v695_v47, %v2506_v54  ;;  %v699_v58 = vstv %s2529_s17  ;;  %s2622_s17 = sld [smem:[#allocation5 + $0x885]] }
  0x8b   :  { %v626_v48 = vmax.f32 %v625_v24, %v624_v38  ;;  %v644_v49 = vmax.f32 %v642_v31, %v643_v39  ;;  %v673_v51 = vrot.slane %v672_v41, 1  ;;  %v654_v55 = vmax.f32 %v652_v36, %v653_v45 }
  0x8c   :  { %v636_v53 = vmax.f32 %v635_v30, %v634_v44  ;;  %v664_v56 = vmax.f32 %v662_v37, %v663_v46  ;;  %v700_v61 = vmul.f32 %v699_v58, %v697_v43  ;;  %v703_v62 = vstv %s2534_s28  ;;  %v772_v44 = vld [vmem:[#allocation3 + $0x20] sm:$0x7f]  ;;  %s2624_s28 = sld [smem:[#allocation5 + $0x606]] }
  0x8d   :  { %627 = vst [vmem:[#allocation2 + $0x6] sm:$0x1] %v626_v48  ;;  %v646_v59 = vmax.f32 %v645_v35, %v644_v49  ;;  %v674_v60 = vmax.f32 %v672_v41, %v673_v51  ;;  %v656_v54 = vmax.f32 %v655_v40, %v654_v55  ;;  %v704_v0 = vmul.f32 %v703_v62, %v697_v43  ;;  %v797_v62 = vld [vmem:[#allocation3 + $0x28] sm:$0x7f] }
  0x8e   :  { %637 = vst [vmem:[#allocation2 + $0x7] sm:$0x1] %v636_v53  ;;  %v666_v63 = vmax.f32 %v665_v50, %v664_v56  ;;  %v707_v1 = vstv %s2537_s18  ;;  %v701_v4 = vadd.f32 %v700_v61, %v2516_v2  ;;  %v711_v6 = vstv %s2542_s19  ;;  %s2629_s18 = sld [smem:[#allocation5 + $0x686]] }
  0x8f   :  { %647 = vst [vmem:[#allocation2 + $0x8] sm:$0x1] %v646_v59  ;;  %v676_v3 = vmax.f32 %v675_v57, %v674_v60  ;;  %v708_v5 = vmul.f32 %v707_v1, %v697_v43  ;;  %657 = vst [vmem:[#allocation2 + $0x9] sm:$0x1] %v656_v54  ;;  %v705_v8 = vadd.f32 %v704_v0, %v2526_v14  ;;  %v715_v10 = vstv %s2545_s20  ;;  %s2631_s19 = sld [smem:[#allocation5 + $0x706]] }
  0x90   :  { %667 = vst [vmem:[#allocation2 + $0xa] sm:$0x1] %v666_v63  ;;  %v712_v9 = vmul.f32 %v711_v6, %v697_v43  ;;  %v719_v11 = vstv %s2547_s3  ;;  %v716_v12 = vmul.f32 %v715_v10, %v697_v43  ;;  %v724_v15 = vstv %s2550_s21  ;;  %s2633_s20 = sld [smem:[#allocation5 + $0x786]] }
  0x91   :  { %677 = vst [vmem:[#allocation2 + $0xb] sm:$0x1] %v676_v3  ;;  %v709_v2 = vadd.f32 %v708_v5, %v2532_v23  ;;  %v720_v13 = vmul.f32 %v719_v11, %v697_v43  ;;  %v725_v16 = vmul.f32 %v724_v15, %v722_v7  ;;  %v728_v17 = vstv %s2553_s22  ;;  %s2637_s3 = sld [smem:[#allocation5 + $0x806]]  ;;  %s2641_s22 = sld [smem:[#allocation5 + $0x607]] }
  0x92   :  { %v713_v14 = vadd.f32 %v712_v9, %v2540_v33  ;;  %v732_v19 = vstv %s2555_s23  ;;  %v717_v20 = vadd.f32 %v716_v12, %v693_v42  ;;  %v729_v22 = vmul.f32 %v728_v17, %v722_v7  ;;  %s2639_s21 = sld [smem:[#allocation5 + $0x886]]  ;;  %s2646_s23 = sld [smem:[#allocation5 + $0x687]] }
  0x93   :  { %v721_v21 = vadd.f32 %v720_v13, %v696_v52  ;;  %v733_v23 = vmul.f32 %v732_v19, %v722_v7  ;;  %v726_v24 = vadd.f32 %v725_v16, %v701_v4  ;;  %v736_v25 = vstv %s2558_s24  ;;  %s2648_s24 = sld [smem:[#allocation5 + $0x707]]  ;;  %v822_v19 = vld [vmem:[#allocation3 + $0x30] sm:$0x7f] }
  0x94   :  { %v740_v27 = vstv %s2561_s25  ;;  %v744_v28 = vstv %s2563_s26  ;;  %v730_v29 = vadd.f32 %v729_v22, %v705_v8  ;;  %v737_v31 = vmul.f32 %v736_v25, %v722_v7  ;;  %s2653_s25 = sld [smem:[#allocation5 + $0x787]] }
  0x95   :  { %v734_v30 = vadd.f32 %v733_v23, %v709_v2  ;;  %v741_v32 = vmul.f32 %v740_v27, %v722_v7  ;;  %v745_v33 = vmul.f32 %v744_v28, %v722_v7  ;;  %v749_v34 = vstv %s2566_s1  ;;  %s2655_s26 = sld [smem:[#allocation5 + $0x807]] }
  0x96   :  { %v753_v35 = vstv %s2569_s27  ;;  %v757_v36 = vstv %s2571_s29  ;;  %v738_v37 = vadd.f32 %v737_v31, %v713_v14  ;;  %v750_v38 = vmul.f32 %v749_v34, %v747_v18  ;;  %s2657_s1 = sld [smem:[#allocation5 + $0x887]]  ;;  %s2661_s27 = sld [smem:[#allocation5 + $0x608]] }
  0x97   :  { %v742_v26 = vadd.f32 %v741_v32, %v717_v20  ;;  %v754_v39 = vmul.f32 %v753_v35, %v747_v18  ;;  %v746_v40 = vadd.f32 %v745_v33, %v721_v21  ;;  %v758_v41 = vmul.f32 %v757_v36, %v747_v18  ;;  %s2663_s29 = sld [smem:[#allocation5 + $0x688]] }
  0x98   :  { %v761_v42 = vstv %s2578_s30  ;;  %v765_v43 = vstv %s2580_s6  ;;  %v751_v45 = vadd.f32 %v750_v38, %v726_v24  ;;  %v769_v50 = vstv %s2584_s7  ;;  %s2665_s30 = sld [smem:[#allocation5 + $0x708]] }
  0x99   :  { %v755_v46 = vadd.f32 %v754_v39, %v730_v29  ;;  %v762_v47 = vmul.f32 %v761_v42, %v747_v18  ;;  %v766_v48 = vmul.f32 %v765_v43, %v747_v18  ;;  %v759_v49 = vadd.f32 %v758_v41, %v734_v30  ;;  %v847_v39 = vld [vmem:[#allocation3 + $0x38] sm:$0x7f]  ;;  %s2670_s6 = sld [smem:[#allocation5 + $0x788]] }
  0x9a   :  { %v774_v51 = vstv %s2589_s8  ;;  %v778_v52 = vstv %s2591_s9  ;;  %v770_v56 = vmul.f32 %v769_v50, %v747_v18  ;;  %v782_v59 = vstv %s2593_s10  ;;  %s2672_s7 = sld [smem:[#allocation5 + $0x808]]  ;;  %s2679_s9 = sld [smem:[#allocation5 + $0x609]] }
  0x9b   :  { %v763_v53 = vadd.f32 %v762_v47, %v738_v37  ;;  %v767_v55 = vadd.f32 %v766_v48, %v742_v26  ;;  %v775_v57 = vmul.f32 %v774_v51, %v772_v44  ;;  %v779_v58 = vmul.f32 %v778_v52, %v772_v44  ;;  %s2677_s8 = sld [smem:[#allocation5 + $0x888]]  ;;  %s2681_s10 = sld [smem:[#allocation5 + $0x689]] }
  0x9c   :  { %v786_v60 = vstv %s2598_s0  ;;  %v790_v61 = vstv %s2600_s11  ;;  %v771_v54 = vadd.f32 %v770_v56, %v746_v40  ;;  %v783_v0 = vmul.f32 %v782_v59, %v772_v44  ;;  %s2685_s0 = sld [smem:[#allocation5 + $0x709]] }
  0x9d   :  { %v776_v63 = vadd.f32 %v775_v57, %v751_v45  ;;  %v787_v1 = vmul.f32 %v786_v60, %v772_v44  ;;  %v780_v3 = vadd.f32 %v779_v58, %v755_v46  ;;  %v791_v4 = vmul.f32 %v790_v61, %v772_v44  ;;  %v872_v57 = vld [vmem:[#allocation3 + $0x40] sm:$0x7f]  ;;  %s2687_s11 = sld [smem:[#allocation5 + $0x789]] }
  0x9e   :  { %v794_v5 = vstv %s2605_s12  ;;  %v799_v6 = vstv %s2607_s13  ;;  %v784_v7 = vadd.f32 %v783_v0, %v759_v49  ;;  %v803_v2 = vstv %s2609_s14  ;;  %s2689_s12 = sld [smem:[#allocation5 + $0x809]]  ;;  %s2696_s14 = sld [smem:[#allocation5 + $0x900]] }
  0x9f   :  { %v788_v8 = vadd.f32 %v787_v1, %v763_v53  ;;  %v795_v9 = vmul.f32 %v794_v5, %v772_v44  ;;  %v800_v10 = vmul.f32 %v799_v6, %v797_v62  ;;  %v792_v11 = vadd.f32 %v791_v4, %v767_v55  ;;  %s2694_s13 = sld [smem:[#allocation5 + $0x889]] }
  0xa0   :  { %v807_v12 = vstv %s2613_s15  ;;  %v811_v13 = vstv %s2615_s2  ;;  %v804_v16 = vmul.f32 %v803_v2, %v797_v62  ;;  %v815_v21 = vstv %s2617_s16  ;;  %s2701_s15 = sld [smem:[#allocation5 + $0x980]] }
  0xa1   :  { %v796_v15 = vadd.f32 %v795_v9, %v771_v54  ;;  %v801_v14 = vadd.f32 %v800_v10, %v776_v63  ;;  %v808_v17 = vmul.f32 %v807_v12, %v797_v62  ;;  %v812_v20 = vmul.f32 %v811_v13, %v797_v62  ;;  %v897_v10 = vld [vmem:[#allocation3 + $0x48] sm:$0x7f]  ;;  %s2708_s2 = sld [smem:[#allocation5 + $0xa00]] }
  0xa2   :  { %v819_v22 = vstv %s2622_s17  ;;  %v824_v23 = vstv %s2624_s28  ;;  %v805_v24 = vadd.f32 %v804_v16, %v780_v3  ;;  %v816_v27 = vmul.f32 %v815_v21, %v797_v62  ;;  %s2715_s16 = sld [smem:[#allocation5 + $0xa80]] }
  0xa3   :  { %v809_v25 = vadd.f32 %v808_v17, %v784_v7  ;;  %v820_v28 = vmul.f32 %v819_v22, %v797_v62  ;;  %v813_v18 = vadd.f32 %v812_v20, %v788_v8  ;;  %v825_v29 = vmul.f32 %v824_v23, %v822_v19  ;;  %s2722_s17 = sld [smem:[#allocation5 + $0xb00]] }
  0xa4   :  { %v828_v30 = vstv %s2629_s18  ;;  %v832_v31 = vstv %s2631_s19  ;;  %v817_v32 = vadd.f32 %v816_v27, %v792_v11  ;;  %v836_v37 = vstv %s2633_s20  ;;  %s2730_s28 = sld [smem:[#allocation5 + $0xb80]]  ;;  %s2735_s18 = sld [smem:[#allocation5 + $0x901]] }
  0xa5   :  { %v821_v33 = vadd.f32 %v820_v28, %v796_v15  ;;  %v829_v34 = vmul.f32 %v828_v30, %v822_v19  ;;  %v833_v35 = vmul.f32 %v832_v31, %v822_v19  ;;  %v826_v36 = vadd.f32 %v825_v29, %v801_v14  ;;  %v2710_v31 = vld [vmem:[#allocation3] sm:$0x7f]  ;;  %s2741_s19 = sld [smem:[#allocation5 + $0x981]] }
  0xa6   :  { %v840_v26 = vstv %s2637_s3  ;;  %v844_v38 = vstv %s2639_s21  ;;  %v837_v42 = vmul.f32 %v836_v37, %v822_v19  ;;  %v849_v45 = vstv %s2641_s22  ;;  %s2747_s20 = sld [smem:[#allocation5 + $0xa01]] }
  0xa7   :  { %v830_v40 = vadd.f32 %v829_v34, %v805_v24  ;;  %v834_v41 = vadd.f32 %v833_v35, %v809_v25  ;;  %v841_v43 = vmul.f32 %v840_v26, %v822_v19  ;;  %v845_v44 = vmul.f32 %v844_v38, %v822_v19  ;;  %s2749_s3 = sld [smem:[#allocation5 + $0xa81]] }
  0xa8   :  { %v853_v46 = vstv %s2646_s23  ;;  %v857_v47 = vstv %s2648_s24  ;;  %v838_v48 = vadd.f32 %v837_v42, %v813_v18  ;;  %v850_v50 = vmul.f32 %v849_v45, %v847_v39  ;;  %s2753_s21 = sld [smem:[#allocation5 + $0xb01]]  ;;  %s2761_s23 = sld [smem:[#allocation5 + $0x902]] }
  0xa9   :  { %v842_v49 = vadd.f32 %v841_v43, %v817_v32  ;;  %v854_v51 = vmul.f32 %v853_v46, %v847_v39  ;;  %v846_v52 = vadd.f32 %v845_v44, %v821_v33  ;;  %v858_v53 = vmul.f32 %v857_v47, %v847_v39  ;;  %s2755_s22 = sld [smem:[#allocation5 + $0xb81]]  ;;  %s2763_s24 = sld [smem:[#allocation5 + $0x982]] }
  0xaa   :  { %v861_v55 = vstv %s2653_s25  ;;  %v865_v56 = vstv %s2655_s26  ;;  %v851_v58 = vadd.f32 %v850_v50, %v826_v36  ;;  %v869_v54 = vstv %s2657_s1  ;;  %s2767_s25 = sld [smem:[#allocation5 + $0xa02]] }
  0xab   :  { %v855_v59 = vadd.f32 %v854_v51, %v830_v40  ;;  %v862_v60 = vmul.f32 %v861_v55, %v847_v39  ;;  %v866_v61 = vmul.f32 %v865_v56, %v847_v39  ;;  %v859_v62 = vadd.f32 %v858_v53, %v834_v41  ;;  %s2769_s26 = sld [smem:[#allocation5 + $0xa82]] }
  0xac   :  { %v874_v63 = vstv %s2661_s27  ;;  %v878_v0 = vstv %s2663_s29  ;;  %v870_v4 = vmul.f32 %v869_v54, %v847_v39  ;;  %v882_v7 = vstv %s2665_s30  ;;  %s2773_s1 = sld [smem:[#allocation5 + $0xb02]]  ;;  %s2778_s29 = sld [smem:[#allocation5 + $0x903]] }
  0xad   :  { %v863_v1 = vadd.f32 %v862_v60, %v838_v48  ;;  %v867_v3 = vadd.f32 %v866_v61, %v842_v49  ;;  %v875_v5 = vmul.f32 %v874_v63, %v872_v57  ;;  %v879_v6 = vmul.f32 %v878_v0, %v872_v57  ;;  %s2775_s27 = sld [smem:[#allocation5 + $0xb82]]  ;;  %s2780_s30 = sld [smem:[#allocation5 + $0x983]] }
  0xae   :  { %v886_v8 = vstv %s2670_s6  ;;  %v890_v9 = vstv %s2672_s7  ;;  %v871_v11 = vadd.f32 %v870_v4, %v846_v52  ;;  %v883_v12 = vmul.f32 %v882_v7, %v872_v57  ;;  %s2785_s6 = sld [smem:[#allocation5 + $0xa03]] }
  0xaf   :  { %v876_v2 = vadd.f32 %v875_v5, %v851_v58  ;;  %v887_v13 = vmul.f32 %v886_v8, %v872_v57  ;;  %v880_v15 = vadd.f32 %v879_v6, %v855_v59  ;;  %v891_v14 = vmul.f32 %v890_v9, %v872_v57  ;;  %v929_v8 = vld [vmem:[#allocation2 + $0xc] sm:$0x1]  ;;  %s2787_s7 = sld [smem:[#allocation5 + $0xa83]] }
  0xb0   :  { %v894_v16 = vstv %s2677_s8  ;;  %v899_v17 = vstv %s2679_s9  ;;  %v884_v19 = vadd.f32 %v883_v12, %v859_v62  ;;  %v903_v24 = vstv %s2681_s10  ;;  %s2796_s8 = sld [smem:[#allocation5 + $0xb03]]  ;;  %s2806_s10 = sld [smem:[#allocation5 + $0x904]] }
  0xb1   :  { %v888_v20 = vadd.f32 %v887_v13, %v863_v1  ;;  %v895_v21 = vmul.f32 %v894_v16, %v872_v57  ;;  %v900_v22 = vmul.f32 %v899_v17, %v897_v10  ;;  %v892_v23 = vadd.f32 %v891_v14, %v867_v3  ;;  %v939_v13 = vld [vmem:[#allocation2 + $0xd] sm:$0x1]  ;;  %s2798_s9 = sld [smem:[#allocation5 + $0xb83]] }
  0xb2   :  { %v907_v25 = vstv %s2685_s0  ;;  %v911_v27 = vstv %s2687_s11  ;;  %v904_v29 = vmul.f32 %v903_v24, %v897_v10  ;;  %v915_v33 = vstv %s2689_s12  ;;  %v2751_v17 = vld [vmem:[#allocation3 + $0x8] sm:$0x7f]  ;;  %s2808_s0 = sld [smem:[#allocation5 + $0x984]] }
  0xb3   :  { %v896_v28 = vadd.f32 %v895_v21, %v871_v11  ;;  %v901_v18 = vadd.f32 %v900_v22, %v876_v2  ;;  %v908_v30 = vmul.f32 %v907_v25, %v897_v10  ;;  %v912_v32 = vmul.f32 %v911_v27, %v897_v10  ;;  %v949_v25 = vld [vmem:[#allocation2 + $0xe] sm:$0x1]  ;;  %s2811_s11 = sld [smem:[#allocation5 + $0xa04]] }
  0xb4   :  { %v919_v34 = vstv %s2694_s13  ;;  %v984_v35 = vstv %s2696_s14  ;;  %v905_v36 = vadd.f32 %v904_v29, %v880_v15  ;;  %v916_v26 = vmul.f32 %v915_v33, %v897_v10  ;;  %s2813_s12 = sld [smem:[#allocation5 + $0xa84]] }
  0xb5   :  { %v909_v37 = vadd.f32 %v908_v30, %v884_v19  ;;  %v920_v38 = vmul.f32 %v919_v34, %v897_v10  ;;  %v913_v39 = vadd.f32 %v912_v32, %v888_v20  ;;  %v922_v40 = vsel %vm313_vm0, %v901_v18, -inf  ;;  %s2817_s13 = sld [smem:[#allocation5 + $0xb04]] }
  0xb6   :  { %v2719_v41 = vmul.f32 %v984_v35, %v2710_v31  ;;  %v987_v42 = vstv %s2701_s15  ;;  %v917_v43 = vadd.f32 %v916_v26, %v892_v23  ;;  %v923_v45 = vrot.slane %v922_v40, 4  ;;  %s2819_s14 = sld [smem:[#allocation5 + $0xb84]]  ;;  %s2825_s15 = sld [smem:[#allocation5 + $0x905]] }
  0xb7   :  { %v921_v44 = vadd.f32 %v920_v38, %v896_v28  ;;  %v932_v46 = vsel %vm313_vm0, %v905_v36, -inf  ;;  %v942_v48 = vsel %vm313_vm0, %v909_v37, -inf  ;;  %v952_v49 = vsel %vm313_vm0, %v913_v39, -inf  ;;  %v959_v28 = vld [vmem:[#allocation2 + $0xf] sm:$0x1] }
  0xb8   :  { %v933_v47 = vrot.slane %v932_v46, 4  ;;  %v2728_v50 = vmul.f32 %v987_v42, %v2710_v31  ;;  %v924_v51 = vmax.f32 %v922_v40, %v923_v45  ;;  %v943_v52 = vrot.slane %v942_v48, 4  ;;  %v969_v37 = vld [vmem:[#allocation2 + $0x10] sm:$0x1]  ;;  %v979_v40 = vld [vmem:[#allocation2 + $0x11] sm:$0x1] }
  0xb9   :  { %v953_v53 = vrot.slane %v952_v49, 4  ;;  %v962_v55 = vsel %vm313_vm0, %v917_v43, -inf  ;;  %v972_v58 = vsel %vm313_vm0, %v921_v44, -inf  ;;  %v990_v59 = vstv %s2708_s2  ;;  %s2827_s2 = sld [smem:[#allocation5 + $0x985]] }
  0xba   :  { %v934_v56 = vmax.f32 %v932_v46, %v933_v47  ;;  %v963_v57 = vrot.slane %v962_v55, 4  ;;  %v925_v60 = vrot.slane %v924_v51, 2  ;;  %v944_v61 = vmax.f32 %v942_v48, %v943_v52 }
  0xbb   :  { %v954_v62 = vmax.f32 %v952_v49, %v953_v53  ;;  %v973_v54 = vrot.slane %v972_v58, 4  ;;  %v2738_v1 = vmul.f32 %v990_v59, %v2710_v31  ;;  %v993_v3 = vstv %s2715_s16  ;;  %s2831_s16 = sld [smem:[#allocation5 + $0xa05]] }
  0xbc   :  { %v935_v63 = vrot.slane %v934_v56, 2  ;;  %v964_v0 = vmax.f32 %v962_v55, %v963_v57  ;;  %v926_v4 = vmax.f32 %v924_v51, %v925_v60  ;;  %v945_v5 = vrot.slane %v944_v61, 2  ;;  %v1026_v57 = vld [vmem:[#allocation3 + $0x10] sm:$0x7f] }
  0xbd   :  { %v955_v6 = vrot.slane %v954_v62, 2  ;;  %v974_v7 = vmax.f32 %v972_v58, %v973_v54  ;;  %v2744_v11 = vmul.f32 %v993_v3, %v2710_v31  ;;  %v996_v2 = vstv %s2722_s17  ;;  %s2833_s17 = sld [smem:[#allocation5 + $0xa85]] }
  0xbe   :  { %v936_v9 = vmax.f32 %v934_v56, %v935_v63  ;;  %v965_v10 = vrot.slane %v964_v0, 2  ;;  %v927_v12 = vrot.slane %v926_v4, 1  ;;  %v946_v15 = vmax.f32 %v944_v61, %v945_v5 }
  0xbf   :  { %v956_v14 = vmax.f32 %v954_v62, %v955_v6  ;;  %v975_v16 = vrot.slane %v974_v7, 2  ;;  %v2758_v21 = vmul.f32 %v996_v2, %v2710_v31  ;;  %v999_v22 = vstv %s2730_s28  ;;  %v1051_v2 = vld [vmem:[#allocation3 + $0x18] sm:$0x7f]  ;;  %s2835_s28 = sld [smem:[#allocation5 + $0xb05]] }
  0xc0   :  { %v937_v19 = vrot.slane %v936_v9, 1  ;;  %v966_v20 = vmax.f32 %v964_v0, %v965_v10  ;;  %v928_v23 = vmax.f32 %v926_v4, %v927_v12  ;;  %v947_v24 = vrot.slane %v946_v15, 1 }
  0xc1   :  { %v957_v27 = vrot.slane %v956_v14, 1  ;;  %v976_v18 = vmax.f32 %v974_v7, %v975_v16  ;;  %v1000_v32 = vmul.f32 %v999_v22, %v2710_v31  ;;  %v1003_v33 = vstv %s2735_s18  ;;  %s2837_s18 = sld [smem:[#allocation5 + $0xb85]] }
  0xc2   :  { %v938_v29 = vmax.f32 %v936_v9, %v937_v19  ;;  %v967_v30 = vrot.slane %v966_v20, 1  ;;  %v930_v34 = vmax.f32 %v929_v8, %v928_v23  ;;  %v948_v35 = vmax.f32 %v946_v15, %v947_v24 }
  0xc3   :  { %v958_v36 = vmax.f32 %v956_v14, %v957_v27  ;;  %v977_v26 = vrot.slane %v976_v18, 1  ;;  %v1004_v42 = vmul.f32 %v1003_v33, %v2751_v17  ;;  %v1007_v43 = vstv %s2741_s19  ;;  %s2841_s19 = sld [smem:[#allocation5 + $0x906]] }
  0xc4   :  { %v940_v38 = vmax.f32 %v939_v13, %v938_v29  ;;  %v968_v39 = vmax.f32 %v966_v20, %v967_v30  ;;  %931 = vst [vmem:[#allocation2 + $0xc] sm:$0x1] %v930_v34  ;;  %v950_v31 = vmax.f32 %v949_v25, %v948_v35  ;;  %v1008_v46 = vmul.f32 %v1007_v43, %v2751_v17  ;;  %v1076_v29 = vld [vmem:[#allocation3 + $0x20] sm:$0x7f] }
  0xc5   :  { %v960_v44 = vmax.f32 %v959_v28, %v958_v36  ;;  %v978_v45 = vmax.f32 %v976_v18, %v977_v26  ;;  %v1005_v48 = vadd.f32 %v1004_v42, %v2719_v41  ;;  %v1011_v49 = vstv %s2747_s20  ;;  %s2843_s20 = sld [smem:[#allocation5 + $0x986]] }
  0xc6   :  { %941 = vst [vmem:[#allocation2 + $0xd] sm:$0x1] %v940_v38  ;;  %v970_v47 = vmax.f32 %v969_v37, %v968_v39  ;;  %v1015_v51 = vstv %s2749_s3  ;;  %951 = vst [vmem:[#allocation2 + $0xe] sm:$0x1] %v950_v31  ;;  %v1009_v53 = vadd.f32 %v1008_v46, %v2728_v50  ;;  %v1012_v55 = vmul.f32 %v1011_v49, %v2751_v17  ;;  %v1101_v46 = vld [vmem:[#allocation3 + $0x28] sm:$0x7f] }
  0xc7   :  { %961 = vst [vmem:[#allocation2 + $0xf] sm:$0x1] %v960_v44  ;;  %v980_v52 = vmax.f32 %v979_v40, %v978_v45  ;;  %v1016_v56 = vmul.f32 %v1015_v51, %v2751_v17  ;;  %v1019_v41 = vstv %s2753_s21  ;;  %v1023_v58 = vstv %s2755_s22  ;;  %s2849_s3 = sld [smem:[#allocation5 + $0xa06]] }
  0xc8   :  { %971 = vst [vmem:[#allocation2 + $0x10] sm:$0x1] %v970_v47  ;;  %v1028_v59 = vstv %s2761_s23  ;;  %v1032_v60 = vstv %s2763_s24  ;;  %v1013_v61 = vadd.f32 %v1012_v55, %v2738_v1  ;;  %v1020_v62 = vmul.f32 %v1019_v41, %v2751_v17  ;;  %s2851_s21 = sld [smem:[#allocation5 + $0xa86]]  ;;  %s2859_s24 = sld [smem:[#allocation5 + $0x907]] }
  0xc9   :  { %981 = vst [vmem:[#allocation2 + $0x11] sm:$0x1] %v980_v52  ;;  %v1017_v50 = vadd.f32 %v1016_v56, %v2744_v11  ;;  %v1024_v54 = vmul.f32 %v1023_v58, %v2751_v17  ;;  %v1029_v63 = vmul.f32 %v1028_v59, %v1026_v57  ;;  %v1033_v0 = vmul.f32 %v1032_v60, %v1026_v57  ;;  %s2855_s22 = sld [smem:[#allocation5 + $0xb06]] }
  0xca   :  { %v1036_v3 = vstv %s2767_s25  ;;  %v1040_v4 = vstv %s2769_s26  ;;  %v1021_v5 = vadd.f32 %v1020_v62, %v2758_v21  ;;  %v1044_v10 = vstv %s2773_s1  ;;  %s2857_s23 = sld [smem:[#allocation5 + $0xb86]]  ;;  %s2861_s25 = sld [smem:[#allocation5 + $0x987]] }
  0xcb   :  { %v1025_v6 = vadd.f32 %v1024_v54, %v1000_v32  ;;  %v1037_v1 = vmul.f32 %v1036_v3, %v1026_v57  ;;  %v1041_v7 = vmul.f32 %v1040_v4, %v1026_v57  ;;  %v1030_v8 = vadd.f32 %v1029_v63, %v1005_v48  ;;  %s2865_s26 = sld [smem:[#allocation5 + $0xa07]]  ;;  %v1126_v4 = vld [vmem:[#allocation3 + $0x30] sm:$0x7f] }
  0xcc   :  { %v1034_v9 = vadd.f32 %v1033_v0, %v1009_v53  ;;  %v1048_v11 = vstv %s2775_s27  ;;  %v1045_v15 = vmul.f32 %v1044_v10, %v1026_v57  ;;  %v1053_v16 = vstv %s2778_s29  ;;  %s2867_s1 = sld [smem:[#allocation5 + $0xa87]] }
  0xcd   :  { %v1038_v12 = vadd.f32 %v1037_v1, %v1013_v61  ;;  %v1042_v13 = vadd.f32 %v1041_v7, %v1017_v50  ;;  %v1049_v14 = vmul.f32 %v1048_v11, %v1026_v57  ;;  %v1057_v17 = vstv %s2780_s30  ;;  %s2873_s27 = sld [smem:[#allocation5 + $0xb07]]  ;;  %s2879_s30 = sld [smem:[#allocation5 + $0x908]] }
  0xce   :  { %v1061_v19 = vstv %s2785_s6  ;;  %v1065_v20 = vstv %s2787_s7  ;;  %v1046_v21 = vadd.f32 %v1045_v15, %v1021_v5  ;;  %v1054_v23 = vmul.f32 %v1053_v16, %v1051_v2  ;;  %s2875_s29 = sld [smem:[#allocation5 + $0xb87]]  ;;  %s2881_s6 = sld [smem:[#allocation5 + $0x988]] }
  0xcf   :  { %v1050_v22 = vadd.f32 %v1049_v14, %v1025_v6  ;;  %v1058_v24 = vmul.f32 %v1057_v17, %v1051_v2  ;;  %v1062_v25 = vmul.f32 %v1061_v19, %v1051_v2  ;;  %v1066_v27 = vmul.f32 %v1065_v20, %v1051_v2  ;;  %s2883_s7 = sld [smem:[#allocation5 + $0xa08]] }
  0xd0   :  { %v1069_v28 = vstv %s2796_s8  ;;  %v1073_v18 = vstv %s2798_s9  ;;  %v1055_v30 = vadd.f32 %v1054_v23, %v1030_v8  ;;  %v1078_v37 = vstv %s2806_s10  ;;  %s2885_s8 = sld [smem:[#allocation5 + $0xa88]] }
  0xd1   :  { %v1059_v32 = vadd.f32 %v1058_v24, %v1034_v9  ;;  %v1070_v33 = vmul.f32 %v1069_v28, %v1051_v2  ;;  %v1074_v34 = vmul.f32 %v1073_v18, %v1051_v2  ;;  %v1063_v35 = vadd.f32 %v1062_v25, %v1038_v12  ;;  %v1151_v24 = vld [vmem:[#allocation3 + $0x38] sm:$0x7f]  ;;  %s2889_s9 = sld [smem:[#allocation5 + $0xb08]] }
  0xd2   :  { %v1067_v36 = vadd.f32 %v1066_v27, %v1042_v13  ;;  %v1082_v26 = vstv %s2808_s0  ;;  %v1079_v40 = vmul.f32 %v1078_v37, %v1076_v29  ;;  %v1086_v43 = vstv %s2811_s11  ;;  %s2891_s10 = sld [smem:[#allocation5 + $0xb88]]  ;;  %s2897_s0 = sld [smem:[#allocation5 + $0x909]] }
  0xd3   :  { %v1071_v38 = vadd.f32 %v1070_v33, %v1046_v21  ;;  %v1075_v39 = vadd.f32 %v1074_v34, %v1050_v22  ;;  %v1083_v42 = vmul.f32 %v1082_v26, %v1076_v29  ;;  %v1090_v31 = vstv %s2813_s12  ;;  %s2899_s11 = sld [smem:[#allocation5 + $0x989]] }
  0xd4   :  { %v1094_v44 = vstv %s2817_s13  ;;  %v1098_v45 = vstv %s2819_s14  ;;  %v1080_v47 = vadd.f32 %v1079_v40, %v1055_v30  ;;  %v1087_v49 = vmul.f32 %v1086_v43, %v1076_v29  ;;  %s2903_s12 = sld [smem:[#allocation5 + $0xa09]] }
  0xd5   :  { %v1084_v48 = vadd.f32 %v1083_v42, %v1059_v32  ;;  %v1091_v51 = vmul.f32 %v1090_v31, %v1076_v29  ;;  %v1095_v52 = vmul.f32 %v1094_v44, %v1076_v29  ;;  %v1099_v53 = vmul.f32 %v1098_v45, %v1076_v29  ;;  %v1176_v42 = vld [vmem:[#allocation3 + $0x40] sm:$0x7f]  ;;  %s2905_s13 = sld [smem:[#allocation5 + $0xa89]] }
  0xd6   :  { %v1103_v55 = vstv %s2825_s15  ;;  %v1107_v56 = vstv %s2827_s2  ;;  %v1088_v57 = vadd.f32 %v1087_v49, %v1063_v35  ;;  %v1111_v50 = vstv %s2831_s16  ;;  %s2907_s14 = sld [smem:[#allocation5 + $0xb09]]  ;;  %s2913_s2 = sld [smem:[#allocation5 + $0xc00]] }
  0xd7   :  { %v1092_v41 = vadd.f32 %v1091_v51, %v1067_v36  ;;  %v1104_v58 = vmul.f32 %v1103_v55, %v1101_v46  ;;  %v1108_v59 = vmul.f32 %v1107_v56, %v1101_v46  ;;  %v1096_v60 = vadd.f32 %v1095_v52, %v1071_v38  ;;  %s2909_s15 = sld [smem:[#allocation5 + $0xb89]]  ;;  %s2915_s16 = sld [smem:[#allocation5 + $0xc80]] }
  0xd8   :  { %v1100_v61 = vadd.f32 %v1099_v53, %v1075_v39  ;;  %v1115_v62 = vstv %s2833_s17  ;;  %v1112_v0 = vmul.f32 %v1111_v50, %v1101_v46  ;;  %v1119_v5 = vstv %s2835_s28  ;;  %s2923_s17 = sld [smem:[#allocation5 + $0xd00]] }
  0xd9   :  { %v1105_v54 = vadd.f32 %v1104_v58, %v1080_v47  ;;  %v1109_v63 = vadd.f32 %v1108_v59, %v1084_v48  ;;  %v1116_v3 = vmul.f32 %v1115_v62, %v1101_v46  ;;  %v1123_v6 = vstv %s2837_s18  ;;  %v1201_v59 = vld [vmem:[#allocation3 + $0x48] sm:$0x7f]  ;;  %s2925_s28 = sld [smem:[#allocation5 + $0xd80]] }
  0xda   :  { %v1128_v1 = vstv %s2841_s19  ;;  %v1132_v7 = vstv %s2843_s20  ;;  %v1113_v8 = vadd.f32 %v1112_v0, %v1088_v57  ;;  %v1120_v10 = vmul.f32 %v1119_v5, %v1101_v46  ;;  %s2933_s18 = sld [smem:[#allocation5 + $0xe00]]  ;;  %s2947_s20 = sld [smem:[#allocation5 + $0xc01]] }
  0xdb   :  { %v1117_v9 = vadd.f32 %v1116_v3, %v1092_v41  ;;  %v1124_v11 = vmul.f32 %v1123_v6, %v1101_v46  ;;  %v1129_v2 = vmul.f32 %v1128_v1, %v1126_v4  ;;  %v1133_v12 = vmul.f32 %v1132_v7, %v1126_v4  ;;  %s2935_s19 = sld [smem:[#allocation5 + $0xe80]] }
  0xdc   :  { %v1136_v13 = vstv %s2849_s3  ;;  %v1140_v15 = vstv %s2851_s21  ;;  %v1121_v14 = vadd.f32 %v1120_v10, %v1096_v60  ;;  %v1144_v22 = vstv %s2855_s22  ;;  %s2949_s3 = sld [smem:[#allocation5 + $0xc81]] }
  0xdd   :  { %v1125_v16 = vadd.f32 %v1124_v11, %v1100_v61  ;;  %v1137_v17 = vmul.f32 %v1136_v13, %v1126_v4  ;;  %v1141_v19 = vmul.f32 %v1140_v15, %v1126_v4  ;;  %v1130_v20 = vadd.f32 %v1129_v2, %v1105_v54  ;;  %v1286_v15 = vld [vmem:[#allocation3] sm:$0x7f]  ;;  %s2961_s21 = sld [smem:[#allocation5 + $0xd01]] }
  0xde   :  { %v1134_v21 = vadd.f32 %v1133_v12, %v1109_v63  ;;  %v1148_v23 = vstv %s2857_s23  ;;  %v1145_v28 = vmul.f32 %v1144_v22, %v1126_v4  ;;  %v1153_v29 = vstv %s2859_s24  ;;  %s2963_s22 = sld [smem:[#allocation5 + $0xd81]] }
  0xdf   :  { %v1138_v25 = vadd.f32 %v1137_v17, %v1113_v8  ;;  %v1142_v27 = vadd.f32 %v1141_v19, %v1117_v9  ;;  %v1149_v18 = vmul.f32 %v1148_v23, %v1126_v4  ;;  %v1157_v30 = vstv %s2861_s25  ;;  %s2969_s23 = sld [smem:[#allocation5 + $0xe01]]  ;;  %s2973_s25 = sld [smem:[#allocation5 + $0xc02]] }
  0xe0   :  { %v1161_v32 = vstv %s2865_s26  ;;  %v1165_v33 = vstv %s2867_s1  ;;  %v1146_v34 = vadd.f32 %v1145_v28, %v1121_v14  ;;  %v1154_v36 = vmul.f32 %v1153_v29, %v1151_v24  ;;  %s2971_s24 = sld [smem:[#allocation5 + $0xe81]]  ;;  %s2975_s26 = sld [smem:[#allocation5 + $0xc82]] }
  0xe1   :  { %v1150_v35 = vadd.f32 %v1149_v18, %v1125_v16  ;;  %v1158_v37 = vmul.f32 %v1157_v30, %v1151_v24  ;;  %v1162_v26 = vmul.f32 %v1161_v32, %v1151_v24  ;;  %v1166_v38 = vmul.f32 %v1165_v33, %v1151_v24  ;;  %s2979_s1 = sld [smem:[#allocation5 + $0xd02]] }
  0xe2   :  { %v1169_v39 = vstv %s2873_s27  ;;  %v1173_v40 = vstv %s2875_s29  ;;  %v1155_v43 = vadd.f32 %v1154_v36, %v1130_v20  ;;  %v1178_v48 = vstv %s2879_s30  ;;  %s2981_s27 = sld [smem:[#allocation5 + $0xd82]] }
  0xe3   :  { %v1159_v31 = vadd.f32 %v1158_v37, %v1134_v21  ;;  %v1170_v44 = vmul.f32 %v1169_v39, %v1151_v24  ;;  %v1174_v45 = vmul.f32 %v1173_v40, %v1151_v24  ;;  %v1163_v46 = vadd.f32 %v1162_v26, %v1138_v25  ;;  %s2985_s29 = sld [smem:[#allocation5 + $0xe02]] }
  0xe4   :  { %v1167_v47 = vadd.f32 %v1166_v38, %v1142_v27  ;;  %v1182_v49 = vstv %s2881_s6  ;;  %v1179_v53 = vmul.f32 %v1178_v48, %v1176_v42  ;;  %v1186_v56 = vstv %s2883_s7  ;;  %s2987_s30 = sld [smem:[#allocation5 + $0xe82]]  ;;  %s2991_s6 = sld [smem:[#allocation5 + $0xc03]] }
  0xe5   :  { %v1171_v51 = vadd.f32 %v1170_v44, %v1146_v34  ;;  %v1175_v52 = vadd.f32 %v1174_v45, %v1150_v35  ;;  %v1183_v55 = vmul.f32 %v1182_v49, %v1176_v42  ;;  %v1190_v57 = vstv %s2885_s8  ;;  %s2993_s7 = sld [smem:[#allocation5 + $0xc83]] }
  0xe6   :  { %v1194_v41 = vstv %s2889_s9  ;;  %v1198_v58 = vstv %s2891_s10  ;;  %v1180_v60 = vadd.f32 %v1179_v53, %v1155_v43  ;;  %v1187_v50 = vmul.f32 %v1186_v56, %v1176_v42  ;;  %s2997_s8 = sld [smem:[#allocation5 + $0xd03]] }
  0xe7   :  { %v1184_v61 = vadd.f32 %v1183_v55, %v1159_v31  ;;  %v1191_v62 = vmul.f32 %v1190_v57, %v1176_v42  ;;  %v1195_v54 = vmul.f32 %v1194_v41, %v1176_v42  ;;  %v1199_v63 = vmul.f32 %v1198_v58, %v1176_v42  ;;  %v2959_v41 = vld [vmem:[#allocation3 + $0x8] sm:$0x7f]  ;;  %v1233_v58 = vld [vmem:[#allocation2 + $0x12] sm:$0x1]  ;;  %s2999_s9 = sld [smem:[#allocation5 + $0xd83]] }
  0xe8   :  { %v1203_v0 = vstv %s2897_s0  ;;  %v1207_v3 = vstv %s2899_s11  ;;  %v1188_v4 = vadd.f32 %v1187_v50, %v1163_v46  ;;  %v1211_v9 = vstv %s2903_s12  ;;  %s3007_s10 = sld [smem:[#allocation5 + $0xe03]]  ;;  %s3013_s11 = sld [smem:[#allocation5 + $0xc04]] }
  0xe9   :  { %v1192_v5 = vadd.f32 %v1191_v62, %v1167_v47  ;;  %v1204_v6 = vmul.f32 %v1203_v0, %v1201_v59  ;;  %v1208_v1 = vmul.f32 %v1207_v3, %v1201_v59  ;;  %v1196_v7 = vadd.f32 %v1195_v54, %v1171_v51  ;;  %v1243_v3 = vld [vmem:[#allocation2 + $0x13] sm:$0x1]  ;;  %s3009_s0 = sld [smem:[#allocation5 + $0xe83]]  ;;  %s3015_s12 = sld [smem:[#allocation5 + $0xc84]] }
  0xea   :  { %v1200_v8 = vadd.f32 %v1199_v63, %v1175_v52  ;;  %v1215_v10 = vstv %s2905_s13  ;;  %v1212_v12 = vmul.f32 %v1211_v9, %v1201_v59  ;;  %v1219_v14 = vstv %s2907_s14  ;;  %s3023_s13 = sld [smem:[#allocation5 + $0xd04]] }
  0xeb   :  { %v1205_v11 = vadd.f32 %v1204_v6, %v1180_v60  ;;  %v1209_v2 = vadd.f32 %v1208_v1, %v1184_v61  ;;  %v1216_v13 = vmul.f32 %v1215_v10, %v1201_v59  ;;  %v1223_v16 = vstv %s2909_s15  ;;  %s3025_s14 = sld [smem:[#allocation5 + $0xd84]] }
  0xec   :  { %v1288_v17 = vstv %s2913_s2  ;;  %v1291_v19 = vstv %s2915_s16  ;;  %v1213_v20 = vadd.f32 %v1212_v12, %v1188_v4  ;;  %v1220_v22 = vmul.f32 %v1219_v14, %v1201_v59  ;;  %v1253_v4 = vld [vmem:[#allocation2 + $0x14] sm:$0x1]  ;;  %s3029_s15 = sld [smem:[#allocation5 + $0xe04]]  ;;  %s3037_s16 = sld [smem:[#allocation5 + $0xc05]] }
  0xed   :  { %v1217_v21 = vadd.f32 %v1216_v13, %v1192_v5  ;;  %v1224_v23 = vmul.f32 %v1223_v16, %v1201_v59  ;;  %v1226_v24 = vsel %vm313_vm0, %v1205_v11, -inf  ;;  %v1236_v25 = vsel %vm313_vm0, %v1209_v2, -inf  ;;  %v1263_v2 = vld [vmem:[#allocation2 + $0x15] sm:$0x1]  ;;  %s3031_s2 = sld [smem:[#allocation5 + $0xe84]] }
  0xee   :  { %v2939_v27 = vmul.f32 %v1288_v17, %v1286_v15  ;;  %v2941_v28 = vmul.f32 %v1291_v19, %v1286_v15  ;;  %v1221_v18 = vadd.f32 %v1220_v22, %v1196_v7  ;;  %v1227_v30 = vrot.slane %v1226_v24, 4 }
  0xef   :  { %v1225_v29 = vadd.f32 %v1224_v23, %v1200_v8  ;;  %v1237_v32 = vrot.slane %v1236_v25, 4  ;;  %v1246_v33 = vsel %vm313_vm0, %v1213_v20, -inf  ;;  %v1256_v34 = vsel %vm313_vm0, %v1217_v21, -inf  ;;  %v1273_v21 = vld [vmem:[#allocation2 + $0x16] sm:$0x1] }
  0xf0   :  { %v1294_v35 = vstv %s2923_s17  ;;  %v1297_v36 = vstv %s2925_s28  ;;  %v1228_v37 = vmax.f32 %v1226_v24, %v1227_v30  ;;  %v1247_v38 = vrot.slane %v1246_v33, 4  ;;  %v1283_v30 = vld [vmem:[#allocation2 + $0x17] sm:$0x1]  ;;  %s3039_s17 = sld [smem:[#allocation5 + $0xc85]] }
  0xf1   :  { %v1238_v26 = vmax.f32 %v1236_v25, %v1237_v32  ;;  %v1257_v39 = vrot.slane %v1256_v34, 4  ;;  %v1266_v40 = vsel %vm313_vm0, %v1221_v18, -inf  ;;  %v1276_v42 = vsel %vm313_vm0, %v1225_v29, -inf  ;;  %s3041_s28 = sld [smem:[#allocation5 + $0xd05]] }
  0xf2   :  { %v2953_v43 = vmul.f32 %v1294_v35, %v1286_v15  ;;  %v2955_v31 = vmul.f32 %v1297_v36, %v1286_v15  ;;  %v1229_v44 = vrot.slane %v1228_v37, 2  ;;  %v1248_v46 = vmax.f32 %v1246_v33, %v1247_v38  ;;  %v1330_v36 = vld [vmem:[#allocation3 + $0x10] sm:$0x7f] }
  0xf3   :  { %v1239_v45 = vrot.slane %v1238_v26, 2  ;;  %v1258_v47 = vmax.f32 %v1256_v34, %v1257_v39  ;;  %v1267_v48 = vrot.slane %v1266_v40, 4  ;;  %v1277_v49 = vrot.slane %v1276_v42, 4 }
  0xf4   :  { %v1300_v51 = vstv %s2933_s18  ;;  %v1303_v52 = vstv %s2935_s19  ;;  %v1230_v53 = vmax.f32 %v1228_v37, %v1229_v44  ;;  %v1249_v56 = vrot.slane %v1248_v46, 2  ;;  %s3043_s18 = sld [smem:[#allocation5 + $0xd85]] }
  0xf5   :  { %v1240_v55 = vmax.f32 %v1238_v26, %v1239_v45  ;;  %v1259_v57 = vrot.slane %v1258_v47, 2  ;;  %v1268_v59 = vmax.f32 %v1266_v40, %v1267_v48  ;;  %v1278_v60 = vmax.f32 %v1276_v42, %v1277_v49  ;;  %s3049_s19 = sld [smem:[#allocation5 + $0xe05]] }
  0xf6   :  { %v2965_v61 = vmul.f32 %v1300_v51, %v1286_v15  ;;  %v2967_v50 = vmul.f32 %v1303_v52, %v1286_v15  ;;  %v1231_v62 = vrot.slane %v1230_v53, 1  ;;  %v1250_v63 = vmax.f32 %v1248_v46, %v1249_v56 }
  0xf7   :  { %v1241_v54 = vrot.slane %v1240_v55, 1  ;;  %v1260_v0 = vmax.f32 %v1258_v47, %v1259_v57  ;;  %v1269_v5 = vrot.slane %v1268_v59, 2  ;;  %v1279_v6 = vrot.slane %v1278_v60, 2 }
  0xf8   :  { %v1307_v1 = vstv %s2947_s20  ;;  %v1311_v7 = vstv %s2949_s3  ;;  %v1232_v8 = vmax.f32 %v1230_v53, %v1231_v62  ;;  %v1251_v10 = vrot.slane %v1250_v63, 1  ;;  %v1355_v62 = vld [vmem:[#allocation3 + $0x18] sm:$0x7f]  ;;  %s3051_s20 = sld [smem:[#allocation5 + $0xe85]]  ;;  %s3053_s3 = sld [smem:[#allocation5 + $0xc06]] }
  0xf9   :  { %v1242_v9 = vmax.f32 %v1240_v55, %v1241_v54  ;;  %v1261_v11 = vrot.slane %v1260_v0, 1  ;;  %v1270_v12 = vmax.f32 %v1268_v59, %v1269_v5  ;;  %v1280_v13 = vmax.f32 %v1278_v60, %v1279_v6 }
  0xfa   :  { %v1308_v15 = vmul.f32 %v1307_v1, %v2959_v41  ;;  %v1312_v14 = vmul.f32 %v1311_v7, %v2959_v41  ;;  %v1234_v16 = vmax.f32 %v1233_v58, %v1232_v8  ;;  %v1252_v19 = vmax.f32 %v1250_v63, %v1251_v10 }
  0xfb   :  { %v1244_v17 = vmax.f32 %v1243_v3, %v1242_v9  ;;  %v1262_v20 = vmax.f32 %v1260_v0, %v1261_v11  ;;  %v1271_v22 = vrot.slane %v1270_v12, 1  ;;  %v1281_v23 = vrot.slane %v1280_v13, 1  ;;  %v1380_v9 = vld [vmem:[#allocation3 + $0x20] sm:$0x7f] }
  0xfc   :  { %v1309_v24 = vadd.f32 %v1308_v15, %v2939_v27  ;;  %v1313_v25 = vadd.f32 %v1312_v14, %v2941_v28  ;;  %1235 = vst [vmem:[#allocation2 + $0x12] sm:$0x1] %v1234_v16  ;;  %v1254_v18 = vmax.f32 %v1253_v4, %v1252_v19  ;;  %v1315_v32 = vstv %s2961_s21  ;;  %s3055_s21 = sld [smem:[#allocation5 + $0xc86]] }
  0xfd   :  { %1245 = vst [vmem:[#allocation2 + $0x13] sm:$0x1] %v1244_v17  ;;  %v1264_v29 = vmax.f32 %v1263_v2, %v1262_v20  ;;  %v1319_v33 = vstv %s2963_s22  ;;  %v1272_v27 = vmax.f32 %v1270_v12, %v1271_v22  ;;  %v1282_v28 = vmax.f32 %v1280_v13, %v1281_v23  ;;  %s3061_s22 = sld [smem:[#allocation5 + $0xd06]] }
  0xfe   :  { %v1316_v34 = vmul.f32 %v1315_v32, %v2959_v41  ;;  %v1320_v35 = vmul.f32 %v1319_v33, %v2959_v41  ;;  %1255 = vst [vmem:[#allocation2 + $0x14] sm:$0x1] %v1254_v18  ;;  %v1323_v37 = vstv %s2969_s23  ;;  %v1327_v26 = vstv %s2971_s24  ;;  %s3063_s23 = sld [smem:[#allocation5 + $0xd86]] }
  0xff   :  { %1265 = vst [vmem:[#allocation2 + $0x15] sm:$0x1] %v1264_v29  ;;  %v1332_v38 = vstv %s2973_s25  ;;  %v1336_v39 = vstv %s2975_s26  ;;  %v1274_v40 = vmax.f32 %v1273_v21, %v1272_v27  ;;  %v1284_v42 = vmax.f32 %v1283_v30, %v1282_v28  ;;  %s3065_s24 = sld [smem:[#allocation5 + $0xe06]]  ;;  %s3073_s26 = sld [smem:[#allocation5 + $0xc07]] }
 0x100   :  { %v1317_v44 = vadd.f32 %v1316_v34, %v2953_v43  ;;  %v1321_v45 = vadd.f32 %v1320_v35, %v2955_v31  ;;  %v1324_v46 = vmul.f32 %v1323_v37, %v2959_v41  ;;  %v1328_v47 = vmul.f32 %v1327_v26, %v2959_v41  ;;  %s3067_s25 = sld [smem:[#allocation5 + $0xe86]]  ;;  %v1405_v35 = vld [vmem:[#allocation3 + $0x28] sm:$0x7f] }
 0x101   :  { %v1333_v48 = vmul.f32 %v1332_v38, %v1330_v36  ;;  %v1337_v49 = vmul.f32 %v1336_v39, %v1330_v36  ;;  %1275 = vst [vmem:[#allocation2 + $0x16] sm:$0x1] %v1274_v40  ;;  %1285 = vst [vmem:[#allocation2 + $0x17] sm:$0x1] %v1284_v42  ;;  %v1340_v51 = vstv %s2979_s1  ;;  %v1344_v52 = vstv %s2981_s27  ;;  %s3075_s1 = sld [smem:[#allocation5 + $0xc87]] }
 0x102   :  { %v1348_v53 = vstv %s2985_s29  ;;  %v1352_v43 = vstv %s2987_s30  ;;  %v1325_v31 = vadd.f32 %v1324_v46, %v2965_v61  ;;  %v1329_v55 = vadd.f32 %v1328_v47, %v2967_v50  ;;  %s3077_s27 = sld [smem:[#allocation5 + $0xd07]] }
 0x103   :  { %v1334_v56 = vadd.f32 %v1333_v48, %v1309_v24  ;;  %v1338_v57 = vadd.f32 %v1337_v49, %v1313_v25  ;;  %v1341_v41 = vmul.f32 %v1340_v51, %v1330_v36  ;;  %v1345_v58 = vmul.f32 %v1344_v52, %v1330_v36  ;;  %s3079_s29 = sld [smem:[#allocation5 + $0xd87]]  ;;  %v1430_v49 = vld [vmem:[#allocation3 + $0x30] sm:$0x7f] }
 0x104   :  { %v1349_v59 = vmul.f32 %v1348_v53, %v1330_v36  ;;  %v1353_v60 = vmul.f32 %v1352_v43, %v1330_v36  ;;  %v1357_v54 = vstv %s2991_s6  ;;  %v1361_v63 = vstv %s2993_s7  ;;  %s3085_s30 = sld [smem:[#allocation5 + $0xe07]]  ;;  %s3089_s7 = sld [smem:[#allocation5 + $0xc08]] }
 0x105   :  { %v1365_v0 = vstv %s2997_s8  ;;  %v1369_v3 = vstv %s2999_s9  ;;  %v1342_v61 = vadd.f32 %v1341_v41, %v1317_v44  ;;  %v1346_v50 = vadd.f32 %v1345_v58, %v1321_v45  ;;  %s3087_s6 = sld [smem:[#allocation5 + $0xe87]]  ;;  %s3091_s8 = sld [smem:[#allocation5 + $0xc88]] }
 0x106   :  { %v1350_v4 = vadd.f32 %v1349_v59, %v1325_v31  ;;  %v1354_v5 = vadd.f32 %v1353_v60, %v1329_v55  ;;  %v1358_v6 = vmul.f32 %v1357_v54, %v1355_v62  ;;  %v1362_v1 = vmul.f32 %v1361_v63, %v1355_v62  ;;  %s3097_s9 = sld [smem:[#allocation5 + $0xd08]] }
 0x107   :  { %v1366_v7 = vmul.f32 %v1365_v0, %v1355_v62  ;;  %v1370_v8 = vmul.f32 %v1369_v3, %v1355_v62  ;;  %v1373_v10 = vstv %s3007_s10  ;;  %v1377_v11 = vstv %s3009_s0  ;;  %s3099_s10 = sld [smem:[#allocation5 + $0xd88]] }
 0x108   :  { %v1382_v2 = vstv %s3013_s11  ;;  %v1386_v12 = vstv %s3015_s12  ;;  %v1359_v13 = vadd.f32 %v1358_v6, %v1334_v56  ;;  %v1363_v15 = vadd.f32 %v1362_v1, %v1338_v57  ;;  %s3101_s0 = sld [smem:[#allocation5 + $0xe08]]  ;;  %s3109_s12 = sld [smem:[#allocation5 + $0xc09]] }
 0x109   :  { %v1367_v14 = vadd.f32 %v1366_v7, %v1342_v61  ;;  %v1371_v16 = vadd.f32 %v1370_v8, %v1346_v50  ;;  %v1374_v17 = vmul.f32 %v1373_v10, %v1355_v62  ;;  %v1378_v19 = vmul.f32 %v1377_v11, %v1355_v62  ;;  %s3103_s11 = sld [smem:[#allocation5 + $0xe88]]  ;;  %v1455_v8 = vld [vmem:[#allocation3 + $0x38] sm:$0x7f] }
 0x10a   :  { %v1383_v20 = vmul.f32 %v1382_v2, %v1380_v9  ;;  %v1387_v21 = vmul.f32 %v1386_v12, %v1380_v9  ;;  %v1390_v22 = vstv %s3023_s13  ;;  %v1394_v23 = vstv %s3025_s14  ;;  %s3111_s13 = sld [smem:[#allocation5 + $0xc89]] }
 0x10b   :  { %v1398_v24 = vstv %s3029_s15  ;;  %v1402_v25 = vstv %s3031_s2  ;;  %v1375_v18 = vadd.f32 %v1374_v17, %v1350_v4  ;;  %v1379_v29 = vadd.f32 %v1378_v19, %v1354_v5  ;;  %s3113_s14 = sld [smem:[#allocation5 + $0xd09]] }
 0x10c   :  { %v1384_v30 = vadd.f32 %v1383_v20, %v1359_v13  ;;  %v1388_v32 = vadd.f32 %v1387_v21, %v1363_v15  ;;  %v1391_v33 = vmul.f32 %v1390_v22, %v1380_v9  ;;  %v1395_v27 = vmul.f32 %v1394_v23, %v1380_v9  ;;  %s3115_s15 = sld [smem:[#allocation5 + $0xd89]]  ;;  %v1480_v21 = vld [vmem:[#allocation3 + $0x40] sm:$0x7f] }
 0x10d   :  { %v1399_v28 = vmul.f32 %v1398_v24, %v1380_v9  ;;  %v1403_v34 = vmul.f32 %v1402_v25, %v1380_v9  ;;  %v1407_v36 = vstv %s3037_s16  ;;  %v1411_v37 = vstv %s3039_s17  ;;  %s3121_s2 = sld [smem:[#allocation5 + $0xe09]] }
 0x10e   :  { %v1415_v26 = vstv %s3041_s28  ;;  %v1419_v38 = vstv %s3043_s18  ;;  %v1392_v39 = vadd.f32 %v1391_v33, %v1367_v14  ;;  %v1396_v40 = vadd.f32 %v1395_v27, %v1371_v16  ;;  %s3123_s16 = sld [smem:[#allocation5 + $0xe89]] }
 0x10f   :  { %v1400_v42 = vadd.f32 %v1399_v28, %v1375_v18  ;;  %v1404_v44 = vadd.f32 %v1403_v34, %v1379_v29  ;;  %v1408_v45 = vmul.f32 %v1407_v36, %v1405_v35  ;;  %v1412_v46 = vmul.f32 %v1411_v37, %v1405_v35 }
 0x110   :  { %v1416_v47 = vmul.f32 %v1415_v26, %v1405_v35  ;;  %v1420_v48 = vmul.f32 %v1419_v38, %v1405_v35  ;;  %v1423_v51 = vstv %s3049_s19  ;;  %v1427_v52 = vstv %s3051_s20 }
 0x111   :  { %v1432_v53 = vstv %s3053_s3  ;;  %v1436_v43 = vstv %s3055_s21  ;;  %v1409_v31 = vadd.f32 %v1408_v45, %v1384_v30  ;;  %v1413_v55 = vadd.f32 %v1412_v46, %v1388_v32 }
 0x112   :  { %v1417_v56 = vadd.f32 %v1416_v47, %v1392_v39  ;;  %v1421_v57 = vadd.f32 %v1420_v48, %v1396_v40  ;;  %v1424_v41 = vmul.f32 %v1423_v51, %v1405_v35  ;;  %v1428_v58 = vmul.f32 %v1427_v52, %v1405_v35  ;;  %v1505_v48 = vld [vmem:[#allocation3 + $0x48] sm:$0x7f] }
 0x113   :  { %v1433_v59 = vmul.f32 %v1432_v53, %v1430_v49  ;;  %v1437_v60 = vmul.f32 %v1436_v43, %v1430_v49  ;;  %v1440_v62 = vstv %s3061_s22  ;;  %v1444_v54 = vstv %s3063_s23 }
 0x114   :  { %v1448_v63 = vstv %s3065_s24  ;;  %v1452_v0 = vstv %s3067_s25  ;;  %v1425_v3 = vadd.f32 %v1424_v41, %v1400_v42  ;;  %v1429_v61 = vadd.f32 %v1428_v58, %v1404_v44 }
 0x115   :  { %v1434_v50 = vadd.f32 %v1433_v59, %v1409_v31  ;;  %v1438_v4 = vadd.f32 %v1437_v60, %v1413_v55  ;;  %v1441_v5 = vmul.f32 %v1440_v62, %v1430_v49  ;;  %v1445_v6 = vmul.f32 %v1444_v54, %v1430_v49 }
 0x116   :  { %v1449_v1 = vmul.f32 %v1448_v63, %v1430_v49  ;;  %v1453_v7 = vmul.f32 %v1452_v0, %v1430_v49  ;;  %v1457_v9 = vstv %s3073_s26  ;;  %v1461_v10 = vstv %s3075_s1 }
 0x117   :  { %v1465_v11 = vstv %s3077_s27  ;;  %v1469_v2 = vstv %s3079_s29  ;;  %v1442_v12 = vadd.f32 %v1441_v5, %v1417_v56  ;;  %v1446_v13 = vadd.f32 %v1445_v6, %v1421_v57 }
 0x118   :  { %v1450_v15 = vadd.f32 %v1449_v1, %v1425_v3  ;;  %v1454_v14 = vadd.f32 %v1453_v7, %v1429_v61  ;;  %v1458_v16 = vmul.f32 %v1457_v9, %v1455_v8  ;;  %v1462_v17 = vmul.f32 %v1461_v10, %v1455_v8 }
 0x119   :  { %v1466_v19 = vmul.f32 %v1465_v11, %v1455_v8  ;;  %v1470_v20 = vmul.f32 %v1469_v2, %v1455_v8  ;;  %v1473_v22 = vstv %s3085_s30  ;;  %v1477_v23 = vstv %s3087_s6 }
 0x11a   :  { %v1482_v24 = vstv %s3089_s7  ;;  %v1486_v25 = vstv %s3091_s8  ;;  %v1459_v18 = vadd.f32 %v1458_v16, %v1434_v50  ;;  %v1463_v29 = vadd.f32 %v1462_v17, %v1438_v4 }
 0x11b   :  { %v1467_v30 = vadd.f32 %v1466_v19, %v1442_v12  ;;  %v1471_v32 = vadd.f32 %v1470_v20, %v1446_v13  ;;  %v1474_v33 = vmul.f32 %v1473_v22, %v1455_v8  ;;  %v1478_v27 = vmul.f32 %v1477_v23, %v1455_v8 }
 0x11c   :  { %v1483_v28 = vmul.f32 %v1482_v24, %v1480_v21  ;;  %v1487_v34 = vmul.f32 %v1486_v25, %v1480_v21  ;;  %v1490_v35 = vstv %s3097_s9  ;;  %v1494_v36 = vstv %s3099_s10 }
 0x11d   :  { %v1498_v37 = vstv %s3101_s0  ;;  %v1502_v26 = vstv %s3103_s11  ;;  %v1475_v38 = vadd.f32 %v1474_v33, %v1450_v15  ;;  %v1479_v39 = vadd.f32 %v1478_v27, %v1454_v14 }
 0x11e   :  { %v1484_v40 = vadd.f32 %v1483_v28, %v1459_v18  ;;  %v1488_v42 = vadd.f32 %v1487_v34, %v1463_v29  ;;  %v1491_v44 = vmul.f32 %v1490_v35, %v1480_v21  ;;  %v1495_v45 = vmul.f32 %v1494_v36, %v1480_v21  ;;  %v1537_v36 = vld [vmem:[#allocation2 + $0x18] sm:$0x1] }
 0x11f   :  { %v1499_v46 = vmul.f32 %v1498_v37, %v1480_v21  ;;  %v1503_v47 = vmul.f32 %v1502_v26, %v1480_v21  ;;  %v1507_v49 = vstv %s3109_s12  ;;  %v1511_v51 = vstv %s3111_s13  ;;  %v1547_v37 = vld [vmem:[#allocation2 + $0x19] sm:$0x1] }
 0x120   :  { %v1515_v52 = vstv %s3113_s14  ;;  %v1519_v53 = vstv %s3115_s15  ;;  %v1492_v43 = vadd.f32 %v1491_v44, %v1467_v30  ;;  %v1496_v31 = vadd.f32 %v1495_v45, %v1471_v32  ;;  %v1557_v45 = vld [vmem:[#allocation2 + $0x1a] sm:$0x1] }
 0x121   :  { %v1508_v55 = vmul.f32 %v1507_v49, %v1505_v48  ;;  %v1512_v56 = vmul.f32 %v1511_v51, %v1505_v48  ;;  %v1516_v57 = vmul.f32 %v1515_v52, %v1505_v48  ;;  %v1520_v41 = vmul.f32 %v1519_v53, %v1505_v48 }
 0x122   :  { %v1500_v58 = vadd.f32 %v1499_v46, %v1475_v38  ;;  %v1504_v59 = vadd.f32 %v1503_v47, %v1479_v39  ;;  %v1523_v60 = vstv %s3121_s2  ;;  %v1527_v62 = vstv %s3123_s16  ;;  %v1567_v46 = vld [vmem:[#allocation2 + $0x1b] sm:$0x1] }
 0x123   :  { %v1509_v54 = vadd.f32 %v1508_v55, %v1484_v40  ;;  %v1513_v63 = vadd.f32 %v1512_v56, %v1488_v42  ;;  %v1517_v0 = vadd.f32 %v1516_v57, %v1492_v43  ;;  %v1521_v3 = vadd.f32 %v1520_v41, %v1496_v31  ;;  %v1577_v43 = vld [vmem:[#allocation2 + $0x1c] sm:$0x1]  ;;  %v1587_v31 = vld [vmem:[#allocation2 + $0x1d] sm:$0x1]  ;;  %v1616_v55 = vpop.permute.xlu0 %1615 }
 0x124   :  { %v1524_v61 = vmul.f32 %v1523_v60, %v1505_v48  ;;  %v1528_v50 = vmul.f32 %v1527_v62, %v1505_v48  ;;  %vm1622_vm1 = vcmask 1045504  }
 0x125   :  { %v1530_v4 = vsel %vm313_vm0, %v1509_v54, -inf  ;;  %v1540_v5 = vsel %vm313_vm0, %v1513_v63, -inf  ;;  %v1550_v6 = vsel %vm313_vm0, %v1517_v0, -inf  ;;  %v1560_v1 = vsel %vm313_vm0, %v1521_v3, -inf  ;;  %v1590_v63 = vld [vmem:[#allocation2] sm:$0xff]  ;;  %v1591_v3 = vld [vmem:[#allocation2 + $0x8] sm:$0xff] }
 0x126   :  { %v1525_v7 = vadd.f32 %v1524_v61, %v1500_v58  ;;  %v1529_v8 = vadd.f32 %v1528_v50, %v1504_v59  ;;  %v1531_v9 = vrot.slane %v1530_v4, 4  ;;  %v1541_v10 = vrot.slane %v1540_v5, 4  ;;  %v1606_v59 = vpop.permute.xlu1 %1605  ;;  %v1592_v61 = vld [vmem:[#allocation2 + $0x10] sm:$0xff] }
 0x127   :  { %v1551_v11 = vrot.slane %v1550_v6, 4  ;;  %v1561_v2 = vrot.slane %v1560_v1, 4  ;;  %v1601_v54 = vpop.permute.xlu0 %1600 }
 0x128   :  { %v1532_v12 = vmax.f32 %v1530_v4, %v1531_v9  ;;  %v1542_v13 = vmax.f32 %v1540_v5, %v1541_v10  ;;  %v1570_v15 = vsel %vm313_vm0, %v1525_v7, -inf  ;;  %v1580_v14 = vsel %vm313_vm0, %v1529_v8, -inf }
 0x129   :  { %v1552_v16 = vmax.f32 %v1550_v6, %v1551_v11  ;;  %v1562_v17 = vmax.f32 %v1560_v1, %v1561_v2  ;;  %v1571_v19 = vrot.slane %v1570_v15, 4  ;;  %v1581_v20 = vrot.slane %v1580_v14, 4 }
 0x12a   :  { %v1533_v21 = vrot.slane %v1532_v12, 2  ;;  %v1543_v22 = vrot.slane %v1542_v13, 2  ;;  %v1611_v0 = vpop.permute.xlu1 %1610  ;;  %v1618_v50 = vadd.f32 %v1601_v54, %v1590_v63  ;;  %v1619_v5 = vadd.f32 %v1606_v59, %v1591_v3 }
 0x12b   :  { %v1553_v23 = vrot.slane %v1552_v16, 2  ;;  %v1563_v24 = vrot.slane %v1562_v17, 2  ;;  %v1572_v25 = vmax.f32 %v1570_v15, %v1571_v19  ;;  %v1582_v18 = vmax.f32 %v1580_v14, %v1581_v20 }
 0x12c   :  { %v1534_v29 = vmax.f32 %v1532_v12, %v1533_v21  ;;  %v1544_v30 = vmax.f32 %v1542_v13, %v1543_v22  ;;  %v1620_v6 = vadd.f32 %v1611_v0, %v1592_v61  ;;  %v1624_v7 = vmax.f32 %v1618_v50, %v1619_v5 }
 0x12d   :  { %v1554_v32 = vmax.f32 %v1552_v16, %v1553_v23  ;;  %v1564_v33 = vmax.f32 %v1562_v17, %v1563_v24  ;;  %v1573_v27 = vrot.slane %v1572_v25, 2  ;;  %v1583_v28 = vrot.slane %v1582_v18, 2 }
 0x12e   :  { %v1535_v34 = vrot.slane %v1534_v29, 1  ;;  %v1545_v35 = vrot.slane %v1544_v30, 1  ;;  %v1696_v59 = vstv %s3154_s4 }
 0x12f   :  { %v1555_v26 = vrot.slane %v1554_v32, 1  ;;  %v1565_v38 = vrot.slane %v1564_v33, 1  ;;  %v1574_v39 = vmax.f32 %v1572_v25, %v1573_v27  ;;  %v1584_v40 = vmax.f32 %v1582_v18, %v1583_v28  ;;  %v1667_v25 = vpop.permute.xlu1 %1666  ;;  %v1662_v18 = vpop.permute.xlu0 %1661 }
 0x130   :  { %v1536_v42 = vmax.f32 %v1534_v29, %v1535_v34  ;;  %v1546_v44 = vmax.f32 %v1544_v30, %v1545_v35 }
 0x131   :  { %v1556_v47 = vmax.f32 %v1554_v32, %v1555_v26  ;;  %v1566_v48 = vmax.f32 %v1564_v33, %v1565_v38  ;;  %v1575_v49 = vrot.slane %v1574_v39, 1  ;;  %v1585_v51 = vrot.slane %v1584_v40, 1 }
 0x132   :  { %v1538_v52 = vmax.f32 %v1537_v36, %v1536_v42  ;;  %v1548_v53 = vmax.f32 %v1547_v37, %v1546_v44 }
 0x133   :  { %v1558_v56 = vmax.f32 %v1557_v45, %v1556_v47  ;;  %v1568_v57 = vmax.f32 %v1567_v46, %v1566_v48  ;;  %v1576_v41 = vmax.f32 %v1574_v39, %v1575_v49  ;;  %v1586_v58 = vmax.f32 %v1584_v40, %v1585_v51  ;;  %v1677_v35 = vpop.permute.xlu1 %1676  ;;  %v1672_v36 = vpop.permute.xlu0 %1671 }
 0x134   :  { %1539 = vst [vmem:[#allocation2 + $0x18] sm:$0x1] %v1538_v52  ;;  %1549 = vst [vmem:[#allocation2 + $0x19] sm:$0x1] %v1548_v53 }
 0x135   :  { %1559 = vst [vmem:[#allocation2 + $0x1a] sm:$0x1] %v1558_v56  ;;  %1569 = vst [vmem:[#allocation2 + $0x1b] sm:$0x1] %v1568_v57  ;;  %v1578_v60 = vmax.f32 %v1577_v43, %v1576_v41  ;;  %v1588_v62 = vmax.f32 %v1587_v31, %v1586_v58 }
 0x137   :  { %1579 = vst [vmem:[#allocation2 + $0x1c] sm:$0x1] %v1578_v60  ;;  %1589 = vst [vmem:[#allocation2 + $0x1d] sm:$0x1] %v1588_v62 }
 0x13e   :  { %v1593_v4 = vld [vmem:[#allocation2 + $0x18] sm:$0x3f] }
 0x13f   :  { %v1621_v1 = vadd.f32 %v1616_v55, %v1593_v4 }
 0x141   :  { %v1623_v8 = vsel %vm1622_vm1, %v1621_v1, -inf }
 0x142   :  { %v1625_v9 = vmax.f32 %v1620_v6, %v1623_v8 }
 0x144   :  { %v1626_v10 = vmax.f32 %v1624_v7, %v1625_v9 }
 0x146   :  { %v1627_v11 = vrot.slane %v1626_v10, 4 }
 0x148   :  { %v1628_v2 = vmax.f32 %v1626_v10, %v1627_v11 }
 0x14a   :  { %v1629_v12 = vrot.slane %v1628_v2, 2 }
 0x14c   :  { %v1630_v13 = vmax.f32 %v1628_v2, %v1629_v12 }
 0x14e   :  { %v1631_v15 = vrot.slane %v1630_v13, 1 }
 0x150   :  { %v1632_v14 = vmax.f32 %v1630_v13, %v1631_v15 }
 0x152   :  { %v1633_v16 = vsub.f32 %v1618_v50, %v1632_v14  ;;  %v1634_v17 = vsub.f32 %v1619_v5, %v1632_v14  ;;  %v1635_v19 = vsub.f32 %v1620_v6, %v1632_v14  ;;  %v1636_v20 = vsub.f32 %v1621_v1, %v1632_v14 }
 0x154   :  { %v1637_v21 = vmul.f32 1.442695, %v1633_v16  ;;  %v1639_v22 = vmul.f32 1.442695, %v1634_v17  ;;  %v1641_v23 = vmul.f32 1.442695, %v1635_v19 }
 0x155   :  { %v1643_v24 = vmul.f32 1.442695, %v1636_v20 }
 0x156   :  { %2010 = vpow2.f32 %v1637_v21 }
 0x157   :  { %2012 = vpow2.f32 %v1639_v22 }
 0x158   :  { %2014 = vpow2.f32 %v1641_v23 }
 0x159   :  { %2016 = vpow2.f32 %v1643_v24 }
 0x160   :  { %v2011_v29 = vpop.eup %2010 }
 0x161   :  { %v2013_v30 = vpop.eup %2012  ;;  %v1679_v32 = vmul.f32 %v2011_v29, %v1662_v18 }
 0x162   :  { %v2015_v33 = vpop.eup %2014  ;;  %v1645_v27 = vadd.f32 %v2013_v30, %v2011_v29  ;;  %v1680_v28 = vmul.f32 %v2013_v30, %v1667_v25 }
 0x163   :  { %v2017_v34 = vpop.eup %2016  ;;  %v1681_v26 = vmul.f32 %v2015_v33, %v1672_v36 }
 0x164   :  { %v1646_v37 = vadd.f32 %v2015_v33, %v1645_v27  ;;  %v1682_v38 = vmul.f32 %v2017_v34, %v1677_v35  ;;  %v1683_v39 = vadd.f32 %v1680_v28, %v1679_v32  ;;  %v1647_v40 = vsel %vm1622_vm1, %v2017_v34, 0.0 }
 0x166   :  { %v1648_v42 = vadd.f32 %v1647_v40, %v1646_v37  ;;  %v1684_v44 = vadd.f32 %v1683_v39, %v1681_v26  ;;  %v1685_v45 = vsel %vm1622_vm1, %v1682_v38, 0.0 }
 0x168   :  { %v1649_v46 = vrot.slane %v1648_v42, 4  ;;  %v1686_v47 = vadd.f32 %v1685_v45, %v1684_v44 }
 0x16a   :  { %v1650_v48 = vadd.f32 %v1649_v46, %v1648_v42  ;;  %v1687_v49 = vrot.slane %v1686_v47, 4 }
 0x16c   :  { %v1651_v51 = vrot.slane %v1650_v48, 2  ;;  %v1688_v52 = vadd.f32 %v1687_v49, %v1686_v47 }
 0x16e   :  { %v1652_v53 = vadd.f32 %v1651_v51, %v1650_v48  ;;  %v1689_v31 = vrot.slane %v1688_v52, 2 }
 0x170   :  { %v1653_v43 = vrot.slane %v1652_v53, 1  ;;  %v1690_v56 = vadd.f32 %v1689_v31, %v1688_v52 }
 0x172   :  { %v1654_v55 = vadd.f32 %v1653_v43, %v1652_v53  ;;  %v1691_v57 = vrot.slane %v1690_v56, 1 }
 0x174   :  { %2018 = vrcp.f32 %v1654_v55  ;;  %v1692_v41 = vadd.f32 %v1691_v57, %v1690_v56 }
 0x17e   :  { %v2019_v58 = vpop.eup %2018 }
 0x17f   :  { %v1694_v60 = vmul.f32 %v2019_v58, %v1692_v41 }
 0x181   :  { %v1697_v62 = vadd.f32 %v1696_v59, %v1694_v60 }
 0x183   :  { %1698 = vst [vmem:[%s3155_s5] sm:$0x1] %v1697_v62 }
 0x184   :  { %1703 = vsyncpa [#allocation6], 1 }

</bundles_post_ra>
